<compile_context>
chip_gen: v5e
topology: v5e:2x2
jax: 0.10.0
libtpu: 0.0.40
codegen_flags: <defaults>
</compile_context>

<pallas_src>
import jax
import jax.numpy as jnp
from jax.experimental import pallas as pl
from jax.experimental.pallas import tpu as pltpu

NEG_SLOPE = 0.2   # LeakyReLU(0.2)
LANE = 128        # TPU lane width; all channel dims are padded to this.


def _double_conv_kernel(x_ref, w1_ref, b1_ref, w2_ref, b2_ref, o_ref, xpad):
    """One batch element, both convs fused.

    x_ref : (1, H, W, CP)   channel-padded input tile (CP = 128)
    w*_ref: (9*CP, CP)      im2col weight slab, row index = tap*CP + cin
    b*_ref: (1, CP)         zero-padded bias
    o_ref : (1, H, W, CP)   channel-padded output tile (lane-dense store)
    xpad  : (H+2, W+2, CP)  VMEM halo scratch, reused by both convs
    """
    _, H, W, CP = x_ref.shape

    # In-kernel 'same' padding: zero the halo scratch, drop the tile into its interior.
    xpad[...] = jnp.zeros_like(xpad)
    xpad[1:H + 1, 1:W + 1, :] = x_ref[0]

    def conv3x3_lrelu(w_ref, b_ref):
        # im2col: one (H*W, 9*CP) x (9*CP, CP) MXU matmul instead of 9 skinny ones.
        cols = [
            xpad[dy:dy + H, dx:dx + W, :].reshape(H * W, CP)
            for dy in range(3) for dx in range(3)
        ]
        patch = jnp.concatenate(cols, axis=1)                     # (H*W, 9*CP)
        acc = jnp.dot(patch, w_ref[...],
                      preferred_element_type=jnp.float32)         # (H*W, CP)
        acc = acc + b_ref[...]                                    # (1, CP) broadcast
        return jnp.where(acc >= 0, acc, NEG_SLOPE * acc)          # LeakyReLU(0.2)

    mid = conv3x3_lrelu(w1_ref, b1_ref)                           # stays in VMEM
    # Second conv reuses the same halo scratch (its border is still zero).
    xpad[1:H + 1, 1:W + 1, :] = mid.reshape(H, W, CP)
    out = conv3x3_lrelu(w2_ref, b2_ref)

    o_ref[...] = out.reshape(1, H, W, CP).astype(o_ref.dtype)


def _pack_params(params):
    """Pad channels to the lane width and flatten weights into im2col slabs."""
    def w_slab(w9):                                  # (9, Cin, Cout) -> (9*CP, CP)
        _, cin, cout = w9.shape
        assert cin <= LANE and cout <= LANE
        w = jnp.zeros((9, LANE, LANE), w9.dtype).at[:, :cin, :cout].set(w9)
        return w.reshape(9 * LANE, LANE)

    def b_pad(b):                                    # (C,) -> (1, CP)
        return jnp.zeros((1, LANE), b.dtype).at[0, :b.shape[0]].set(b)

    return (w_slab(params["w1"]), b_pad(params["b1"]),
            w_slab(params["w2"]), b_pad(params["b2"]))


def double_conv(x_nchw, params):
    """Forward pass of DoubleConv; input/output are NCHW like the PyTorch module."""
    N, Cin, H, W = x_nchw.shape
    Cout = params["w2"].shape[2]
    assert Cin <= LANE
    w1p, b1p, w2p, b2p = _pack_params(params)

    # One-time layout glue at the model boundary: NCHW -> NHWC, pad C to lane width.
    x = jnp.transpose(x_nchw, (0, 2, 3, 1))
    x = jnp.pad(x, ((0, 0), (0, 0), (0, 0), (0, LANE - Cin)))

    out = pl.pallas_call(
        _double_conv_kernel,
        out_shape=jax.ShapeDtypeStruct((N, H, W, LANE), x.dtype),
        grid=(N,),
        in_specs=[
            pl.BlockSpec((1, H, W, LANE), lambda n: (n, 0, 0, 0)),
            pl.BlockSpec((9 * LANE, LANE), lambda n: (0, 0)),
            pl.BlockSpec((1, LANE), lambda n: (0, 0)),
            pl.BlockSpec((9 * LANE, LANE), lambda n: (0, 0)),
            pl.BlockSpec((1, LANE), lambda n: (0, 0)),
        ],
        out_specs=pl.BlockSpec((1, H, W, LANE), lambda n: (n, 0, 0, 0)),
        scratch_shapes=[pltpu.VMEM((H + 2, W + 2, LANE), jnp.float32)],
        compiler_params=pltpu.CompilerParams(
            dimension_semantics=("parallel",)),   # shards batch across v7x's 2 TCs
    )(x, w1p, b1p, w2p, b2p)

    # Kernel stores lane-dense (CP=128); strip channel padding and go back to NCHW.
    return jnp.transpose(out[..., :Cout], (0, 3, 1, 2))


def init_double_conv_params(key, in_channels, out_channels, mid_channels=None):
    """Deterministic synthetic parameters (matches nn.Conv2d shapes, tap-major)."""
    if not mid_channels:
        mid_channels = out_channels
    k1, k2, k3, k4 = jax.random.split(key, 4)
    s1 = 1.0 / jnp.sqrt(in_channels * 9.0)
    s2 = 1.0 / jnp.sqrt(mid_channels * 9.0)
    return {
        "w1": jax.random.uniform(k1, (9, in_channels, mid_channels),
                                 jnp.float32, -s1, s1),
        "b1": jax.random.uniform(k2, (mid_channels,), jnp.float32, -s1, s1),
        "w2": jax.random.uniform(k3, (9, mid_channels, out_channels),
                                 jnp.float32, -s2, s2),
        "b2": jax.random.uniform(k4, (out_channels,), jnp.float32, -s2, s2),
    }


def ref_forward(x, params):
    """Plain-JAX (lax.conv) reference, NCHW, f32."""
    def conv(x, w9, b):
        w = jnp.transpose(w9.reshape(3, 3, w9.shape[1], w9.shape[2]), (3, 2, 0, 1))
        y = jax.lax.conv_general_dilated(
            x, w, window_strides=(1, 1), padding=((1, 1), (1, 1)),
            dimension_numbers=("NCHW", "OIHW", "NCHW"))
        y = y + b.reshape(1, -1, 1, 1)
        return jnp.where(y >= 0, y, NEG_SLOPE * y)
    y = conv(x, params["w1"], params["b1"])
    return conv(y, params["w2"], params["b2"])


if __name__ == "__main__":
    key = jax.random.PRNGKey(0)
    k_x, k_p = jax.random.split(key)

    N, Cin, H, W = 2, 4, 16, 16
    Cout = 8
    x = jax.random.normal(k_x, (N, Cin, H, W), jnp.float32)
    params = init_double_conv_params(k_p, Cin, Cout)

    out = jax.block_until_ready(double_conv(x, params))
    assert out.shape == (N, Cout, H, W), out.shape

    ref = jax.block_until_ready(ref_forward(x, params))
    # Tolerance slightly looser than 1e-5 only to absorb MXU accumulation-order
    # differences of the single K=1152 im2col matmul vs. lax.conv (still pure f32).
    assert jnp.allclose(out, ref, atol=1e-4, rtol=1e-4), \
        float(jnp.max(jnp.abs(out - ref)))

    print("KERNEL_OK")
</pallas_src>

<mosaic_0001>
module attributes {stable_mosaic.version = 11 : i64} {
  func.func @_double_conv_kernel(%arg0: i32, %arg1: memref<1x16x16x128xf32, #tpu.memory_space<vmem>>, %arg2: memref<1152x128xf32, #tpu.memory_space<vmem>>, %arg3: memref<1x128xf32, #tpu.memory_space<vmem>>, %arg4: memref<1152x128xf32, #tpu.memory_space<vmem>>, %arg5: memref<1x128xf32, #tpu.memory_space<vmem>>, %arg6: memref<1x16x16x128xf32, #tpu.memory_space<vmem>>, %arg7: memref<18x18x128xf32, #tpu.memory_space<vmem>>) attributes {dimension_semantics = [#tpu.dimension_semantics<parallel>], iteration_bounds = array<i64: 2>, scalar_prefetch = 0 : i64, scratch_operands = 1 : i64, tpu.core_type = #tpu.core_type<tc>, window_params = [{transform_indices = @transform_0, window_bounds = array<i64: 1, 16, 16, 128>}, {pipeline_mode = #tpu.pipeline_mode<synchronous>, transform_indices = @transform_1, window_bounds = array<i64: 1152, 128>}, {pipeline_mode = #tpu.pipeline_mode<synchronous>, transform_indices = @transform_2, window_bounds = array<i64: 1, 128>}, {pipeline_mode = #tpu.pipeline_mode<synchronous>, transform_indices = @transform_3, window_bounds = array<i64: 1152, 128>}, {pipeline_mode = #tpu.pipeline_mode<synchronous>, transform_indices = @transform_4, window_bounds = array<i64: 1, 128>}, {transform_indices = @transform_5, window_bounds = array<i64: 1, 16, 16, 128>}]} {
    %cst = arith.constant 0.000000e+00 : f32
    %0 = vector.broadcast %cst : f32 to vector<18x18x128xf32>
    %c0 = arith.constant 0 : index
    %c0_0 = arith.constant 0 : index
    %c0_1 = arith.constant 0 : index
    %1 = vector.load %arg7[%c0, %c0_0, %c0_1] : memref<18x18x128xf32, #tpu.memory_space<vmem>>, vector<18x18x128xf32>
    tpu.vector_store %arg7[%c0, %c0_0, %c0_1], %0 {strides = array<i32>} : memref<18x18x128xf32, #tpu.memory_space<vmem>>, vector<18x18x128xf32>,
    %c0_2 = arith.constant 0 : index
    %c0_3 = arith.constant 0 : index
    %c0_4 = arith.constant 0 : index
    %c0_5 = arith.constant 0 : index
    %2 = vector.load %arg1[%c0_2, %c0_3, %c0_4, %c0_5] : memref<1x16x16x128xf32, #tpu.memory_space<vmem>>, vector<1x16x16x128xf32>
    %3 = vector.shape_cast %2 : vector<1x16x16x128xf32> to vector<16x16x128xf32>
    %c1 = arith.constant 1 : index
    %c1_6 = arith.constant 1 : index
    %c0_7 = arith.constant 0 : index
    %4 = vector.load %arg7[%c1, %c1_6, %c0_7] : memref<18x18x128xf32, #tpu.memory_space<vmem>>, vector<16x16x128xf32>
    tpu.vector_store %arg7[%c1, %c1_6, %c0_7], %3 {strides = array<i32>} : memref<18x18x128xf32, #tpu.memory_space<vmem>>, vector<16x16x128xf32>,
    %c0_8 = arith.constant 0 : index
    %c0_9 = arith.constant 0 : index
    %c0_10 = arith.constant 0 : index
    %5 = vector.load %arg7[%c0_8, %c0_9, %c0_10] : memref<18x18x128xf32, #tpu.memory_space<vmem>>, vector<16x16x128xf32>
    %6 = vector.shape_cast %5 : vector<16x16x128xf32> to vector<256x128xf32>
    %c0_11 = arith.constant 0 : index
    %c1_12 = arith.constant 1 : index
    %c0_13 = arith.constant 0 : index
    %7 = vector.load %arg7[%c0_11, %c1_12, %c0_13] : memref<18x18x128xf32, #tpu.memory_space<vmem>>, vector<16x16x128xf32>
    %8 = vector.shape_cast %7 : vector<16x16x128xf32> to vector<256x128xf32>
    %c0_14 = arith.constant 0 : index
    %c2 = arith.constant 2 : index
    %c0_15 = arith.constant 0 : index
    %9 = vector.load %arg7[%c0_14, %c2, %c0_15] : memref<18x18x128xf32, #tpu.memory_space<vmem>>, vector<16x16x128xf32>
    %10 = vector.shape_cast %9 : vector<16x16x128xf32> to vector<256x128xf32>
    %c1_16 = arith.constant 1 : index
    %c0_17 = arith.constant 0 : index
    %c0_18 = arith.constant 0 : index
    %11 = vector.load %arg7[%c1_16, %c0_17, %c0_18] : memref<18x18x128xf32, #tpu.memory_space<vmem>>, vector<16x16x128xf32>
    %12 = vector.shape_cast %11 : vector<16x16x128xf32> to vector<256x128xf32>
    %c1_19 = arith.constant 1 : index
    %c1_20 = arith.constant 1 : index
    %c0_21 = arith.constant 0 : index
    %13 = vector.load %arg7[%c1_19, %c1_20, %c0_21] : memref<18x18x128xf32, #tpu.memory_space<vmem>>, vector<16x16x128xf32>
    %14 = vector.shape_cast %13 : vector<16x16x128xf32> to vector<256x128xf32>
    %c1_22 = arith.constant 1 : index
    %c2_23 = arith.constant 2 : index
    %c0_24 = arith.constant 0 : index
    %15 = vector.load %arg7[%c1_22, %c2_23, %c0_24] : memref<18x18x128xf32, #tpu.memory_space<vmem>>, vector<16x16x128xf32>
    %16 = vector.shape_cast %15 : vector<16x16x128xf32> to vector<256x128xf32>
    %c2_25 = arith.constant 2 : index
    %c0_26 = arith.constant 0 : index
    %c0_27 = arith.constant 0 : index
    %17 = vector.load %arg7[%c2_25, %c0_26, %c0_27] : memref<18x18x128xf32, #tpu.memory_space<vmem>>, vector<16x16x128xf32>
    %18 = vector.shape_cast %17 : vector<16x16x128xf32> to vector<256x128xf32>
    %c2_28 = arith.constant 2 : index
    %c1_29 = arith.constant 1 : index
    %c0_30 = arith.constant 0 : index
    %19 = vector.load %arg7[%c2_28, %c1_29, %c0_30] : memref<18x18x128xf32, #tpu.memory_space<vmem>>, vector<16x16x128xf32>
    %20 = vector.shape_cast %19 : vector<16x16x128xf32> to vector<256x128xf32>
    %c2_31 = arith.constant 2 : index
    %c2_32 = arith.constant 2 : index
    %c0_33 = arith.constant 0 : index
    %21 = vector.load %arg7[%c2_31, %c2_32, %c0_33] : memref<18x18x128xf32, #tpu.memory_space<vmem>>, vector<16x16x128xf32>
    %22 = vector.shape_cast %21 : vector<16x16x128xf32> to vector<256x128xf32>
    %23 = tpu.concatenate %6, %8, %10, %12, %14, %16, %18, %20, %22 in 1 : vector<256x128xf32>, vector<256x128xf32>, vector<256x128xf32>, vector<256x128xf32>, vector<256x128xf32>, vector<256x128xf32>, vector<256x128xf32>, vector<256x128xf32>, vector<256x128xf32> -> vector<256x1152xf32>
    %c0_34 = arith.constant 0 : index
    %c0_35 = arith.constant 0 : index
    %24 = vector.load %arg2[%c0_34, %c0_35] : memref<1152x128xf32, #tpu.memory_space<vmem>>, vector<1152x128xf32>
    %cst_36 = arith.constant dense<0.000000e+00> : vector<256x128xf32>
    %25 = tpu.matmul %23, %24, %cst_36 {dimension_numbers = #tpu.dot_dimension_numbers<[1], [0], [0], [1], [0, 0, 1, 1], [], []>} : vector<256x1152xf32>, vector<1152x128xf32>, vector<256x128xf32> -> vector<256x128xf32>
    %c0_37 = arith.constant 0 : index
    %c0_38 = arith.constant 0 : index
    %26 = vector.load %arg3[%c0_37, %c0_38] : memref<1x128xf32, #tpu.memory_space<vmem>>, vector<1x128xf32>
    %27 = vector.broadcast %26 : vector<1x128xf32> to vector<256x128xf32>
    %28 = arith.addf %25, %27 : vector<256x128xf32>
    %cst_39 = arith.constant 0.000000e+00 : f32
    %29 = vector.broadcast %cst_39 : f32 to vector<256x128xf32>
    %30 = arith.cmpf oge, %28, %29 : vector<256x128xf32>
    %cst_40 = arith.constant 2.000000e-01 : f32
    %31 = vector.broadcast %cst_40 : f32 to vector<256x128xf32>
    %32 = arith.mulf %31, %28 : vector<256x128xf32>
    %33 = arith.select %30, %28, %32 : vector<256x128xi1>, vector<256x128xf32>
    %34 = vector.shape_cast %33 : vector<256x128xf32> to vector<16x16x128xf32>
    %c1_41 = arith.constant 1 : index
    %c1_42 = arith.constant 1 : index
    %c0_43 = arith.constant 0 : index
    %35 = vector.load %arg7[%c1_41, %c1_42, %c0_43] : memref<18x18x128xf32, #tpu.memory_space<vmem>>, vector<16x16x128xf32>
    tpu.vector_store %arg7[%c1_41, %c1_42, %c0_43], %34 {strides = array<i32>} : memref<18x18x128xf32, #tpu.memory_space<vmem>>, vector<16x16x128xf32>,
    %c0_44 = arith.constant 0 : index
    %c0_45 = arith.constant 0 : index
    %c0_46 = arith.constant 0 : index
    %36 = vector.load %arg7[%c0_44, %c0_45, %c0_46] : memref<18x18x128xf32, #tpu.memory_space<vmem>>, vector<16x16x128xf32>
    %37 = vector.shape_cast %36 : vector<16x16x128xf32> to vector<256x128xf32>
    %c0_47 = arith.constant 0 : index
    %c1_48 = arith.constant 1 : index
    %c0_49 = arith.constant 0 : index
    %38 = vector.load %arg7[%c0_47, %c1_48, %c0_49] : memref<18x18x128xf32, #tpu.memory_space<vmem>>, vector<16x16x128xf32>
    %39 = vector.shape_cast %38 : vector<16x16x128xf32> to vector<256x128xf32>
    %c0_50 = arith.constant 0 : index
    %c2_51 = arith.constant 2 : index
    %c0_52 = arith.constant 0 : index
    %40 = vector.load %arg7[%c0_50, %c2_51, %c0_52] : memref<18x18x128xf32, #tpu.memory_space<vmem>>, vector<16x16x128xf32>
    %41 = vector.shape_cast %40 : vector<16x16x128xf32> to vector<256x128xf32>
    %c1_53 = arith.constant 1 : index
    %c0_54 = arith.constant 0 : index
    %c0_55 = arith.constant 0 : index
    %42 = vector.load %arg7[%c1_53, %c0_54, %c0_55] : memref<18x18x128xf32, #tpu.memory_space<vmem>>, vector<16x16x128xf32>
    %43 = vector.shape_cast %42 : vector<16x16x128xf32> to vector<256x128xf32>
    %c1_56 = arith.constant 1 : index
    %c1_57 = arith.constant 1 : index
    %c0_58 = arith.constant 0 : index
    %44 = vector.load %arg7[%c1_56, %c1_57, %c0_58] : memref<18x18x128xf32, #tpu.memory_space<vmem>>, vector<16x16x128xf32>
    %45 = vector.shape_cast %44 : vector<16x16x128xf32> to vector<256x128xf32>
    %c1_59 = arith.constant 1 : index
    %c2_60 = arith.constant 2 : index
    %c0_61 = arith.constant 0 : index
    %46 = vector.load %arg7[%c1_59, %c2_60, %c0_61] : memref<18x18x128xf32, #tpu.memory_space<vmem>>, vector<16x16x128xf32>
    %47 = vector.shape_cast %46 : vector<16x16x128xf32> to vector<256x128xf32>
    %c2_62 = arith.constant 2 : index
    %c0_63 = arith.constant 0 : index
    %c0_64 = arith.constant 0 : index
    %48 = vector.load %arg7[%c2_62, %c0_63, %c0_64] : memref<18x18x128xf32, #tpu.memory_space<vmem>>, vector<16x16x128xf32>
    %49 = vector.shape_cast %48 : vector<16x16x128xf32> to vector<256x128xf32>
    %c2_65 = arith.constant 2 : index
    %c1_66 = arith.constant 1 : index
    %c0_67 = arith.constant 0 : index
    %50 = vector.load %arg7[%c2_65, %c1_66, %c0_67] : memref<18x18x128xf32, #tpu.memory_space<vmem>>, vector<16x16x128xf32>
    %51 = vector.shape_cast %50 : vector<16x16x128xf32> to vector<256x128xf32>
    %c2_68 = arith.constant 2 : index
    %c2_69 = arith.constant 2 : index
    %c0_70 = arith.constant 0 : index
    %52 = vector.load %arg7[%c2_68, %c2_69, %c0_70] : memref<18x18x128xf32, #tpu.memory_space<vmem>>, vector<16x16x128xf32>
    %53 = vector.shape_cast %52 : vector<16x16x128xf32> to vector<256x128xf32>
    %54 = tpu.concatenate %37, %39, %41, %43, %45, %47, %49, %51, %53 in 1 : vector<256x128xf32>, vector<256x128xf32>, vector<256x128xf32>, vector<256x128xf32>, vector<256x128xf32>, vector<256x128xf32>, vector<256x128xf32>, vector<256x128xf32>, vector<256x128xf32> -> vector<256x1152xf32>
    %c0_71 = arith.constant 0 : index
    %c0_72 = arith.constant 0 : index
    %55 = vector.load %arg4[%c0_71, %c0_72] : memref<1152x128xf32, #tpu.memory_space<vmem>>, vector<1152x128xf32>
    %cst_73 = arith.constant dense<0.000000e+00> : vector<256x128xf32>
    %56 = tpu.matmul %54, %55, %cst_73 {dimension_numbers = #tpu.dot_dimension_numbers<[1], [0], [0], [1], [0, 0, 1, 1], [], []>} : vector<256x1152xf32>, vector<1152x128xf32>, vector<256x128xf32> -> vector<256x128xf32>
    %c0_74 = arith.constant 0 : index
    %c0_75 = arith.constant 0 : index
    %57 = vector.load %arg5[%c0_74, %c0_75] : memref<1x128xf32, #tpu.memory_space<vmem>>, vector<1x128xf32>
    %58 = vector.broadcast %57 : vector<1x128xf32> to vector<256x128xf32>
    %59 = arith.addf %56, %58 : vector<256x128xf32>
    %cst_76 = arith.constant 0.000000e+00 : f32
    %60 = vector.broadcast %cst_76 : f32 to vector<256x128xf32>
    %61 = arith.cmpf oge, %59, %60 : vector<256x128xf32>
    %cst_77 = arith.constant 2.000000e-01 : f32
    %62 = vector.broadcast %cst_77 : f32 to vector<256x128xf32>
    %63 = arith.mulf %62, %59 : vector<256x128xf32>
    %64 = arith.select %61, %59, %63 : vector<256x128xi1>, vector<256x128xf32>
    %65 = vector.shape_cast %64 : vector<256x128xf32> to vector<1x16x16x128xf32>
    %c0_78 = arith.constant 0 : index
    %c0_79 = arith.constant 0 : index
    %c0_80 = arith.constant 0 : index
    %c0_81 = arith.constant 0 : index
    %66 = vector.load %arg6[%c0_78, %c0_79, %c0_80, %c0_81] : memref<1x16x16x128xf32, #tpu.memory_space<vmem>>, vector<1x16x16x128xf32>
    tpu.vector_store %arg6[%c0_78, %c0_79, %c0_80, %c0_81], %65 {strides = array<i32>} : memref<1x16x16x128xf32, #tpu.memory_space<vmem>>, vector<1x16x16x128xf32>,
    return
  }
  func.func @transform_0(%arg0: i32) -> (i32, i32, i32, i32) {
    %c0_i32 = arith.constant 0 : i32
    %c0_i32_0 = arith.constant 0 : i32
    %c0_i32_1 = arith.constant 0 : i32
    %c0_i32_2 = arith.constant 0 : i32
    return %arg0, %c0_i32, %c0_i32_0, %c0_i32_1 : i32, i32, i32, i32
  }
  func.func @transform_1(%arg0: i32) -> (i32, i32) {
    %c0_i32 = arith.constant 0 : i32
    %c0_i32_0 = arith.constant 0 : i32
    %c0_i32_1 = arith.constant 0 : i32
    return %c0_i32, %c0_i32_0 : i32, i32
  }
  func.func @transform_2(%arg0: i32) -> (i32, i32) {
    %c0_i32 = arith.constant 0 : i32
    %c0_i32_0 = arith.constant 0 : i32
    %c0_i32_1 = arith.constant 0 : i32
    return %c0_i32, %c0_i32_0 : i32, i32
  }
  func.func @transform_3(%arg0: i32) -> (i32, i32) {
    %c0_i32 = arith.constant 0 : i32
    %c0_i32_0 = arith.constant 0 : i32
    %c0_i32_1 = arith.constant 0 : i32
    return %c0_i32, %c0_i32_0 : i32, i32
  }
  func.func @transform_4(%arg0: i32) -> (i32, i32) {
    %c0_i32 = arith.constant 0 : i32
    %c0_i32_0 = arith.constant 0 : i32
    %c0_i32_1 = arith.constant 0 : i32
    return %c0_i32, %c0_i32_0 : i32, i32
  }
  func.func @transform_5(%arg0: i32) -> (i32, i32, i32, i32) {
    %c0_i32 = arith.constant 0 : i32
    %c0_i32_0 = arith.constant 0 : i32
    %c0_i32_1 = arith.constant 0 : i32
    %c0_i32_2 = arith.constant 0 : i32
    return %arg0, %c0_i32, %c0_i32_0, %c0_i32_1 : i32, i32, i32, i32
  }
}

</mosaic_0001>

<bundles_post_ra>
// kernel: tpu_custom_call.1
= control target key start
LH: loop header
LB: loop body
LE: loop exit
PB: predicated region body
PF: predicated region fallthrough
CT: control target
= control target key end

     0   :  { %10 = vsyncpa [#allocation4], 0  ;;  %s5902_s0 = inlined_call_operand.hbm [shape: f32[2,16,16,128], index: 0, kind: input, shape index: {}]   ;;  %s5903_s1 = inlined_call_operand.hbm [shape: f32[1152,128], index: 1, kind: input, shape index: {}]   ;;  %s5904_s2 = inlined_call_operand.vmem [shape: f32[1,128], index: 2, kind: input, shape index: {}]   ;;  %s5905_s3 = inlined_call_operand.hbm [shape: f32[1152,128], index: 3, kind: input, shape index: {}]   ;;  %s5906_s4 = inlined_call_operand.vmem [shape: f32[1,128], index: 4, kind: input, shape index: {}]   ;;  %s5907_s5 = inlined_call_operand.hbm [shape: f32[2,16,16,128], index: 5, kind: output, shape index: {}]  }
   0x1   :  { %12 = vsyncpa [#allocation4 + $0x1], 0 }
   0x2   :  { %13 = vsyncpa [#allocation7], 0 }
   0x3   :  { %14 = vsyncpa [#allocation5], 0 }
   0x4   :  { %16 = vsyncpa [#allocation5 + $0x1], 0  ;;  %s4000_s18 = smov 0   ;;  %s4002_s19 = smov 0  }
   0x5   :  { %s4004_s20 = smov 0   ;;  %s4006_s21 = smov 0  }
   0x6 LB: > { %s4021_s22 = sadd.s32 4294967295, %s3961_s21   ;;  %s3668_s23 = sadd.s32 4294967294, %s3961_s21   ;;  %s3961_s21 = sphi %s4006_s21, %s6026_s21   ;;  %s3957_s20 = sphi %s4004_s20, %s6025_s20   ;;  %s3953_s19 = sphi %s4002_s19, %s6024_s19   ;;  %s3949_s18 = sphi %s4000_s18, %s6023_s18  }
   0x7   : > { %p42_p0 = scmp.ne.s32.totalorder %s3953_s19, %s3949_s18  ;;  %p43_p1 = scmp.eq.s32.totalorder %s4021_s22, 0 }
   0x8   : > { %p150_p2 = scmp.eq.s32.totalorder %s4021_s22, 1  ;;  %p156_p3 = scmp.eq.s32.totalorder %s3668_s23, 1 }
   0x9   : > { %p4030_p4 = por %p43_p1, %p42_p0  ;;  %p3669_p5 = scmp.ge.s32.totalorder %s3961_s21, 1 }
   0xa   : > { %p4035_p6 = por %p156_p3, %p42_p0  ;;  %p163_p7 = scmp.lt.s32.totalorder %s3961_s21, 3 }
   0xb   : > { %s174_s28 = sshll.u32 %s5903_s1, 4  ;;  %s3963_s30 = smov [#allocation6]   ;;  %s175_s28 = int_to_ptr.hbm [resolvable:$true] %s174_s28 }
   0xc   : > { %p4043_p8 = pnand %p3669_p5, %p163_p7  ;;  %s176_s6 = sshll.u32 %s3963_s30, 4  ;;  %s177_s6 = int_to_ptr.vmem [resolvable:$true] %s176_s6 }
   0xd   : > { %s191_s9 = sshll.u32 %s5905_s3, 4  ;;  %s5908_s10 = smov 128   ;;  %s192_s9 = int_to_ptr.hbm [resolvable:$true] %s191_s9 }
   0xe   : > { %p3732_p9 = pneg %p4043_p8  ;;  %s3965_s11 = smov 8  }
   0xf   : > { %s3966_s12 = smov [#allocation8]   ;;  %s4062_s14 = sadd.s32 1, %s3961_s21  }
  0x10   : > { %p3733_p10 = pnand %p3732_p9, %p43_p1  ;;  %s193_s13 = sshll.u32 %s3966_s12, 4  ;;  %s194_s13 = int_to_ptr.vmem [resolvable:$true] %s193_s13 }
  0x11   : > { %s29_s15 = sadd.s32 1, %s3957_s20  ;;  %s26_s16 = ssub.s32 %s3961_s21, %s4062_s14 }
  0x12   : > { %3735 = dma.hbm_to_vmem [thread:$0]  (!%p3733_p10), %s175_s28, 18432, %s177_s6, [#allocation7], %s5908_s10, %s5908_s10, %s3965_s11  }
  0x13   : > { %3738 = dma.hbm_to_vmem [thread:$0]  (!%p3733_p10), %s192_s9, 18432, %s194_s13, [#allocation7], %s5908_s10, %s5908_s10, %s3965_s11  }
  0x14   : > { %p36_p12 = scmp.ne.s32.totalorder %s3957_s20, %s3953_s19  ;;  %p27_p13 = scmp.eq.s32.totalorder %s26_s16, 0 }
  0x15   : > { %p37_p0 = scmp.eq.s32.totalorder %s3961_s21, 0  ;;  %p3749_p5 = scmp.lt.s32.totalorder %s3961_s21, 2 }
  0x16   : > { %p4072_p3 = por %p150_p2, %p36_p12  ;;  %s210_s26 = sand.u32 1, %s3957_s20  }
  0x17   : > { %s4078_s23 = scalar_select %p27_p13, %s3957_s20, %s29_s15  }
  0x18   : > { %p38_p7 = por %p37_p0, %p36_p12  ;;  %s3673_s27 = sshll.u32 %s210_s26, 8 }
  0x19   : > { %s3686_s28 = sshll.u32 %s3961_s21, 8  ;;  %s214_s8 = scalar_lea.vmem [#allocation3], %s3673_s27 }
  0x1a   : > { %s219_s7 = scalar_lea.hbm %s5902_s0, %s3686_s28  ;;  %s222_s9 = sshll.u32 %s214_s8, 4  ;;  %s223_s9 = int_to_ptr.vmem [resolvable:$true] %s222_s9 }
  0x1b   : > { %s220_s12 = sshll.u32 %s219_s7, 4  ;;  %p4085_p2 = pnand %p3749_p5, %p38_p7  ;;  %s221_s12 = int_to_ptr.hbm [resolvable:$true] %s220_s12 }
  0x1c   : > { %s211_s15 = scalar_lea.sflag [#allocation4], %s210_s26  ;;  %s3861_s16 = sshra.s32 %s221_s12, 4  ;;  %s3862_s16 = int_to_ptr.hbm [resolvable:$true] %s3861_s16 }
  0x1d   : > { %s3863_s10 = scalar_lea.hbm %s3862_s16, 256  ;;  %p3865_p10 = pneg %p4085_p2 }
  0x1e   : > { %p3864_p9 = scmp.ne.s32.totalorder %s3862_s16, %s3863_s10  ;;  %s3868_s30 = scalar_lea.hbm %s5902_s0, 512 }
  0x1f   : > { %p3869_p0 = scmp.lt.s32.totalorder %s3862_s16, %s5902_s0  ;;  %p3870_p5 = scmp.lt.s32.totalorder %s3868_s30, %s3863_s10 }
  0x20   : > { %p3866_p12 = pnand %p3865_p10, %p3864_p9 }
  0x21   : > { %p3871_p7 = por %p3870_p5, %p3869_p0 }
  0x22   : > { %p3867_p13 = pneg %p3866_p12 }
  0x24   : > { %p3872_p11 = pnand %p3871_p7, %p3867_p13 }
  0x26   : > { %3875 = shalt.err (!%p3872_p11)
}
  0x27   : > { %s5917_s26 = smov 128   ;;  %234 = sbr.rel (%p4043_p8) target bundleno = 1526 (0x5f6), region = 40 }
  0x28   : > { %3742 = dma.hbm_to_vmem [thread:$0]  (!%p4085_p2), %s221_s12, 4096, %s223_s9, %s211_s15, %s5917_s26, %s5917_s26, %s3965_s11  }
  0x2c   : > { %s4105_s8 = sand.u32 1, %s3953_s19  }
  0x2d   : > { %s3677_s10 = sshll.u32 %s4105_s8, 8  ;;  %s237_s16 = scalar_lea.sflag [#allocation4], %s4105_s8 }
  0x2e   : > { %s4111_s28 = scalar_lea.vmem [#allocation3], %s3677_s10 }
  0x2f   : > { %3936 = dma.done.wait (%p4030_p4), %s237_s16, 4096  }
  0x30   : > { %3938 = vsyncadd (%p4030_p4), %s237_s16, 4294963200 }
  0x31   : > { %3940 = dma.done.wait (%p43_p1), [#allocation7], 36864  }
  0x32   : > { %3942 = vsyncadd (%p43_p1), [#allocation7], 4294930432  ;;  %v3967_v0 = vmov 0.0   ;;  %v701_v1 = vld [vmem:[#allocation6 + $0x78] sm:$0xff]  ;;  %v700_v3 = vld [vmem:[#allocation6 + $0x70] sm:$0xff]  ;;  %s5745_s30 = scalar_lea.vmem [#allocation9], %s3677_s10 }
  0x33   : > { %278 = vst [vmem:[#allocation2] sm:$0xff] %v3967_v0  ;;  %v717_v2 = vld [vmem:[#allocation6 + $0xf8] sm:$0xff]  ;;  %834 = vmatpush.msra.mxu0 %v701_v1  ;;  %3688 = vmatpush.msra.mxu2 %v701_v1  ;;  %v716_v4 = vld [vmem:[#allocation6 + $0xf0] sm:$0xff]  ;;  %v699_v5 = vld [vmem:[#allocation6 + $0x68] sm:$0xff]  ;;  %s3687_s6 = sshll.u32 %s4021_s22, 8  ;;  %s3573_s16 = sshll.u32 %s5745_s30, 4  ;;  %s3574_s16 = int_to_ptr.vmem [resolvable:$true] %s3573_s16 }
  0x34   : > { %279 = vst [vmem:[#allocation2 + $0x8] sm:$0xff] %v3967_v0  ;;  %3704 = vmatpush.msra.mxu3 %v717_v2  ;;  %947 = vmatpush.msra.mxu1 %v717_v2  ;;  %v715_v6 = vld [vmem:[#allocation6 + $0xe8] sm:$0xff]  ;;  %v698_v7 = vld [vmem:[#allocation6 + $0x60] sm:$0xff]  ;;  %v697_v9 = vld [vmem:[#allocation6 + $0x58] sm:$0xff]  ;;  %s3572_s10 = scalar_lea.hbm %s5907_s5, %s3687_s6  ;;  %s3561_s22 = scalar_lea.sflag [#allocation5], %s4105_s8 }
  0x35   : > { %280 = vst [vmem:[#allocation2 + $0x10] sm:$0x3] %v3967_v0  ;;  %835 = vmatpush.msra.mxu0 %v700_v3  ;;  %3689 = vmatpush.msra.mxu2 %v700_v3  ;;  %v714_v8 = vld [vmem:[#allocation6 + $0xe0] sm:$0xff]  ;;  %v713_v10 = vld [vmem:[#allocation6 + $0xd8] sm:$0xff]  ;;  %v696_v11 = vld [vmem:[#allocation6 + $0x50] sm:$0xff]  ;;  %s3911_s12 = scalar_lea.hbm %s5907_s5, 512 }
  0x36   : > { %281 = vst [vmem:[#allocation2 + $0x18] sm:$0xff] %v3967_v0  ;;  %3705 = vmatpush.msra.mxu3 %v716_v4  ;;  %948 = vmatpush.msra.mxu1 %v716_v4  ;;  %v712_v12 = vld [vmem:[#allocation6 + $0xd0] sm:$0xff]  ;;  %v695_v13 = vld [vmem:[#allocation6 + $0x48] sm:$0xff]  ;;  %v694_v15 = vld [vmem:[#allocation6 + $0x40] sm:$0xff] }
  0x37   : > { %282 = vst [vmem:[#allocation2 + $0x20] sm:$0xff] %v3967_v0  ;;  %836 = vmatpush.msra.mxu0 %v699_v5  ;;  %3690 = vmatpush.msra.mxu2 %v699_v5  ;;  %v711_v14 = vld [vmem:[#allocation6 + $0xc8] sm:$0xff]  ;;  %v710_v16 = vld [vmem:[#allocation6 + $0xc0] sm:$0xff]  ;;  %v693_v17 = vld [vmem:[#allocation6 + $0x38] sm:$0xff] }
  0x38   : > { %283 = vst [vmem:[#allocation2 + $0x28] sm:$0x3] %v3967_v0  ;;  %3706 = vmatpush.msra.mxu3 %v715_v6  ;;  %949 = vmatpush.msra.mxu1 %v715_v6  ;;  %v709_v18 = vld [vmem:[#allocation6 + $0xb8] sm:$0xff]  ;;  %v692_v19 = vld [vmem:[#allocation6 + $0x30] sm:$0xff]  ;;  %v691_v21 = vld [vmem:[#allocation6 + $0x28] sm:$0xff] }
  0x39   : > { %284 = vst [vmem:[#allocation2 + $0x30] sm:$0xff] %v3967_v0  ;;  %837 = vmatpush.msra.mxu0 %v698_v7  ;;  %3691 = vmatpush.msra.mxu2 %v698_v7  ;;  %v708_v20 = vld [vmem:[#allocation6 + $0xb0] sm:$0xff]  ;;  %v707_v22 = vld [vmem:[#allocation6 + $0xa8] sm:$0xff]  ;;  %v690_v23 = vld [vmem:[#allocation6 + $0x20] sm:$0xff] }
  0x3a   : > { %285 = vst [vmem:[#allocation2 + $0x38] sm:$0xff] %v3967_v0  ;;  %3707 = vmatpush.msra.mxu3 %v714_v8  ;;  %950 = vmatpush.msra.mxu1 %v714_v8  ;;  %v706_v24 = vld [vmem:[#allocation6 + $0xa0] sm:$0xff]  ;;  %v689_v25 = vld [vmem:[#allocation6 + $0x18] sm:$0xff]  ;;  %v688_v27 = vld [vmem:[#allocation6 + $0x10] sm:$0xff] }
  0x3b   : > { %286 = vst [vmem:[#allocation2 + $0x40] sm:$0x3] %v3967_v0  ;;  %838 = vmatpush.msra.mxu0 %v697_v9  ;;  %3692 = vmatpush.msra.mxu2 %v697_v9  ;;  %v705_v26 = vld [vmem:[#allocation6 + $0x98] sm:$0xff]  ;;  %v704_v28 = vld [vmem:[#allocation6 + $0x90] sm:$0xff]  ;;  %v687_v29 = vld [vmem:[#allocation6 + $0x8] sm:$0xff] }
  0x3c   : > { %287 = vst [vmem:[#allocation2 + $0x48] sm:$0xff] %v3967_v0  ;;  %3708 = vmatpush.msra.mxu3 %v713_v10  ;;  %951 = vmatpush.msra.mxu1 %v713_v10  ;;  %v703_v30 = vld [vmem:[#allocation6 + $0x88] sm:$0xff]  ;;  %v686_v31 = vld [vmem:[#allocation6] sm:$0xff]  ;;  %v733_v33 = vld [vmem:[#allocation6 + $0x178] sm:$0xff] }
  0x3d   : > { %288 = vst [vmem:[#allocation2 + $0x50] sm:$0xff] %v3967_v0  ;;  %839 = vmatpush.msra.mxu0 %v696_v11  ;;  %3693 = vmatpush.msra.mxu2 %v696_v11  ;;  %v702_v32 = vld [vmem:[#allocation6 + $0x80] sm:$0xff]  ;;  %v749_v34 = vld [vmem:[#allocation6 + $0x1f8] sm:$0xff]  ;;  %v346_v35 = vld [vmem:[%s4111_s28 + $0x70] sm:$0xff] }
  0x3e   : > { %289 = vst [vmem:[#allocation2 + $0x58] sm:$0x3] %v3967_v0  ;;  %3709 = vmatpush.msra.mxu3 %v712_v12  ;;  %952 = vmatpush.msra.mxu1 %v712_v12  ;;  %v732_v36 = vld [vmem:[#allocation6 + $0x170] sm:$0xff]  ;;  %v765_v37 = vld [vmem:[#allocation6 + $0x278] sm:$0xff]  ;;  %v731_v41 = vld [vmem:[#allocation6 + $0x168] sm:$0xff] }
  0x3f   : > { %290 = vst [vmem:[#allocation2 + $0x60] sm:$0xff] %v3967_v0  ;;  %840 = vmatpush.msra.mxu0 %v695_v13  ;;  %3694 = vmatpush.msra.mxu2 %v695_v13  ;;  %v748_v38 = vld [vmem:[#allocation6 + $0x1f0] sm:$0xff]  ;;  %v347_v40 = vld [vmem:[%s4111_s28 + $0x78] sm:$0xff]  ;;  %v747_v42 = vld [vmem:[#allocation6 + $0x1e8] sm:$0xff] }
  0x40   : > { %291 = vst [vmem:[#allocation2 + $0x68] sm:$0xff] %v3967_v0  ;;  %3710 = vmatpush.msra.mxu3 %v711_v14  ;;  %953 = vmatpush.msra.mxu1 %v711_v14  ;;  %v429_v39 = vld [vmem:[#allocation2 + $0x1] sm:$0xff]  ;;  %v430_v44 = vld [vmem:[#allocation2 + $0x9] sm:$0xff]  ;;  %v763_v49 = vld [vmem:[#allocation6 + $0x268] sm:$0xff] }
  0x41   : > { %292 = vst [vmem:[#allocation2 + $0x70] sm:$0x3] %v3967_v0  ;;  %841 = vmatpush.msra.mxu0 %v694_v15  ;;  %3695 = vmatpush.msra.mxu2 %v694_v15  ;;  %v764_v43 = vld [vmem:[#allocation6 + $0x270] sm:$0xff]  ;;  %v4180_v45 = vld [vmem:[%s4111_s28] sm:$0xff]  ;;  %v4184_v50 = vld [vmem:[%s4111_s28 + $0x8] sm:$0xff] }
  0x42   : > { %293 = vst [vmem:[#allocation2 + $0x78] sm:$0xff] %v3967_v0  ;;  %3711 = vmatpush.msra.mxu3 %v710_v16  ;;  %954 = vmatpush.msra.mxu1 %v710_v16  ;;  %v348_v46 = vld [vmem:[%s4111_s28 + $0x80] sm:$0xff]  ;;  %v349_v51 = vld [vmem:[%s4111_s28 + $0x88] sm:$0xff]  ;;  %v4189_v52 = vld [vmem:[%s4111_s28 + $0x10] sm:$0xff] }
  0x43   : > { %294 = vst [vmem:[#allocation2 + $0x80] sm:$0xff] %v3967_v0  ;;  %842 = vmatpush.msra.mxu0 %v693_v17  ;;  %3696 = vmatpush.msra.mxu2 %v693_v17  ;;  %v730_v47 = vld [vmem:[#allocation6 + $0x160] sm:$0xff]  ;;  %v350_v53 = vld [vmem:[%s4111_s28 + $0x90] sm:$0xff]  ;;  %v4196_v55 = vld [vmem:[%s4111_s28 + $0x18] sm:$0xff] }
  0x44   : > { %295 = vst [vmem:[#allocation2 + $0x88] sm:$0x3] %v3967_v0  ;;  %3712 = vmatpush.msra.mxu3 %v709_v18  ;;  %955 = vmatpush.msra.mxu1 %v709_v18  ;;  %v746_v48 = vld [vmem:[#allocation6 + $0x1e0] sm:$0xff]  ;;  %v351_v56 = vld [vmem:[%s4111_s28 + $0x98] sm:$0xff]  ;;  %v728_v1 = vld [vmem:[#allocation6 + $0x150] sm:$0xff] }
  0x45   : > { %296 = vst [vmem:[#allocation2 + $0x90] sm:$0xff] %v3967_v0  ;;  %843 = vmatpush.msra.mxu0 %v692_v19  ;;  %3697 = vmatpush.msra.mxu2 %v692_v19  ;;  %v729_v57 = vld [vmem:[#allocation6 + $0x158] sm:$0xff]  ;;  %v762_v60 = vld [vmem:[#allocation6 + $0x260] sm:$0xff]  ;;  %v744_v2 = vld [vmem:[#allocation6 + $0x1d0] sm:$0xff] }
  0x46   : > { %297 = vst [vmem:[#allocation2 + $0x98] sm:$0xff] %v3967_v0  ;;  %3713 = vmatpush.msra.mxu3 %v708_v20  ;;  %956 = vmatpush.msra.mxu1 %v708_v20  ;;  %v745_v58 = vld [vmem:[#allocation6 + $0x1d8] sm:$0xff]  ;;  %v4207_v63 = vld [vmem:[%s4111_s28 + $0x20] sm:$0xff]  ;;  %v4216_v6 = vld [vmem:[%s4111_s28 + $0x28] sm:$0xff] }
  0x47   : > { %298 = vst [vmem:[#allocation2 + $0xa0] sm:$0x3] %v3967_v0  ;;  %844 = vmatpush.msra.mxu0 %v691_v21  ;;  %3698 = vmatpush.msra.mxu2 %v691_v21  ;;  %v761_v3 = vld [vmem:[#allocation6 + $0x258] sm:$0xff]  ;;  %v353_v7 = vld [vmem:[%s4111_s28 + $0xa8] sm:$0xff]  ;;  %v760_v10 = vld [vmem:[#allocation6 + $0x250] sm:$0xff] }
  0x48   : > { %299 = vst [vmem:[#allocation2 + $0xa8] sm:$0xff] %v3967_v0  ;;  %3714 = vmatpush.msra.mxu3 %v707_v22  ;;  %957 = vmatpush.msra.mxu1 %v707_v22  ;;  %v727_v8 = vld [vmem:[#allocation6 + $0x148] sm:$0xff]  ;;  %v4225_v13 = vld [vmem:[%s4111_s28 + $0x30] sm:$0xff]  ;;  %v726_v15 = vld [vmem:[#allocation6 + $0x140] sm:$0xff] }
  0x49   : > { %300 = vst [vmem:[#allocation2 + $0xb0] sm:$0xff] %v3967_v0  ;;  %845 = vmatpush.msra.mxu0 %v690_v23  ;;  %3699 = vmatpush.msra.mxu2 %v690_v23  ;;  %v743_v9 = vld [vmem:[#allocation6 + $0x1c8] sm:$0xff]  ;;  %v354_v14 = vld [vmem:[%s4111_s28 + $0xb0] sm:$0xff]  ;;  %v742_v16 = vld [vmem:[#allocation6 + $0x1c0] sm:$0xff] }
  0x4a   : > { %301 = vst [vmem:[#allocation2 + $0xb8] sm:$0x3] %v3967_v0  ;;  %3715 = vmatpush.msra.mxu3 %v706_v24  ;;  %958 = vmatpush.msra.mxu1 %v706_v24  ;;  %v759_v17 = vld [vmem:[#allocation6 + $0x248] sm:$0xff]  ;;  %v4234_v20 = vld [vmem:[%s4111_s28 + $0x38] sm:$0xff]  ;;  %v758_v24 = vld [vmem:[#allocation6 + $0x240] sm:$0xff] }
  0x4b   : > { %302 = vst [vmem:[#allocation2 + $0xc0] sm:$0xff] %v3967_v0  ;;  %846 = vmatpush.msra.mxu0 %v689_v25  ;;  %3700 = vmatpush.msra.mxu2 %v689_v25  ;;  %v355_v21 = vld [vmem:[%s4111_s28 + $0xb8] sm:$0xff] }
  0x4c   : > { %303 = vst [vmem:[#allocation2 + $0xc8] sm:$0xff] %v3967_v0  ;;  %3716 = vmatpush.msra.mxu3 %v705_v26  ;;  %959 = vmatpush.msra.mxu1 %v705_v26  ;;  %v725_v22 = vld [vmem:[#allocation6 + $0x138] sm:$0xff] }
  0x4d   : > { %304 = vst [vmem:[#allocation2 + $0xd0] sm:$0x3] %v3967_v0  ;;  %847 = vmatpush.msra.mxu0 %v688_v27  ;;  %3701 = vmatpush.msra.mxu2 %v688_v27  ;;  %v741_v23 = vld [vmem:[#allocation6 + $0x1b8] sm:$0xff]  ;;  %v4243_v27 = vld [vmem:[%s4111_s28 + $0x40] sm:$0xff] }
  0x4e   : > { %305 = vst [vmem:[#allocation2 + $0xd8] sm:$0xff] %v3967_v0  ;;  %3717 = vmatpush.msra.mxu3 %v704_v28  ;;  %960 = vmatpush.msra.mxu1 %v704_v28  ;;  %v356_v28 = vld [vmem:[%s4111_s28 + $0xc0] sm:$0xff] }
  0x4f   : > { %306 = vst [vmem:[#allocation2 + $0xe0] sm:$0xff] %v3967_v0  ;;  %848 = vmatpush.msra.mxu0 %v687_v29  ;;  %3702 = vmatpush.msra.mxu2 %v687_v29  ;;  %v724_v29 = vld [vmem:[#allocation6 + $0x130] sm:$0xff] }
  0x50   : > { %307 = vst [vmem:[#allocation2 + $0xe8] sm:$0x3] %v3967_v0  ;;  %3718 = vmatpush.msra.mxu3 %v703_v30  ;;  %961 = vmatpush.msra.mxu1 %v703_v30  ;;  %v740_v30 = vld [vmem:[#allocation6 + $0x1b0] sm:$0xff] }
  0x51   : > { %308 = vst [vmem:[#allocation2 + $0xf0] sm:$0xff] %v3967_v0  ;;  %849 = vmatpush.msra.mxu0 %v686_v31  ;;  %3703 = vmatpush.msra.mxu2 %v686_v31  ;;  %v757_v31 = vld [vmem:[#allocation6 + $0x238] sm:$0xff] }
  0x52   : > { %309 = vst [vmem:[#allocation2 + $0xf8] sm:$0xff] %v3967_v0  ;;  %3719 = vmatpush.msra.mxu3 %v702_v32  ;;  %850 = vmatmul.f32.vlgmr.msra.gmra.mxu0 %v3967_v0 }
  0x53   : > { %310 = vst [vmem:[#allocation2 + $0x100] sm:$0x3] %v3967_v0  ;;  %1011 = vmatmul.f32.vlgmr.msra.gmra.mxu3 %v346_v35  ;;  %1060 = vmatpush.msrb.mxu2 %v733_v33 }
  0x54   : > { %311 = vst [vmem:[#allocation2 + $0x108] sm:$0xff] %v3967_v0  ;;  %1173 = vmatpush.msrb.mxu3 %v749_v34  ;;  %1286 = vmatpush.msrb.mxu0 %v765_v37  ;;  %v4252_v34 = vld [vmem:[%s4111_s28 + $0x48] sm:$0xff] }
  0x55   : > { %312 = vst [vmem:[#allocation2 + $0x110] sm:$0xff] %v3967_v0  ;;  %1061 = vmatpush.msrb.mxu2 %v732_v36  ;;  %962 = vmatpush.msra.mxu1 %v702_v32  ;;  %v723_v36 = vld [vmem:[#allocation6 + $0x128] sm:$0xff] }
  0x56   : > { %313 = vst [vmem:[#allocation2 + $0x118] sm:$0x3] %v3967_v0  ;;  %1174 = vmatpush.msrb.mxu3 %v748_v38  ;;  %963 = vmatmul.f32.vlgmr.msra.gmra.mxu1 %v429_v39  ;;  %v739_v37 = vld [vmem:[#allocation6 + $0x1a8] sm:$0xff]  ;;  %v756_v38 = vld [vmem:[#allocation6 + $0x230] sm:$0xff] }
  0x57   : > { %314 = vst [vmem:[#allocation2 + $0x120] sm:$0xff] %v3967_v0  ;;  %1062 = vmatpush.msrb.mxu2 %v731_v41  ;;  %1287 = vmatpush.msrb.mxu0 %v764_v43  ;;  %v4261_v41 = vld [vmem:[%s4111_s28 + $0x50] sm:$0xff]  ;;  %v722_v43 = vld [vmem:[#allocation6 + $0x120] sm:$0xff] }
  0x58   : > { %315 = vst [vmem:[#allocation2 + $0x128] sm:$0xff] %v3967_v0  ;;  %1175 = vmatpush.msrb.mxu3 %v747_v42  ;;  %v358_v42 = vld [vmem:[%s4111_s28 + $0xd0] sm:$0xff] }
  0x59   : > { %316 = vst [vmem:[#allocation2 + $0x130] sm:$0x3] %v3967_v0  ;;  %1063 = vmatpush.msrb.mxu2 %v730_v47  ;;  %1288 = vmatpush.msrb.mxu0 %v763_v49  ;;  %v4270_v49 = vld [vmem:[%s4111_s28 + $0x58] sm:$0xff] }
  0x5a   : > { %317 = vst [vmem:[#allocation2 + $0x138] sm:$0xff] %v3967_v0  ;;  %853 = vmatmul.f32.gmra.mxu0 %v3967_v0  ;;  %1176 = vmatpush.msrb.mxu3 %v746_v48 }
  0x5b   : > { %318 = vst [vmem:[#allocation2 + $0x140] sm:$0xff] %v3967_v0  ;;  %1014 = vmatmul.f32.gmra.mxu3 %v347_v40  ;;  %1064 = vmatpush.msrb.mxu2 %v729_v57 }
  0x5c   : > { %319 = vst [vmem:[#allocation2 + $0x148] sm:$0x3] %v3967_v0  ;;  %1177 = vmatpush.msrb.mxu3 %v745_v58  ;;  %1289 = vmatpush.msrb.mxu0 %v762_v60  ;;  %v4279_v60 = vld [vmem:[%s4111_s28 + $0x60] sm:$0xff] }
  0x5d   : > { %320 = vst [vmem:[#allocation2 + $0x150] sm:$0xff] %v3967_v0  ;;  %1065 = vmatpush.msrb.mxu2 %v728_v1  ;;  %v736_v1 = vld [vmem:[#allocation6 + $0x190] sm:$0xff] }
  0x5e   : > { %321 = vst [vmem:[#allocation2 + $0x158] sm:$0xff] %v3967_v0  ;;  %966 = vmatmul.f32.gmra.mxu1 %v430_v44  ;;  %1178 = vmatpush.msrb.mxu3 %v744_v2  ;;  %v738_v44 = vld [vmem:[#allocation6 + $0x1a0] sm:$0xff]  ;;  %v753_v2 = vld [vmem:[#allocation6 + $0x218] sm:$0xff] }
  0x5f   : > { %322 = vst [vmem:[#allocation2 + $0x160] sm:$0x3] %v3967_v0  ;;  %1290 = vmatpush.msrb.mxu0 %v761_v3  ;;  %1066 = vmatpush.msrb.mxu2 %v727_v8  ;;  %v781_v3 = vld [vmem:[#allocation6 + $0x2f8] sm:$0xff] }
  0x60   : > { %323 = vst [vmem:[#allocation2 + $0x168] sm:$0xff] %v3967_v0  ;;  %1179 = vmatpush.msrb.mxu3 %v743_v9  ;;  %1399 = vmatpush.msrb.mxu1 %v781_v3  ;;  %v4288_v9 = vld [vmem:[%s4111_s28 + $0x68] sm:$0xff]  ;;  %v796_v3 = vld [vmem:[#allocation6 + $0x370] sm:$0xff] }
  0x61   : > { %324 = vst [vmem:[#allocation2 + $0x170] sm:$0xff] %v3967_v0  ;;  %1291 = vmatpush.msrb.mxu0 %v760_v10  ;;  %1067 = vmatpush.msrb.mxu2 %v726_v15  ;;  %v361_v10 = vld [vmem:[%s4111_s28 + $0xe8] sm:$0xff] }
  0x62   : > { %325 = vst [vmem:[#allocation2 + $0x178] sm:$0x3] %v3967_v0  ;;  %1180 = vmatpush.msrb.mxu3 %v742_v16  ;;  %v735_v15 = vld [vmem:[#allocation6 + $0x188] sm:$0xff]  ;;  %v752_v16 = vld [vmem:[#allocation6 + $0x210] sm:$0xff] }
  0x63   : > { %326 = vst [vmem:[#allocation2 + $0x180] sm:$0xff] %v3967_v0  ;;  %1017 = vmatmul.f32.gmra.mxu3 %v348_v46  ;;  %1292 = vmatpush.msrb.mxu0 %v759_v17  ;;  %v778_v17 = vld [vmem:[#allocation6 + $0x2e0] sm:$0xff] }
  0x64   : > { %327 = vst [vmem:[#allocation2 + $0x188] sm:$0xff] %v3967_v0  ;;  %1068 = vmatpush.msrb.mxu2 %v725_v22  ;;  %1181 = vmatpush.msrb.mxu3 %v741_v23  ;;  %v776_v22 = vld [vmem:[#allocation6 + $0x2d0] sm:$0xff] }
  0x65   : > { %328 = vst [vmem:[#allocation2 + $0x190] sm:$0x3] %v3967_v0  ;;  %1293 = vmatpush.msrb.mxu0 %v758_v24  ;;  %v718_v24 = vld [vmem:[#allocation6 + $0x100] sm:$0xff] }
  0x66   : > { %329 = vst [vmem:[#allocation2 + $0x198] sm:$0xff] %v3967_v0  ;;  %969 = vmatmul.f32.gmra.mxu1 %v4180_v45  ;;  %1069 = vmatpush.msrb.mxu2 %v724_v29  ;;  %v751_v29 = vld [vmem:[#allocation6 + $0x208] sm:$0xff] }
  0x67   : > { %330 = vst [vmem:[#allocation2 + $0x1a0] sm:$0xff] %v3967_v0  ;;  %1182 = vmatpush.msrb.mxu3 %v740_v30  ;;  %1294 = vmatpush.msrb.mxu0 %v757_v31  ;;  %v774_v30 = vld [vmem:[#allocation6 + $0x2c0] sm:$0xff] }
  0x68   : > { %331 = vst [vmem:[#allocation2 + $0x1a8] sm:$0x3] %v3967_v0  ;;  %v352_v0 = vld [vmem:[%s4111_s28 + $0xa0] sm:$0xff]  ;;  %1070 = vmatpush.msrb.mxu2 %v723_v36  ;;  %v772_v36 = vld [vmem:[#allocation6 + $0x2b0] sm:$0xff] }
  0x69   : > { %379 = vst [vmem:[#allocation2 + $0xc1] sm:$0xff] %v346_v35  ;;  %v357_v35 = vld [vmem:[%s4111_s28 + $0xc8] sm:$0xff]  ;;  %1183 = vmatpush.msrb.mxu3 %v739_v37  ;;  %1295 = vmatpush.msrb.mxu0 %v756_v38  ;;  %v750_v31 = vld [vmem:[#allocation6 + $0x200] sm:$0xff]  ;;  %v797_v38 = vld [vmem:[#allocation6 + $0x378] sm:$0xff] }
  0x6a   : > { %380 = vst [vmem:[#allocation2 + $0xc9] sm:$0xff] %v347_v40  ;;  %1071 = vmatpush.msrb.mxu2 %v722_v43  ;;  %v770_v43 = vld [vmem:[#allocation6 + $0x2a0] sm:$0xff] }
  0x6b   : > { %365 = vst [vmem:[#allocation2 + $0x19] sm:$0xff] %v4180_v45  ;;  %1020 = vmatmul.f32.gmra.mxu3 %v349_v51 }
  0x6c   : > { %381 = vst [vmem:[#allocation2 + $0xd9] sm:$0xff] %v348_v46  ;;  %v755_v46 = vld [vmem:[#allocation6 + $0x228] sm:$0xff]  ;;  %1184 = vmatpush.msrb.mxu3 %v738_v44  ;;  %v769_v44 = vld [vmem:[#allocation6 + $0x298] sm:$0xff] }
  0x6d   : > { %366 = vst [vmem:[#allocation2 + $0x21] sm:$0xff] %v4184_v50  ;;  %1296 = vmatpush.msrb.mxu0 %v755_v46 }
  0x6e   : > { %382 = vst [vmem:[#allocation2 + $0xe1] sm:$0xff] %v349_v51  ;;  %972 = vmatmul.f32.gmra.mxu1 %v4184_v50  ;;  %v359_v51 = vld [vmem:[%s4111_s28 + $0xd8] sm:$0xff] }
  0x6f   : > { %367 = vst [vmem:[#allocation2 + $0x31] sm:$0xff] %v4189_v52 }
  0x70   : > { %v413_v54 = vld [vmem:[#allocation2 + $0xc0] sm:$0xff]  ;;  %383 = vst [vmem:[#allocation2 + $0xf1] sm:$0xff] %v350_v53 }
  0x71   : > { %898 = vmatmul.f32.vlgmr.msra.gmra.mxu2 %v413_v54  ;;  %368 = vst [vmem:[#allocation2 + $0x39] sm:$0xff] %v4196_v55  ;;  %v414_v61 = vld [vmem:[#allocation2 + $0xc8] sm:$0xff] }
  0x72   : > { %v4200_v59 = vld [vmem:[#allocation2 + $0x18] sm:$0xff]  ;;  %384 = vst [vmem:[#allocation2 + $0xf9] sm:$0xff] %v351_v56  ;;  %v737_v54 = vld [vmem:[#allocation6 + $0x198] sm:$0xff] }
  0x73   : > { %856 = vmatmul.f32.gmra.mxu0 %v4200_v59  ;;  %369 = vst [vmem:[#allocation2 + $0x49] sm:$0xff] %v4207_v63  ;;  %1023 = vmatmul.f32.gmra.mxu3 %v350_v53  ;;  %v415_v4 = vld [vmem:[#allocation2 + $0xd8] sm:$0xff]  ;;  %v721_v53 = vld [vmem:[#allocation6 + $0x118] sm:$0xff] }
  0x74   : > { %v4204_v62 = vld [vmem:[#allocation2 + $0x20] sm:$0xff]  ;;  %385 = vst [vmem:[#allocation2 + $0x109] sm:$0xff] %v352_v0  ;;  %1072 = vmatpush.msrb.mxu2 %v721_v53  ;;  %1185 = vmatpush.msrb.mxu3 %v737_v54  ;;  %v767_v53 = vld [vmem:[#allocation6 + $0x288] sm:$0xff]  ;;  %v829_v54 = vld [vmem:[#allocation6 + $0x478] sm:$0xff] }
  0x75   : > { %370 = vst [vmem:[#allocation2 + $0x51] sm:$0xff] %v4216_v6  ;;  %v416_v11 = vld [vmem:[#allocation2 + $0xe0] sm:$0xff] }
  0x76   : > { %975 = vmatmul.f32.gmra.mxu1 %v4189_v52  ;;  %v4213_v5 = vld [vmem:[#allocation2 + $0x30] sm:$0xff]  ;;  %386 = vst [vmem:[#allocation2 + $0x111] sm:$0xff] %v353_v7  ;;  %1186 = vmatpush.msrb.mxu3 %v736_v1 }
  0x77   : > { %371 = vst [vmem:[#allocation2 + $0x61] sm:$0xff] %v4225_v13  ;;  %v417_v18 = vld [vmem:[#allocation2 + $0xf0] sm:$0xff] }
  0x78   : > { %v4222_v12 = vld [vmem:[#allocation2 + $0x38] sm:$0xff]  ;;  %387 = vst [vmem:[#allocation2 + $0x121] sm:$0xff] %v354_v14  ;;  %1187 = vmatpush.msrb.mxu3 %v735_v15  ;;  %v828_v15 = vld [vmem:[#allocation6 + $0x470] sm:$0xff] }
  0x79   : > { %901 = vmatmul.f32.gmra.mxu2 %v414_v61  ;;  %372 = vst [vmem:[#allocation2 + $0x69] sm:$0xff] %v4234_v20  ;;  %v418_v25 = vld [vmem:[#allocation2 + $0xf8] sm:$0xff]  ;;  %v360_v61 = vld [vmem:[%s4111_s28 + $0xe0] sm:$0xff] }
  0x7a   : > { %v4231_v19 = vld [vmem:[#allocation2 + $0x48] sm:$0xff]  ;;  %388 = vst [vmem:[#allocation2 + $0x129] sm:$0xff] %v355_v21 }
  0x7b   : > { %859 = vmatmul.f32.gmra.mxu0 %v4204_v62  ;;  %1026 = vmatmul.f32.gmra.mxu3 %v351_v56  ;;  %373 = vst [vmem:[#allocation2 + $0x79] sm:$0xff] %v4243_v27  ;;  %v419_v32 = vld [vmem:[#allocation2 + $0x108] sm:$0xff]  ;;  %v754_v56 = vld [vmem:[#allocation6 + $0x220] sm:$0xff] }
  0x7c   : > { %v4240_v26 = vld [vmem:[#allocation2 + $0x50] sm:$0xff]  ;;  %389 = vst [vmem:[#allocation2 + $0x139] sm:$0xff] %v356_v28  ;;  %1297 = vmatpush.msrb.mxu0 %v754_v56 }
  0x7d   : > { %374 = vst [vmem:[#allocation2 + $0x81] sm:$0xff] %v4252_v34  ;;  %v420_v39 = vld [vmem:[#allocation2 + $0x110] sm:$0xff] }
  0x7e   : > { %978 = vmatmul.f32.gmra.mxu1 %v4196_v55  ;;  %v4249_v33 = vld [vmem:[#allocation2 + $0x60] sm:$0xff]  ;;  %390 = vst [vmem:[#allocation2 + $0x141] sm:$0xff] %v357_v35  ;;  %1298 = vmatpush.msrb.mxu0 %v753_v2 }
  0x7f   : > { %375 = vst [vmem:[#allocation2 + $0x91] sm:$0xff] %v4261_v41  ;;  %v421_v47 = vld [vmem:[#allocation2 + $0x120] sm:$0xff] }
  0x80   : > { %v4258_v40 = vld [vmem:[#allocation2 + $0x68] sm:$0xff]  ;;  %391 = vst [vmem:[#allocation2 + $0x151] sm:$0xff] %v358_v42  ;;  %1299 = vmatpush.msrb.mxu0 %v752_v16 }
  0x81   : > { %904 = vmatmul.f32.gmra.mxu2 %v415_v4  ;;  %376 = vst [vmem:[#allocation2 + $0x99] sm:$0xff] %v4270_v49  ;;  %v422_v57 = vld [vmem:[#allocation2 + $0x128] sm:$0xff]  ;;  %v780_v4 = vld [vmem:[#allocation6 + $0x2f0] sm:$0xff] }
  0x82   : > { %v4267_v48 = vld [vmem:[#allocation2 + $0x78] sm:$0xff]  ;;  %392 = vst [vmem:[#allocation2 + $0x159] sm:$0xff] %v359_v51  ;;  %1400 = vmatpush.msrb.mxu1 %v780_v4  ;;  %1300 = vmatpush.msrb.mxu0 %v751_v29  ;;  %v812_v4 = vld [vmem:[#allocation6 + $0x3f0] sm:$0xff] }
  0x83   : > { %862 = vmatmul.f32.gmra.mxu0 %v4213_v5  ;;  %1029 = vmatmul.f32.gmra.mxu3 %v352_v0  ;;  %v720_v0 = vld [vmem:[#allocation6 + $0x110] sm:$0xff]  ;;  %377 = vst [vmem:[#allocation2 + $0xa9] sm:$0xff] %v4279_v60 }
  0x84   : > { %v4276_v58 = vld [vmem:[#allocation2 + $0x80] sm:$0xff]  ;;  %1073 = vmatpush.msrb.mxu2 %v720_v0  ;;  %393 = vst [vmem:[#allocation2 + $0x169] sm:$0xff] %v360_v61  ;;  %1301 = vmatpush.msrb.mxu0 %v750_v31 }
  0x85   : > { %378 = vst [vmem:[#allocation2 + $0xb1] sm:$0xff] %v4288_v9  ;;  %v557_v0 = vld [vmem:[#allocation2 + $0x1a] sm:$0xff] }
  0x86   : > { %981 = vmatmul.f32.gmra.mxu1 %v4207_v63  ;;  %v4285_v8 = vld [vmem:[#allocation2 + $0x90] sm:$0xff]  ;;  %394 = vst [vmem:[#allocation2 + $0x171] sm:$0xff] %v361_v10  ;;  %1738 = vmatpush.msra.mxu0 %v829_v54 }
  0x88   : > { %v4294_v23 = vld [vmem:[#allocation2 + $0x98] sm:$0xff]  ;;  %1739 = vmatpush.msra.mxu0 %v828_v15  ;;  %v809_v15 = vld [vmem:[#allocation6 + $0x3d8] sm:$0xff] }
  0x89   : > { %907 = vmatmul.f32.gmra.mxu2 %v416_v11  ;;  %v719_v11 = vld [vmem:[#allocation6 + $0x108] sm:$0xff] }
  0x8a   : > { %1074 = vmatpush.msrb.mxu2 %v719_v11  ;;  %v4298_v37 = vld [vmem:[#allocation2 + $0xa8] sm:$0xff]  ;;  %v426_v46 = vld [vmem:[#allocation2 + $0x158] sm:$0xff] }
  0x8b   : > { %865 = vmatmul.f32.gmra.mxu0 %v4222_v12  ;;  %1032 = vmatmul.f32.gmra.mxu3 %v353_v7  ;;  %v423_v7 = vld [vmem:[#allocation2 + $0x138] sm:$0xff]  ;;  %v427_v2 = vld [vmem:[#allocation2 + $0x168] sm:$0xff] }
  0x8c   : > { %1075 = vmatpush.msrb.mxu2 %v718_v24  ;;  %v811_v24 = vld [vmem:[#allocation6 + $0x3e8] sm:$0xff] }
  0x8d   : > { %v428_v11 = vld [vmem:[#allocation2 + $0x170] sm:$0xff] }
  0x8e   : > { %984 = vmatmul.f32.gmra.mxu1 %v4216_v6  ;;  %1512 = vmatpush.msra.mxu2 %v797_v38 }
  0x90   : > { %1513 = vmatpush.msra.mxu2 %v796_v3 }
  0x91   : > { %910 = vmatmul.f32.gmra.mxu2 %v417_v18  ;;  %v777_v18 = vld [vmem:[#allocation6 + $0x2d8] sm:$0xff] }
  0x93   : > { %868 = vmatmul.f32.gmra.mxu0 %v4231_v19  ;;  %1035 = vmatmul.f32.gmra.mxu3 %v354_v14  ;;  %v779_v14 = vld [vmem:[#allocation6 + $0x2e8] sm:$0xff] }
  0x94   : > { %1401 = vmatpush.msrb.mxu1 %v779_v14 }
  0x96   : > { %987 = vmatmul.f32.gmra.mxu1 %v4225_v13 }
  0x97   : > { %1402 = vmatpush.msrb.mxu1 %v778_v17 }
  0x99   : > { %913 = vmatmul.f32.gmra.mxu2 %v418_v25  ;;  %1403 = vmatpush.msrb.mxu1 %v777_v18  ;;  %v775_v25 = vld [vmem:[#allocation6 + $0x2c8] sm:$0xff]  ;;  %v461_v18 = vld [vmem:[#allocation2 + $0x2] sm:$0xff] }
  0x9b   : > { %871 = vmatmul.f32.gmra.mxu0 %v4240_v26  ;;  %1038 = vmatmul.f32.gmra.mxu3 %v355_v21  ;;  %v424_v21 = vld [vmem:[#allocation2 + $0x140] sm:$0xff] }
  0x9c   : > { %1404 = vmatpush.msrb.mxu1 %v776_v22  ;;  %v795_v22 = vld [vmem:[#allocation6 + $0x368] sm:$0xff] }
  0x9d   : > { %1514 = vmatpush.msra.mxu2 %v795_v22 }
  0x9e   : > { %990 = vmatmul.f32.gmra.mxu1 %v4234_v20 }
  0x9f   : > { %1405 = vmatpush.msrb.mxu1 %v775_v25  ;;  %v560_v25 = vld [vmem:[#allocation2 + $0x3a] sm:$0xff] }
  0xa1   : > { %916 = vmatmul.f32.gmra.mxu2 %v419_v32  ;;  %v773_v32 = vld [vmem:[#allocation6 + $0x2b8] sm:$0xff]  ;;  %1406 = vmatpush.msrb.mxu1 %v774_v30 }
  0xa2   : > { %v462_v30 = vld [vmem:[#allocation2 + $0xa] sm:$0xff] }
  0xa3   : > { %874 = vmatmul.f32.gmra.mxu0 %v4249_v33  ;;  %1041 = vmatmul.f32.gmra.mxu3 %v356_v28  ;;  %v734_v28 = vld [vmem:[#allocation6 + $0x180] sm:$0xff] }
  0xa4   : > { %1188 = vmatpush.msrb.mxu3 %v734_v28  ;;  %1407 = vmatpush.msrb.mxu1 %v773_v32 }
  0xa6   : > { %993 = vmatmul.f32.gmra.mxu1 %v4243_v27 }
  0xa7   : > { %1408 = vmatpush.msrb.mxu1 %v772_v36  ;;  %v561_v36 = vld [vmem:[#allocation2 + $0x4a] sm:$0xff] }
  0xa9   : > { %919 = vmatmul.f32.gmra.mxu2 %v420_v39  ;;  %v771_v39 = vld [vmem:[#allocation6 + $0x2a8] sm:$0xff] }
  0xaa   : > { %1409 = vmatpush.msrb.mxu1 %v771_v39 }
  0xab   : > { %877 = vmatmul.f32.gmra.mxu0 %v4258_v40  ;;  %1044 = vmatmul.f32.gmra.mxu3 %v357_v35  ;;  %v425_v35 = vld [vmem:[#allocation2 + $0x150] sm:$0xff] }
  0xac   : > { %1410 = vmatpush.msrb.mxu1 %v770_v43 }
  0xae   : > { %996 = vmatmul.f32.gmra.mxu1 %v4252_v34 }
  0xaf   : > { %1411 = vmatpush.msrb.mxu1 %v769_v44  ;;  %v794_v44 = vld [vmem:[#allocation6 + $0x360] sm:$0xff] }
  0xb0   : > { %1515 = vmatpush.msra.mxu2 %v794_v44 }
  0xb1   : > { %922 = vmatmul.f32.gmra.mxu2 %v421_v47  ;;  %v768_v47 = vld [vmem:[#allocation6 + $0x290] sm:$0xff] }
  0xb2   : > { %1412 = vmatpush.msrb.mxu1 %v768_v47  ;;  %v562_v47 = vld [vmem:[#allocation2 + $0x52] sm:$0xff] }
  0xb3   : > { %880 = vmatmul.f32.gmra.mxu0 %v4267_v48  ;;  %1047 = vmatmul.f32.gmra.mxu3 %v358_v42  ;;  %v813_v42 = vld [vmem:[#allocation6 + $0x3f8] sm:$0xff] }
  0xb4   : > { %1625 = vmatpush.msra.mxu3 %v813_v42  ;;  %1413 = vmatpush.msrb.mxu1 %v767_v53 }
  0xb6   : > { %999 = vmatmul.f32.gmra.mxu1 %v4261_v41  ;;  %1626 = vmatpush.msra.mxu3 %v812_v4 }
  0xb8   : > { %1627 = vmatpush.msra.mxu3 %v811_v24 }
  0xb9   : > { %925 = vmatmul.f32.gmra.mxu2 %v422_v57  ;;  %v766_v57 = vld [vmem:[#allocation6 + $0x280] sm:$0xff] }
  0xba   : > { %1414 = vmatpush.msrb.mxu1 %v766_v57 }
  0xbb   : > { %883 = vmatmul.f32.gmra.mxu0 %v4276_v58  ;;  %1050 = vmatmul.f32.gmra.mxu3 %v359_v51  ;;  %v4302_v51 = vld [vmem:[#allocation2 + $0xb0] sm:$0xff] }
  0xbe   : > { %1002 = vmatmul.f32.gmra.mxu1 %v4270_v49 }
  0xc1   : > { %928 = vmatmul.f32.gmra.mxu2 %v423_v7  ;;  %v558_v7 = vld [vmem:[#allocation2 + $0x22] sm:$0xff] }
  0xc3   : > { %886 = vmatmul.f32.gmra.mxu0 %v4285_v8  ;;  %1053 = vmatmul.f32.gmra.mxu3 %v360_v61 }
  0xc6   : > { %1005 = vmatmul.f32.gmra.mxu1 %v4279_v60 }
  0xc9   : > { %931 = vmatmul.f32.gmra.mxu2 %v424_v21  ;;  %v4325_v21 = vld [vmem:[%s5904_s2] ss:$0 sm:$0xff] }
  0xcb   : > { %889 = vmatmul.f32.gmra.mxu0 %v4294_v23  ;;  %1056 = vmatmul.f32.gmra.mxu3 %v361_v10 }
  0xce   : > { %1008 = vmatmul.f32.gmra.mxu1 %v4288_v9 }
  0xcf   : > { %v4308_v61 = vpop.f32.mrf.mxu0 }
  0xd1   : > { %934 = vmatmul.f32.gmra.mxu2 %v425_v35  ;;  %v827_v35 = vld [vmem:[#allocation6 + $0x468] sm:$0xff] }
  0xd2   : > { %1740 = vmatpush.msra.mxu0 %v827_v35 }
  0xd3   : > { %892 = vmatmul.f32.gmra.mxu0 %v4298_v37  ;;  %1189 = vmatmul.f32.vlgmr.msrb.gmra.mxu3 %v4200_v59  ;;  %v4305_v56 = vpop.f32.mrf.mxu1 }
  0xd6   : > { %v1012_v1 = vpop.f32.mrf.mxu3  ;;  %1415 = vmatmul.f32.vlgmr.msrb.gmra.mxu1 %v557_v0 }
  0xd7   : > { %v4314_v14 = vpop.f32.mrf.mxu0 }
  0xd9   : > { %937 = vmatmul.f32.gmra.mxu2 %v426_v46  ;;  %v810_v46 = vld [vmem:[#allocation6 + $0x3e0] sm:$0xff] }
  0xda   : > { %1628 = vmatpush.msra.mxu3 %v810_v46 }
  0xdb   : > { %895 = vmatmul.f32.gmra.mxu0 %v4302_v51  ;;  %1192 = vmatmul.f32.gmra.mxu3 %v4204_v62  ;;  %v4311_v59 = vpop.f32.mrf.mxu1  ;;  %v559_v62 = vld [vmem:[#allocation2 + $0x32] sm:$0xff] }
  0xdc   : > { %1629 = vmatpush.msra.mxu3 %v809_v15 }
  0xde   : > { %v1015_v10 = vpop.f32.mrf.mxu3  ;;  %1418 = vmatmul.f32.gmra.mxu1 %v558_v7 }
  0xe1   : > { %940 = vmatmul.f32.gmra.mxu2 %v427_v2  ;;  %v563_v2 = vld [vmem:[#allocation2 + $0x62] sm:$0xff] }
  0xe3   : > { %1302 = vmatmul.f32.vlgmr.msrb.gmra.mxu0 %v4180_v45  ;;  %1195 = vmatmul.f32.gmra.mxu3 %v4213_v5  ;;  %v4317_v16 = vpop.f32.mrf.mxu1 }
  0xe6   : > { %v1018_v17 = vpop.f32.mrf.mxu3  ;;  %1421 = vmatmul.f32.gmra.mxu1 %v559_v62 }
  0xe9   : > { %943 = vmatmul.f32.gmra.mxu2 %v428_v11 }
  0xeb   : > { %1305 = vmatmul.f32.gmra.mxu0 %v4184_v50  ;;  %1198 = vmatmul.f32.gmra.mxu3 %v4222_v12  ;;  %v4328_v5 = vpop.f32.mrf.mxu1 }
  0xee   : > { %v1021_v29 = vpop.f32.mrf.mxu3  ;;  %1424 = vmatmul.f32.gmra.mxu1 %v560_v25 }
  0xf0   : > { %v4320_v45 = vpop.f32.mrf.mxu0 }
  0xf1   : > { %1076 = vmatmul.f32.vlgmr.msrb.gmra.mxu2 %v461_v18 }
  0xf3   : > { %1308 = vmatmul.f32.gmra.mxu0 %v4189_v52  ;;  %1201 = vmatmul.f32.gmra.mxu3 %v4231_v19  ;;  %v4337_v12 = vpop.f32.mrf.mxu1 }
  0xf4   : > { %v899_v50 = vpop.f32.mrf.mxu2 }
  0xf5   : > { %v900_v28 = vadd.f32 %v4325_v21, %v899_v50 }
  0xf6   : > { %v1024_v39 = vpop.f32.mrf.mxu3  ;;  %1427 = vmatmul.f32.gmra.mxu1 %v561_v36 }
  0xf7   : > { %v4332_v31 = vadd.f32 %v1012_v1, %v900_v28  ;;  %v565_v28 = vld [vmem:[#allocation2 + $0x7a] sm:$0xff] }
  0xf8   : > { %v4334_v32 = vpop.f32.mrf.mxu0 }
  0xf9   : > { %1079 = vmatmul.f32.gmra.mxu2 %v462_v30 }
  0xfb   : > { %1311 = vmatmul.f32.gmra.mxu0 %v4196_v55  ;;  %1204 = vmatmul.f32.gmra.mxu3 %v4240_v26  ;;  %v4346_v19 = vpop.f32.mrf.mxu1 }
  0xfc   : > { %v902_v52 = vpop.f32.mrf.mxu2 }
  0xfd   : > { %v903_v38 = vadd.f32 %v4325_v21, %v902_v52 }
  0xfe   : > { %v1027_v54 = vpop.f32.mrf.mxu3  ;;  %1430 = vmatmul.f32.gmra.mxu1 %v562_v47 }
  0xff   : > { %v4341_v42 = vadd.f32 %v1015_v10, %v903_v38  ;;  %v808_v38 = vld [vmem:[#allocation6 + $0x3d0] sm:$0xff] }
 0x100   : > { %v4343_v43 = vpop.f32.mrf.mxu0  ;;  %1630 = vmatpush.msra.mxu3 %v808_v38  ;;  %v806_v38 = vld [vmem:[#allocation6 + $0x3c0] sm:$0xff] }
 0x101   : > { %1082 = vmatmul.f32.gmra.mxu2 %v557_v0  ;;  %v826_v0 = vld [vmem:[#allocation6 + $0x460] sm:$0xff] }
 0x102   : > { %1741 = vmatpush.msra.mxu0 %v826_v0 }
 0x103   : > { %1314 = vmatmul.f32.gmra.mxu0 %v4207_v63  ;;  %1207 = vmatmul.f32.gmra.mxu3 %v4249_v33  ;;  %v4355_v26 = vpop.f32.mrf.mxu1 }
 0x104   : > { %v905_v55 = vpop.f32.mrf.mxu2 }
 0x105   : > { %v906_v53 = vadd.f32 %v4325_v21, %v905_v55 }
 0x106   : > { %v1030_v4 = vpop.f32.mrf.mxu3  ;;  %1433 = vmatmul.f32.gmra.mxu1 %v563_v2 }
 0x107   : > { %v4350_v57 = vadd.f32 %v1018_v17, %v906_v53  ;;  %v564_v17 = vld [vmem:[#allocation2 + $0x6a] sm:$0xff] }
 0x108   : > { %v4352_v1 = vpop.f32.mrf.mxu0 }
 0x109   : > { %1085 = vmatmul.f32.gmra.mxu2 %v558_v7  ;;  %v793_v7 = vld [vmem:[#allocation6 + $0x358] sm:$0xff] }
 0x10a   : > { %1516 = vmatpush.msra.mxu2 %v793_v7  ;;  %v4404_v7 = vld [vmem:[#allocation2 + $0x9a] sm:$0xff] }
 0x10b   : > { %1317 = vmatmul.f32.gmra.mxu0 %v4216_v6  ;;  %1210 = vmatmul.f32.gmra.mxu3 %v4258_v40  ;;  %v4364_v33 = vpop.f32.mrf.mxu1 }
 0x10c   : > { %v908_v63 = vpop.f32.mrf.mxu2 }
 0x10d   : > { %v909_v3 = vadd.f32 %v4325_v21, %v908_v63 }
 0x10e   : > { %v1033_v22 = vpop.f32.mrf.mxu3  ;;  %1436 = vmatmul.f32.gmra.mxu1 %v564_v17 }
 0x10f   : > { %v4359_v10 = vadd.f32 %v1021_v29, %v909_v3 }
 0x110   : > { %v4361_v11 = vpop.f32.mrf.mxu0 }
 0x111   : > { %1088 = vmatmul.f32.gmra.mxu2 %v559_v62  ;;  %v825_v62 = vld [vmem:[#allocation6 + $0x458] sm:$0xff] }
 0x112   : > { %1742 = vmatpush.msra.mxu0 %v825_v62  ;;  %v4416_v62 = vld [vmem:[#allocation2 + $0xaa] sm:$0xff] }
 0x113   : > { %1320 = vmatmul.f32.gmra.mxu0 %v4225_v13  ;;  %1213 = vmatmul.f32.gmra.mxu3 %v4267_v48  ;;  %v4373_v40 = vpop.f32.mrf.mxu1 }
 0x114   : > { %v911_v6 = vpop.f32.mrf.mxu2 }
 0x115   : > { %v912_v18 = vadd.f32 %v4325_v21, %v911_v6 }
 0x116   : > { %v1036_v30 = vpop.f32.mrf.mxu3  ;;  %1439 = vmatmul.f32.gmra.mxu1 %v565_v28 }
 0x117   : > { %v4368_v24 = vadd.f32 %v1024_v39, %v912_v18  ;;  %v566_v39 = vld [vmem:[#allocation2 + $0x82] sm:$0xff] }
 0x118   : > { %v4370_v50 = vpop.f32.mrf.mxu0 }
 0x119   : > { %1091 = vmatmul.f32.gmra.mxu2 %v560_v25  ;;  %v792_v25 = vld [vmem:[#allocation6 + $0x350] sm:$0xff] }
 0x11a   : > { %1517 = vmatpush.msra.mxu2 %v792_v25 }
 0x11b   : > { %1323 = vmatmul.f32.gmra.mxu0 %v4234_v20  ;;  %1216 = vmatmul.f32.gmra.mxu3 %v4276_v58  ;;  %v4383_v48 = vpop.f32.mrf.mxu1  ;;  %v4392_v58 = vld [vmem:[#allocation2 + $0x92] sm:$0xff] }
 0x11c   : > { %v914_v13 = vpop.f32.mrf.mxu2 }
 0x11d   : > { %v915_v29 = vadd.f32 %v4325_v21, %v914_v13 }
 0x11e   : > { %v1039_v46 = vpop.f32.mrf.mxu3  ;;  %1442 = vmatmul.f32.gmra.mxu1 %v566_v39 }
 0x11f   : > { %v4377_v35 = vadd.f32 %v1027_v54, %v915_v29 }
 0x120   : > { %v4379_v52 = vpop.f32.mrf.mxu0 }
 0x121   : > { %1094 = vmatmul.f32.gmra.mxu2 %v561_v36  ;;  %v824_v36 = vld [vmem:[#allocation6 + $0x450] sm:$0xff] }
 0x122   : > { %1743 = vmatpush.msra.mxu0 %v824_v36 }
 0x123   : > { %1326 = vmatmul.f32.gmra.mxu0 %v4243_v27  ;;  %1219 = vmatmul.f32.gmra.mxu3 %v4285_v8  ;;  %v4395_v63 = vpop.f32.mrf.mxu1  ;;  %v807_v8 = vld [vmem:[#allocation6 + $0x3c8] sm:$0xff] }
 0x124   : > { %v917_v20 = vpop.f32.mrf.mxu2  ;;  %1631 = vmatpush.msra.mxu3 %v807_v8 }
 0x125   : > { %v918_v44 = vadd.f32 %v4325_v21, %v917_v20  ;;  %v4428_v20 = vld [vmem:[#allocation2 + $0xb2] sm:$0xff] }
 0x126   : > { %v1042_v0 = vpop.f32.mrf.mxu3  ;;  %1445 = vmatmul.f32.gmra.mxu1 %v4392_v58  ;;  %1632 = vmatpush.msra.mxu3 %v806_v38 }
 0x127   : > { %v4386_v55 = vadd.f32 %v1030_v4, %v918_v44 }
 0x128   : > { %v4388_v53 = vpop.f32.mrf.mxu0 }
 0x129   : > { %5918 = vst [vmem:[#allocation13_spill] sm:$0xff] %v4386_v55  ;;  %1097 = vmatmul.f32.gmra.mxu2 %v562_v47  ;;  %v791_v47 = vld [vmem:[#allocation6 + $0x348] sm:$0xff] }
 0x12a   : > { %1518 = vmatpush.msra.mxu2 %v791_v47  ;;  %v4439_v47 = vld [vmem:[#allocation2 + $0xc2] sm:$0xff] }
 0x12b   : > { %1329 = vmatmul.f32.gmra.mxu0 %v4252_v34  ;;  %1222 = vmatmul.f32.gmra.mxu3 %v4294_v23  ;;  %v823_v23 = vld [vmem:[#allocation6 + $0x448] sm:$0xff] }
 0x12c   : > { %v920_v27 = vpop.f32.mrf.mxu2  ;;  %1744 = vmatpush.msra.mxu0 %v823_v23 }
 0x12d   : > { %v921_v54 = vadd.f32 %v4325_v21, %v920_v27 }
 0x12e   : > { %v1045_v6 = vpop.f32.mrf.mxu3  ;;  %1448 = vmatmul.f32.gmra.mxu1 %v4404_v7 }
 0x12f   : > { %v4398_v3 = vadd.f32 %v1033_v22, %v921_v54 }
 0x130   : > { %v4400_v4 = vpop.f32.mrf.mxu0 }
 0x131   : > { %5919 = vst [vmem:[#allocation14_spill] sm:$0xff] %v4398_v3  ;;  %1100 = vmatmul.f32.gmra.mxu2 %v563_v2  ;;  %v4412_v2 = vpop.f32.mrf.mxu1  ;;  %v4489_v3 = vld [vmem:[#allocation2 + $0xfa] sm:$0xff] }
 0x133   : > { %1332 = vmatmul.f32.gmra.mxu0 %v4261_v41  ;;  %1225 = vmatmul.f32.gmra.mxu3 %v4298_v37 }
 0x134   : > { %v923_v34 = vpop.f32.mrf.mxu2 }
 0x135   : > { %v924_v15 = vadd.f32 %v4325_v21, %v923_v34 }
 0x136   : > { %v1048_v29 = vpop.f32.mrf.mxu3  ;;  %1451 = vmatmul.f32.gmra.mxu1 %v4416_v62 }
 0x137   : > { %v4408_v18 = vadd.f32 %v1036_v30, %v924_v15  ;;  %v508_v15 = vld [vmem:[#allocation2 + $0xc8] sm:$0xff] }
 0x138   : > { %v4410_v22 = vpop.f32.mrf.mxu0 }
 0x139   : > { %5920 = vst [vmem:[#allocation15_spill] sm:$0xff] %v4408_v18  ;;  %1103 = vmatmul.f32.gmra.mxu2 %v564_v17  ;;  %v790_v17 = vld [vmem:[#allocation6 + $0x340] sm:$0xff]  ;;  %v4425_v37 = vpop.f32.mrf.mxu1 }
 0x13a   : > { %1519 = vmatpush.msra.mxu2 %v790_v17  ;;  %v4448_v17 = vld [vmem:[#allocation2 + $0xca] sm:$0xff] }
 0x13b   : > { %1335 = vmatmul.f32.gmra.mxu0 %v4270_v49  ;;  %1228 = vmatmul.f32.gmra.mxu3 %v4302_v51  ;;  %v822_v51 = vld [vmem:[#allocation6 + $0x440] sm:$0xff] }
 0x13c   : > { %v926_v41 = vpop.f32.mrf.mxu2  ;;  %1745 = vmatpush.msra.mxu0 %v822_v51 }
 0x13d   : > { %v927_v13 = vadd.f32 %v4325_v21, %v926_v41  ;;  %v789_v41 = vld [vmem:[#allocation6 + $0x338] sm:$0xff] }
 0x13e   : > { %1454 = vmatmul.f32.gmra.mxu1 %v4428_v20  ;;  %1520 = vmatpush.msra.mxu2 %v789_v41 }
 0x13f   : > { %v4420_v30 = vadd.f32 %v1039_v46, %v927_v13  ;;  %v1051_v46 = vpop.f32.mrf.mxu3 }
 0x140   : > { %v4422_v25 = vpop.f32.mrf.mxu0 }
 0x141   : > { %5921 = vst [vmem:[#allocation16_spill] sm:$0xff] %v4420_v30  ;;  %1106 = vmatmul.f32.gmra.mxu2 %v565_v28  ;;  %v507_v28 = vld [vmem:[#allocation2 + $0xc0] sm:$0xff]  ;;  %v4437_v54 = vpop.f32.mrf.mxu1 }
 0x143   : > { %1338 = vmatmul.f32.gmra.mxu0 %v4279_v60  ;;  %1231 = vmatmul.f32.gmra.mxu3 %v507_v28  ;;  %v509_v28 = vld [vmem:[#allocation2 + $0xd8] sm:$0xff] }
 0x144   : > { %v929_v49 = vpop.f32.mrf.mxu2 }
 0x145   : > { %v930_v44 = vadd.f32 %v4325_v21, %v929_v49 }
 0x146   : > { %1457 = vmatmul.f32.gmra.mxu1 %v4439_v47 }
 0x147   : > { %v4432_v36 = vadd.f32 %v1042_v0, %v930_v44  ;;  %v1054_v34 = vpop.f32.mrf.mxu3 }
 0x148   : > { %v4434_v27 = vpop.f32.mrf.mxu0 }
 0x149   : > { %5922 = vst [vmem:[#allocation17_spill] sm:$0xff] %v4432_v36  ;;  %1109 = vmatmul.f32.gmra.mxu2 %v566_v39  ;;  %v539_v39 = vld [vmem:[#allocation2 + $0xc1] sm:$0xff] }
 0x14b   : > { %1341 = vmatmul.f32.gmra.mxu0 %v4288_v9  ;;  %v805_v9 = vld [vmem:[#allocation6 + $0x3b8] sm:$0xff]  ;;  %1234 = vmatmul.f32.gmra.mxu3 %v508_v15 }
 0x14c   : > { %v932_v60 = vpop.f32.mrf.mxu2  ;;  %1633 = vmatpush.msra.mxu3 %v805_v9 }
 0x14d   : > { %v933_v8 = vadd.f32 %v4325_v21, %v932_v60  ;;  %v540_v60 = vld [vmem:[#allocation2 + $0xc9] sm:$0xff] }
 0x14e   : > { %1460 = vmatmul.f32.gmra.mxu1 %v4448_v17 }
 0x14f   : > { %v4443_v0 = vadd.f32 %v1045_v6, %v933_v8  ;;  %v1057_v49 = vpop.f32.mrf.mxu3  ;;  %v4451_v6 = vpop.f32.mrf.mxu1  ;;  %v821_v8 = vld [vmem:[#allocation6 + $0x438] sm:$0xff] }
 0x150   : > { %v4445_v23 = vpop.f32.mrf.mxu0  ;;  %1746 = vmatpush.msra.mxu0 %v821_v8  ;;  %v4468_v8 = vld [vmem:[#allocation2 + $0xe2] sm:$0xff] }
 0x151   : > { %5923 = vst [vmem:[#allocation18_spill] sm:$0xff] %v4443_v0  ;;  %1112 = vmatmul.f32.gmra.mxu2 %v4392_v58  ;;  %v2282_v58 = vld [vmem:[#allocation8 + $0x78] sm:$0xff]  ;;  %v2281_v0 = vld [vmem:[#allocation8 + $0x70] sm:$0xff] }
 0x152   : > { %2415 = vmatpush.msra.mxu1 %v2282_v58 }
 0x153   : > { %1344 = vmatmul.f32.gmra.mxu0 %v539_v39  ;;  %1237 = vmatmul.f32.gmra.mxu3 %v509_v28  ;;  %v4459_v39 = vld [vmem:[#allocation2 + $0xda] sm:$0xff] }
 0x154   : > { %v935_v13 = vpop.f32.mrf.mxu2  ;;  %v804_v28 = vld [vmem:[#allocation6 + $0x3b0] sm:$0xff]  ;;  %2416 = vmatpush.msra.mxu1 %v2281_v0 }
 0x155   : > { %v936_v38 = vadd.f32 %v4325_v21, %v935_v13  ;;  %v510_v13 = vld [vmem:[#allocation2 + $0xe0] sm:$0xff]  ;;  %1634 = vmatpush.msra.mxu3 %v804_v28  ;;  %v4475_v28 = vld [vmem:[#allocation2 + $0xf2] sm:$0xff] }
 0x156   : > { %1463 = vmatmul.f32.gmra.mxu1 %v4459_v39 }
 0x157   : > { %v4454_v44 = vadd.f32 %v1048_v29, %v936_v38  ;;  %v1190_v9 = vpop.f32.mrf.mxu3  ;;  %v4465_v58 = vpop.f32.mrf.mxu1 }
 0x158   : > { %v4456_v51 = vpop.f32.mrf.mxu0 }
 0x159   : > { %5924 = vst [vmem:[#allocation19_spill] sm:$0xff] %v4454_v44  ;;  %1115 = vmatmul.f32.gmra.mxu2 %v4404_v7  ;;  %v541_v44 = vld [vmem:[#allocation2 + $0xd9] sm:$0xff] }
 0x15a   : > { %v788_v7 = vld [vmem:[#allocation6 + $0x330] sm:$0xff] }
 0x15b   : > { %1347 = vmatmul.f32.gmra.mxu0 %v540_v60  ;;  %1240 = vmatmul.f32.gmra.mxu3 %v510_v13  ;;  %v820_v13 = vld [vmem:[#allocation6 + $0x430] sm:$0xff] }
 0x15c   : > { %v938_v15 = vpop.f32.mrf.mxu2  ;;  %1521 = vmatpush.msra.mxu2 %v788_v7  ;;  %1747 = vmatpush.msra.mxu0 %v820_v13 }
 0x15d   : > { %v939_v41 = vadd.f32 %v4325_v21, %v938_v15 }
 0x15e   : > { %1466 = vmatmul.f32.gmra.mxu1 %v4468_v8 }
 0x15f   : > { %v4463_v29 = vadd.f32 %v1051_v46, %v939_v41  ;;  %v1193_v46 = vpop.f32.mrf.mxu3 }
 0x160   : > { %v1303_v38 = vpop.f32.mrf.mxu0 }
 0x161   : > { %5925 = vst [vmem:[#allocation20_spill] sm:$0xff] %v4463_v29  ;;  %1118 = vmatmul.f32.gmra.mxu2 %v4416_v62  ;;  %v511_v29 = vld [vmem:[#allocation2 + $0xf0] sm:$0xff]  ;;  %v542_v62 = vld [vmem:[#allocation2 + $0xe1] sm:$0xff] }
 0x163   : > { %1350 = vmatmul.f32.gmra.mxu0 %v541_v44  ;;  %v1416_v44 = vpop.f32.mrf.mxu1  ;;  %1243 = vmatmul.f32.gmra.mxu3 %v511_v29  ;;  %v543_v29 = vld [vmem:[#allocation2 + $0xf1] sm:$0xff] }
 0x164   : > { %v941_v60 = vpop.f32.mrf.mxu2 }
 0x165   : > { %v942_v15 = vadd.f32 %v4325_v21, %v941_v60 }
 0x166   : > { %1469 = vmatmul.f32.gmra.mxu1 %v4475_v28 }
 0x167   : > { %v4472_v41 = vadd.f32 %v1054_v34, %v942_v15  ;;  %v4478_v30 = vpop.f32.mrf.mxu3  ;;  %v852_v34 = vadd.f32 %v4325_v21, %v4308_v61 }
 0x168   : > { %v1306_v36 = vpop.f32.mrf.mxu0 }
 0x169   : > { %5926 = vst [vmem:[#allocation21_spill] sm:$0xff] %v4472_v41  ;;  %1121 = vmatmul.f32.gmra.mxu2 %v4428_v20  ;;  %v512_v20 = vld [vmem:[#allocation2 + $0xf8] sm:$0xff]  ;;  %v965_v13 = vadd.f32 %v4305_v56, %v852_v34 }
 0x16a   : > { %v544_v56 = vld [vmem:[#allocation2 + $0xf9] sm:$0xff] }
 0x16b   : > { %1353 = vmatmul.f32.gmra.mxu0 %v542_v62  ;;  %v787_v62 = vld [vmem:[#allocation6 + $0x328] sm:$0xff]  ;;  %1246 = vmatmul.f32.gmra.mxu3 %v512_v20  ;;  %v1419_v18 = vpop.f32.mrf.mxu1  ;;  %v513_v20 = vld [vmem:[#allocation2 + $0x108] sm:$0xff] }
 0x16c   : > { %v944_v7 = vpop.f32.mrf.mxu2  ;;  %1522 = vmatpush.msra.mxu2 %v787_v62  ;;  %v2280_v62 = vld [vmem:[#allocation8 + $0x68] sm:$0xff] }
 0x16d   : > { %v945_v60 = vadd.f32 %v4325_v21, %v944_v7  ;;  %v803_v7 = vld [vmem:[#allocation6 + $0x3a8] sm:$0xff]  ;;  %2417 = vmatpush.msra.mxu1 %v2280_v62 }
 0x16e   : > { %1635 = vmatpush.msra.mxu3 %v803_v7  ;;  %1472 = vmatmul.f32.gmra.mxu1 %v4489_v3 }
 0x16f   : > { %v4483_v0 = vadd.f32 %v1057_v49, %v945_v60  ;;  %v4491_v49 = vpop.f32.mrf.mxu3 }
 0x170   : > { %v4485_v15 = vpop.f32.mrf.mxu0 }
 0x171   : > { %5927 = vst [vmem:[#allocation22_spill] sm:$0xff] %v4483_v0  ;;  %1124 = vmatmul.f32.gmra.mxu2 %v4439_v47  ;;  %v855_v47 = vadd.f32 %v4325_v21, %v4314_v14  ;;  %v4502_v14 = vld [vmem:[#allocation2 + $0x10a] sm:$0xff] }
 0x173   : > { %1356 = vmatmul.f32.gmra.mxu0 %v543_v29  ;;  %1249 = vmatmul.f32.gmra.mxu3 %v513_v20  ;;  %v1422_v55 = vpop.f32.mrf.mxu1  ;;  %v786_v20 = vld [vmem:[#allocation6 + $0x320] sm:$0xff] }
 0x174   : > { %v1077_v41 = vpop.f32.mrf.mxu2  ;;  %1523 = vmatpush.msra.mxu2 %v786_v20 }
 0x175   : > { %v1078_v61 = vadd.f32 %v1077_v41, %v965_v13  ;;  %v968_v41 = vadd.f32 %v4311_v59, %v855_v47  ;;  %v819_v13 = vld [vmem:[#allocation6 + $0x428] sm:$0xff] }
 0x176   : > { %1748 = vmatpush.msra.mxu0 %v819_v13  ;;  %1475 = vmatmul.f32.gmra.mxu1 %v4502_v14 }
 0x177   : > { %v1191_v60 = vadd.f32 %v1190_v9, %v1078_v61  ;;  %v4504_v61 = vpop.f32.mrf.mxu3 }
 0x178   : > { %v4496_v0 = vpop.f32.mrf.mxu0 }
 0x179   : > { %1127 = vmatmul.f32.gmra.mxu2 %v4448_v17  ;;  %v1304_v34 = vadd.f32 %v1303_v38, %v1191_v60  ;;  %v858_v17 = vadd.f32 %v4325_v21, %v4320_v45  ;;  %v514_v60 = vld [vmem:[#allocation2 + $0x110] sm:$0xff] }
 0x17a   : > { %v4515_v45 = vld [vmem:[#allocation2 + $0x112] sm:$0xff] }
 0x17b   : > { %v4500_v29 = vadd.f32 %v1416_v44, %v1304_v34  ;;  %1359 = vmatmul.f32.gmra.mxu0 %v544_v56  ;;  %v545_v44 = vld [vmem:[#allocation2 + $0x109] sm:$0xff]  ;;  %1252 = vmatmul.f32.gmra.mxu3 %v514_v60  ;;  %v971_v62 = vadd.f32 %v4317_v16, %v858_v17  ;;  %v546_v17 = vld [vmem:[#allocation2 + $0x111] sm:$0xff] }
 0x17c   : > { %v1080_v7 = vpop.f32.mrf.mxu2  ;;  %v802_v34 = vld [vmem:[#allocation6 + $0x3a0] sm:$0xff] }
 0x17d   : > { %v1081_v9 = vadd.f32 %v1080_v7, %v968_v41  ;;  %1636 = vmatpush.msra.mxu3 %v802_v34  ;;  %v515_v7 = vld [vmem:[#allocation2 + $0x120] sm:$0xff]  ;;  %v2279_v16 = vld [vmem:[#allocation8 + $0x60] sm:$0xff]  ;;  %v864_v34 = vadd.f32 %v4325_v21, %v4343_v43  ;;  %v801_v43 = vld [vmem:[#allocation6 + $0x398] sm:$0xff] }
 0x17e   : > { %1478 = vmatmul.f32.gmra.mxu1 %v4515_v45 }
 0x17f   : > { %v1194_v38 = vadd.f32 %v1193_v46, %v1081_v9  ;;  %v4517_v13 = vpop.f32.mrf.mxu3  ;;  %2418 = vmatpush.msra.mxu1 %v2279_v16  ;;  %1637 = vmatpush.msra.mxu3 %v801_v43 }
 0x180   : > { %v4509_v59 = vpop.f32.mrf.mxu0 }
 0x181   : > { %1130 = vmatmul.f32.gmra.mxu2 %v4459_v39  ;;  %v1307_v47 = vadd.f32 %v1306_v36, %v1194_v38  ;;  %v861_v36 = vadd.f32 %v4325_v21, %v4334_v32  ;;  %v818_v32 = vld [vmem:[#allocation6 + $0x420] sm:$0xff] }
 0x182   : > { %1749 = vmatpush.msra.mxu0 %v818_v32 }
 0x183   : > { %v4513_v56 = vadd.f32 %v1419_v18, %v1307_v47  ;;  %1362 = vmatmul.f32.gmra.mxu0 %v545_v44  ;;  %v1425_v18 = vpop.f32.mrf.mxu1  ;;  %1255 = vmatmul.f32.gmra.mxu3 %v515_v7  ;;  %v974_v60 = vadd.f32 %v4328_v5, %v861_v36  ;;  %v785_v36 = vld [vmem:[#allocation6 + $0x318] sm:$0xff]  ;;  %v977_v7 = vadd.f32 %v4337_v12, %v864_v34 }
 0x184   : > { %v1083_v41 = vpop.f32.mrf.mxu2  ;;  %1524 = vmatpush.msra.mxu2 %v785_v36  ;;  %v2278_v12 = vld [vmem:[#allocation8 + $0x58] sm:$0xff] }
 0x185   : > { %v1084_v46 = vadd.f32 %v1083_v41, %v971_v62  ;;  %v516_v41 = vld [vmem:[#allocation2 + $0x128] sm:$0xff]  ;;  %2419 = vmatpush.msra.mxu1 %v2278_v12  ;;  %v800_v12 = vld [vmem:[#allocation6 + $0x390] sm:$0xff] }
 0x186   : > { %1638 = vmatpush.msra.mxu3 %v800_v12  ;;  %v520_v12 = vld [vmem:[#allocation2 + $0x158] sm:$0xff] }
 0x187   : > { %v1197_v39 = vadd.f32 %v4478_v30, %v1084_v46  ;;  %v4530_v30 = vld [vmem:[#allocation2 + $0x122] sm:$0xff]  ;;  %v4532_v62 = vpop.f32.mrf.mxu3 }
 0x188   : > { %v4523_v9 = vpop.f32.mrf.mxu0  ;;  %1481 = vmatmul.f32.gmra.mxu1 %v4530_v30 }
 0x189   : > { %1133 = vmatmul.f32.gmra.mxu2 %v4468_v8  ;;  %v1310_v38 = vadd.f32 %v4485_v15, %v1197_v39 }
 0x18b   : > { %v4528_v44 = vadd.f32 %v1422_v55, %v1310_v38  ;;  %1365 = vmatmul.f32.gmra.mxu0 %v546_v17  ;;  %v547_v55 = vld [vmem:[#allocation2 + $0x121] sm:$0xff]  ;;  %v1428_v39 = vpop.f32.mrf.mxu1  ;;  %1258 = vmatmul.f32.gmra.mxu3 %v516_v41 }
 0x18c   : > { %v1086_v47 = vpop.f32.mrf.mxu2 }
 0x18d   : > { %v1087_v20 = vadd.f32 %v1086_v47, %v974_v60  ;;  %v517_v47 = vld [vmem:[#allocation2 + $0x138] sm:$0xff] }
 0x18f   : > { %v1200_v15 = vadd.f32 %v4491_v49, %v1087_v20  ;;  %v4545_v49 = vld [vmem:[#allocation2 + $0x12a] sm:$0xff]  ;;  %v4547_v60 = vpop.f32.mrf.mxu3 }
 0x190   : > { %v4538_v5 = vpop.f32.mrf.mxu0  ;;  %1484 = vmatmul.f32.gmra.mxu1 %v4545_v49  ;;  %v548_v20 = vld [vmem:[#allocation2 + $0x129] sm:$0xff] }
 0x191   : > { %1136 = vmatmul.f32.gmra.mxu2 %v4475_v28  ;;  %v1313_v46 = vadd.f32 %v4496_v0, %v1200_v15  ;;  %v867_v0 = vadd.f32 %v4325_v21, %v4352_v1 }
 0x193   : > { %v4543_v16 = vadd.f32 %v1425_v18, %v1313_v46  ;;  %1368 = vmatmul.f32.gmra.mxu0 %v547_v55  ;;  %1261 = vmatmul.f32.gmra.mxu3 %v517_v47  ;;  %v980_v15 = vadd.f32 %v4346_v19, %v867_v0  ;;  %v817_v55 = vld [vmem:[#allocation6 + $0x418] sm:$0xff]  ;;  %v1431_v46 = vpop.f32.mrf.mxu1  ;;  %v518_v19 = vld [vmem:[#allocation2 + $0x140] sm:$0xff] }
 0x194   : > { %v1089_v17 = vpop.f32.mrf.mxu2  ;;  %1750 = vmatpush.msra.mxu0 %v817_v55  ;;  %v784_v0 = vld [vmem:[#allocation6 + $0x310] sm:$0xff] }
 0x195   : > { %v1090_v38 = vadd.f32 %v1089_v17, %v977_v7  ;;  %v549_v17 = vld [vmem:[#allocation2 + $0x139] sm:$0xff]  ;;  %1525 = vmatpush.msra.mxu2 %v784_v0 }
 0x197   : > { %v1203_v32 = vadd.f32 %v4504_v61, %v1090_v38  ;;  %v4560_v61 = vld [vmem:[#allocation2 + $0x13a] sm:$0xff]  ;;  %v4562_v7 = vpop.f32.mrf.mxu3 }
 0x198   : > { %v4553_v18 = vpop.f32.mrf.mxu0  ;;  %1487 = vmatmul.f32.gmra.mxu1 %v4560_v61 }
 0x199   : > { %1139 = vmatmul.f32.gmra.mxu2 %v4489_v3  ;;  %v1316_v34 = vadd.f32 %v4509_v59, %v1203_v32  ;;  %v870_v59 = vadd.f32 %v4325_v21, %v4361_v11 }
 0x19b   : > { %v4558_v41 = vadd.f32 %v1428_v39, %v1316_v34  ;;  %1371 = vmatmul.f32.gmra.mxu0 %v548_v20  ;;  %1264 = vmatmul.f32.gmra.mxu3 %v518_v19  ;;  %v983_v32 = vadd.f32 %v4355_v26, %v870_v59  ;;  %v519_v26 = vld [vmem:[#allocation2 + $0x150] sm:$0xff] }
 0x19c   : > { %v1092_v1 = vpop.f32.mrf.mxu2 }
 0x19d   : > { %v1093_v36 = vadd.f32 %v1092_v1, %v980_v15  ;;  %v1434_v15 = vpop.f32.mrf.mxu1  ;;  %v2277_v1 = vld [vmem:[#allocation8 + $0x50] sm:$0xff] }
 0x19e   : > { %2420 = vmatpush.msra.mxu1 %v2277_v1  ;;  %v4605_v1 = vld [vmem:[#allocation2 + $0x15a] sm:$0xff] }
 0x19f   : > { %v1206_v43 = vadd.f32 %v4517_v13, %v1093_v36  ;;  %v4575_v13 = vld [vmem:[#allocation2 + $0x142] sm:$0xff]  ;;  %v4577_v34 = vpop.f32.mrf.mxu3 }
 0x1a0   : > { %v4568_v39 = vpop.f32.mrf.mxu0  ;;  %1490 = vmatmul.f32.gmra.mxu1 %v4575_v13  ;;  %v550_v36 = vld [vmem:[#allocation2 + $0x141] sm:$0xff] }
 0x1a1   : > { %1142 = vmatmul.f32.gmra.mxu2 %v4502_v14  ;;  %v1319_v38 = vadd.f32 %v4523_v9, %v1206_v43  ;;  %v873_v9 = vadd.f32 %v4325_v21, %v4370_v50 }
 0x1a3   : > { %v4573_v47 = vadd.f32 %v1431_v46, %v1319_v38  ;;  %1374 = vmatmul.f32.gmra.mxu0 %v549_v17  ;;  %1267 = vmatmul.f32.gmra.mxu3 %v519_v26  ;;  %v986_v43 = vadd.f32 %v4364_v33, %v873_v9  ;;  %v816_v17 = vld [vmem:[#allocation6 + $0x410] sm:$0xff]  ;;  %v783_v9 = vld [vmem:[#allocation6 + $0x308] sm:$0xff] }
 0x1a4   : > { %v1095_v11 = vpop.f32.mrf.mxu2  ;;  %1751 = vmatpush.msra.mxu0 %v816_v17  ;;  %1526 = vmatpush.msra.mxu2 %v783_v9  ;;  %v2276_v17 = vld [vmem:[#allocation8 + $0x48] sm:$0xff]  ;;  %v882_v9 = vadd.f32 %v4325_v21, %v4400_v4 }
 0x1a5   : > { %v1096_v20 = vadd.f32 %v1095_v11, %v983_v32  ;;  %v876_v32 = vadd.f32 %v4325_v21, %v4379_v52  ;;  %v1437_v33 = vpop.f32.mrf.mxu1  ;;  %v799_v52 = vld [vmem:[#allocation6 + $0x388] sm:$0xff]  ;;  %2421 = vmatpush.msra.mxu1 %v2276_v17 }
 0x1a6   : > { %1639 = vmatpush.msra.mxu3 %v799_v52 }
 0x1a7   : > { %v1209_v55 = vadd.f32 %v4532_v62, %v1096_v20  ;;  %v4590_v62 = vld [vmem:[#allocation2 + $0x152] sm:$0xff]  ;;  %v4592_v0 = vpop.f32.mrf.mxu3 }
 0x1a8   : > { %v4583_v46 = vpop.f32.mrf.mxu0  ;;  %1493 = vmatmul.f32.gmra.mxu1 %v4590_v62  ;;  %v551_v20 = vld [vmem:[#allocation2 + $0x151] sm:$0xff] }
 0x1a9   : > { %1145 = vmatmul.f32.gmra.mxu2 %v4515_v45  ;;  %v1322_v59 = vadd.f32 %v4538_v5, %v1209_v55  ;;  %v989_v55 = vadd.f32 %v4373_v40, %v876_v32  ;;  %v521_v40 = vld [vmem:[#allocation2 + $0x168] sm:$0xff]  ;;  %v362_v32 = vld [vmem:[%s4111_s28 + $0xf0] sm:$0xff] }
 0x1aa   : > { %395 = vst [vmem:[#allocation2 + $0x181] sm:$0xff] %v362_v32 }
 0x1ab   : > { %v4588_v19 = vadd.f32 %v1434_v15, %v1322_v59  ;;  %1377 = vmatmul.f32.gmra.mxu0 %v550_v36  ;;  %1270 = vmatmul.f32.gmra.mxu3 %v520_v12 }
 0x1ac   : > { %v1098_v50 = vpop.f32.mrf.mxu2 }
 0x1ad   : > { %v1099_v38 = vadd.f32 %v1098_v50, %v986_v43 }
 0x1af   : > { %v1212_v5 = vadd.f32 %v4547_v60, %v1099_v38  ;;  %v4607_v59 = vpop.f32.mrf.mxu3  ;;  %v552_v38 = vld [vmem:[#allocation2 + $0x159] sm:$0xff] }
 0x1b0   : > { %v4598_v11 = vpop.f32.mrf.mxu0  ;;  %1496 = vmatmul.f32.gmra.mxu1 %v4605_v1 }
 0x1b1   : > { %1148 = vmatmul.f32.gmra.mxu2 %v4530_v30  ;;  %v1325_v15 = vadd.f32 %v4553_v18, %v1212_v5  ;;  %v879_v18 = vadd.f32 %v4325_v21, %v4388_v53  ;;  %v815_v53 = vld [vmem:[#allocation6 + $0x408] sm:$0xff] }
 0x1b2   : > { %1752 = vmatpush.msra.mxu0 %v815_v53  ;;  %v523_v53 = vld [vmem:[#allocation2 + $0x180] sm:$0xff] }
 0x1b3   : > { %v4603_v26 = vadd.f32 %v1437_v33, %v1325_v15  ;;  %1380 = vmatmul.f32.gmra.mxu0 %v551_v20  ;;  %1273 = vmatmul.f32.gmra.mxu3 %v521_v40  ;;  %v992_v12 = vadd.f32 %v4383_v48, %v879_v18  ;;  %v782_v18 = vld [vmem:[#allocation6 + $0x300] sm:$0xff] }
 0x1b4   : > { %v1101_v60 = vpop.f32.mrf.mxu2  ;;  %1527 = vmatpush.msra.mxu2 %v782_v18  ;;  %v798_v40 = vld [vmem:[#allocation6 + $0x380] sm:$0xff] }
 0x1b5   : > { %v1102_v36 = vadd.f32 %v1101_v60, %v989_v55  ;;  %v522_v55 = vld [vmem:[#allocation2 + $0x170] sm:$0xff]  ;;  %1640 = vmatpush.msra.mxu3 %v798_v40 }
 0x1b6   : > { %v553_v60 = vld [vmem:[#allocation2 + $0x169] sm:$0xff] }
 0x1b7   : > { %v1215_v43 = vadd.f32 %v4562_v7, %v1102_v36  ;;  %v4619_v7 = vld [vmem:[#allocation2 + $0x16a] sm:$0xff]  ;;  %v1226_v15 = vpop.f32.mrf.mxu3 }
 0x1b8   : > { %v1336_v50 = vpop.f32.mrf.mxu0  ;;  %1499 = vmatmul.f32.gmra.mxu1 %v4619_v7  ;;  %v363_v36 = vld [vmem:[%s4111_s28 + $0xf8] sm:$0xff]  ;;  %s3575_s28 = sshll.u32 %s3572_s10, 4  ;;  %s3576_s28 = int_to_ptr.hbm [resolvable:$true] %s3575_s28 }
 0x1b9   : > { %1151 = vmatmul.f32.gmra.mxu2 %v4545_v49  ;;  %v4616_v5 = vadd.f32 %v4568_v39, %v1215_v43  ;;  %396 = vst [vmem:[#allocation2 + $0x189] sm:$0xff] %v363_v36  ;;  %v995_v43 = vadd.f32 %v4395_v63, %v882_v9  ;;  %s3905_s24 = sshra.s32 %s3576_s28, 4  ;;  %s3906_s24 = int_to_ptr.hbm [resolvable:$true] %s3905_s24 }
 0x1ba   : > { %s3907_s29 = scalar_lea.hbm %s3906_s24, 256  ;;  %p3912_p11 = scmp.lt.s32.totalorder %s3906_s24, %s5907_s5 }
 0x1bb   : > { %1383 = vmatmul.f32.gmra.mxu0 %v552_v38  ;;  %1276 = vmatmul.f32.gmra.mxu3 %v522_v55  ;;  %v814_v55 = vld [vmem:[#allocation6 + $0x400] sm:$0xff]  ;;  %p3908_p1 = scmp.ne.s32.totalorder %s3906_s24, %s3907_s29  ;;  %p3913_p2 = scmp.lt.s32.totalorder %s3911_s12, %s3907_s29 }
 0x1bc   : > { %v1104_v33 = vpop.f32.mrf.mxu2  ;;  %1753 = vmatpush.msra.mxu0 %v814_v55 }
 0x1bd   : > { %v1105_v20 = vadd.f32 %v1104_v33, %v992_v12  ;;  %v2275_v33 = vld [vmem:[#allocation8 + $0x40] sm:$0xff]  ;;  %p3909_p4 = pnand %p3908_p1, %p4072_p3  ;;  %p3914_p9 = por %p3913_p2, %p3912_p11 }
 0x1be   : > { %2422 = vmatpush.msra.mxu1 %v2275_v33 }
 0x1bf   : > { %v1218_v39 = vadd.f32 %v4577_v34, %v1105_v20  ;;  %v4631_v34 = vld [vmem:[#allocation2 + $0x172] sm:$0xff]  ;;  %v1229_v38 = vpop.f32.mrf.mxu3  ;;  %p3910_p8 = pneg %p3909_p4 }
 0x1c0   : > { %v1339_v52 = vpop.f32.mrf.mxu0  ;;  %1502 = vmatmul.f32.gmra.mxu1 %v4631_v34 }
 0x1c1   : > { %1154 = vmatmul.f32.gmra.mxu2 %v4560_v61  ;;  %v4628_v48 = vadd.f32 %v4583_v46, %v1218_v39  ;;  %v885_v46 = vadd.f32 %v4325_v21, %v4410_v22  ;;  %v554_v39 = vld [vmem:[#allocation2 + $0x171] sm:$0xff]  ;;  %v587_v22 = vld [vmem:[#allocation2 + $0x182] sm:$0xff]  ;;  %p3915_p10 = pnand %p3914_p9, %p3910_p8 }
 0x1c3   : > { %1386 = vmatmul.f32.gmra.mxu0 %v553_v60  ;;  %1279 = vmatmul.f32.gmra.mxu3 %v523_v53  ;;  %v998_v9 = vadd.f32 %v4412_v2, %v885_v46  ;;  %v588_v46 = vld [vmem:[#allocation2 + $0x18a] sm:$0xff] }
 0x1c4   : > { %v1107_v4 = vpop.f32.mrf.mxu2 }
 0x1c5   : > { %v1108_v17 = vadd.f32 %v1107_v4, %v995_v43  ;;  %v888_v43 = vadd.f32 %v4325_v21, %v4422_v25  ;;  %v891_v25 = vadd.f32 %v4325_v21, %v4434_v27 }
 0x1c7   : > { %v1221_v12 = vadd.f32 %v4592_v0, %v1108_v17  ;;  %v1232_v0 = vpop.f32.mrf.mxu3  ;;  %v1001_v2 = vadd.f32 %v4425_v37, %v888_v43  ;;  %v1004_v37 = vadd.f32 %v4437_v54, %v891_v25  ;;  %v590_v25 = vld [vmem:[#allocation2 + $0x30] sm:$0xff] }
 0x1c8   : > { %v1342_v20 = vpop.f32.mrf.mxu0  ;;  %1505 = vmatmul.f32.gmra.mxu1 %v587_v22 }
 0x1c9   : > { %1157 = vmatmul.f32.gmra.mxu2 %v4575_v13  ;;  %v4639_v63 = vadd.f32 %v4598_v11, %v1221_v12  ;;  %v524_v13 = vld [vmem:[#allocation2 + $0x188] sm:$0xff] }
 0x1cb   : > { %1389 = vmatmul.f32.gmra.mxu0 %v554_v39  ;;  %1282 = vmatmul.f32.gmra.mxu3 %v524_v13  ;;  %v2274_v39 = vld [vmem:[#allocation8 + $0x38] sm:$0xff]  ;;  %v2273_v13 = vld [vmem:[#allocation8 + $0x30] sm:$0xff] }
 0x1cc   : > { %v1110_v60 = vpop.f32.mrf.mxu2  ;;  %2423 = vmatpush.msra.mxu1 %v2274_v39 }
 0x1cd   : > { %v1111_v18 = vadd.f32 %v1110_v60, %v998_v9  ;;  %v894_v60 = vadd.f32 %v4325_v21, %v4445_v23 }
 0x1ce   : > { %2424 = vmatpush.msra.mxu1 %v2273_v13 }
 0x1cf   : > { %v1224_v40 = vadd.f32 %v4607_v59, %v1111_v18  ;;  %v1235_v53 = vpop.f32.mrf.mxu3  ;;  %v622_v59 = vld [vmem:[#allocation2 + $0x31] sm:$0xff] }
 0x1d0   : > { %v1345_v4 = vpop.f32.mrf.mxu0  ;;  %1508 = vmatmul.f32.gmra.mxu1 %v588_v46  ;;  %v654_v18 = vld [vmem:[#allocation2 + $0x32] sm:$0xff] }
 0x1d1   : > { %1160 = vmatmul.f32.gmra.mxu2 %v4590_v62  ;;  %v4646_v11 = vadd.f32 %v1336_v50, %v1224_v40  ;;  %v3794_v40 = vld [vmem:[%s5904_s2] ss:$0 sm:$0xff] }
 0x1d2   : > { %v897_v21 = vadd.f32 %v3794_v40, %v4456_v51  ;;  %v625_v51 = vld [vmem:[#allocation2 + $0x51] sm:$0xff] }
 0x1d3   : > { %1392 = vmatmul.f32.gmra.mxu0 %v362_v32  ;;  %1641 = vmatmul.f32.vlgmr.msra.gmra.mxu3 %v622_v59  ;;  %v656_v59 = vld [vmem:[#allocation2 + $0x4a] sm:$0xff] }
 0x1d4   : > { %v1113_v17 = vpop.f32.mrf.mxu2 }
 0x1d5   : > { %v1114_v12 = vadd.f32 %v1113_v17, %v1001_v2 }
 0x1d7   : > { %v1227_v33 = vadd.f32 %v1226_v15, %v1114_v12  ;;  %v1238_v55 = vpop.f32.mrf.mxu3  ;;  %v623_v15 = vld [vmem:[#allocation2 + $0x39] sm:$0xff] }
 0x1d8   : > { %v1348_v9 = vpop.f32.mrf.mxu0 }
 0x1d9   : > { %1163 = vmatmul.f32.gmra.mxu2 %v4605_v1  ;;  %v4652_v62 = vadd.f32 %v1339_v52, %v1227_v33  ;;  %v1007_v1 = vadd.f32 %v4451_v6, %v894_v60  ;;  %v1010_v6 = vadd.f32 %v4465_v58, %v897_v21  ;;  %v2272_v60 = vld [vmem:[#allocation8 + $0x28] sm:$0xff]  ;;  %v658_v21 = vld [vmem:[#allocation2 + $0x62] sm:$0xff] }
 0x1da   : > { %2425 = vmatpush.msra.mxu1 %v2272_v60 }
 0x1db   : > { %1395 = vmatmul.f32.gmra.mxu0 %v363_v36  ;;  %1644 = vmatmul.f32.gmra.mxu3 %v623_v15  ;;  %v657_v15 = vld [vmem:[#allocation2 + $0x52] sm:$0xff] }
 0x1dc   : > { %v1116_v50 = vpop.f32.mrf.mxu2 }
 0x1dd   : > { %v1117_v32 = vadd.f32 %v1116_v50, %v1004_v37  ;;  %v591_v50 = vld [vmem:[#allocation2 + $0x38] sm:$0xff] }
 0x1df   : > { %v1230_v27 = vadd.f32 %v1229_v38, %v1117_v32  ;;  %v1241_v36 = vpop.f32.mrf.mxu3  ;;  %v624_v38 = vld [vmem:[#allocation2 + $0x49] sm:$0xff]  ;;  %v626_v32 = vld [vmem:[#allocation2 + $0x61] sm:$0xff] }
 0x1e0   : > { %v1351_v22 = vpop.f32.mrf.mxu0 }
 0x1e1   : > { %1166 = vmatmul.f32.gmra.mxu2 %v4619_v7  ;;  %v4658_v43 = vadd.f32 %v1342_v20, %v1230_v27  ;;  %v655_v7 = vld [vmem:[#allocation2 + $0x3a] sm:$0xff] }
 0x1e3   : > { %1754 = vmatmul.f32.vlgmr.msra.gmra.mxu0 %v654_v18  ;;  %1647 = vmatmul.f32.gmra.mxu3 %v624_v38 }
 0x1e4   : > { %v1119_v54 = vpop.f32.mrf.mxu2 }
 0x1e5   : > { %v1120_v52 = vadd.f32 %v1119_v54, %v1007_v1  ;;  %v592_v54 = vld [vmem:[#allocation2 + $0x48] sm:$0xff] }
 0x1e7   : > { %v1233_v23 = vadd.f32 %v1232_v0, %v1120_v52  ;;  %v1244_v12 = vpop.f32.mrf.mxu3 }
 0x1e8   : > { %v1354_v2 = vpop.f32.mrf.mxu0 }
 0x1e9   : > { %1169 = vmatmul.f32.gmra.mxu2 %v4631_v34  ;;  %v4666_v20 = vadd.f32 %v1345_v4, %v1233_v23 }
 0x1eb   : > { %1757 = vmatmul.f32.gmra.mxu0 %v655_v7  ;;  %1650 = vmatmul.f32.gmra.mxu3 %v625_v51  ;;  %v593_v7 = vld [vmem:[#allocation2 + $0x50] sm:$0xff] }
 0x1ec   : > { %v1122_v17 = vpop.f32.mrf.mxu2 }
 0x1ed   : > { %v1123_v46 = vadd.f32 %v1122_v17, %v1010_v6  ;;  %v2271_v17 = vld [vmem:[#allocation8 + $0x20] sm:$0xff] }
 0x1ee   : > { %2426 = vmatpush.msra.mxu1 %v2271_v17 }
 0x1ef   : > { %v1236_v33 = vadd.f32 %v1235_v53, %v1123_v46  ;;  %v1247_v37 = vpop.f32.mrf.mxu3 }
 0x1f0   : > { %v1357_v0 = vpop.f32.mrf.mxu0 }
 0x1f1   : > { %1528 = vmatmul.f32.vlgmr.msra.gmra.mxu2 %v590_v25  ;;  %v4669_v39 = vadd.f32 %v1348_v9, %v1236_v33 }
 0x1f3   : > { %1760 = vmatmul.f32.gmra.mxu0 %v656_v59  ;;  %1653 = vmatmul.f32.gmra.mxu3 %v626_v32 }
 0x1f4   : > { %v1125_v34 = vpop.f32.mrf.mxu2 }
 0x1f5   : > { %v1126_v4 = vadd.f32 %v1125_v34, %v4332_v31  ;;  %v627_v31 = vld [vmem:[#allocation2 + $0x69] sm:$0xff] }
 0x1f7   : > { %v1239_v58 = vadd.f32 %v1238_v55, %v1126_v4  ;;  %v1250_v1 = vpop.f32.mrf.mxu3  ;;  %v4675_v55 = vpop.f32.mrf.mxu1  ;;  %v629_v4 = vld [vmem:[#allocation2 + $0x81] sm:$0xff] }
 0x1f8   : > { %v1360_v27 = vpop.f32.mrf.mxu0 }
 0x1f9   : > { %1531 = vmatmul.f32.gmra.mxu2 %v591_v50  ;;  %v4672_v53 = vadd.f32 %v1351_v22, %v1239_v58  ;;  %v660_v50 = vld [vmem:[#allocation2 + $0x7a] sm:$0xff] }
 0x1fb   : > { %1763 = vmatmul.f32.gmra.mxu0 %v657_v15  ;;  %1656 = vmatmul.f32.gmra.mxu3 %v627_v31 }
 0x1fc   : > { %v1128_v9 = vpop.f32.mrf.mxu2 }
 0x1fd   : > { %v1129_v18 = vadd.f32 %v1128_v9, %v4341_v42  ;;  %v628_v42 = vld [vmem:[#allocation2 + $0x79] sm:$0xff]  ;;  %v595_v9 = vld [vmem:[#allocation2 + $0x68] sm:$0xff] }
 0x1ff   : > { %v1242_v52 = vadd.f32 %v1241_v36, %v1129_v18  ;;  %v1253_v13 = vpop.f32.mrf.mxu3  ;;  %v659_v36 = vld [vmem:[#allocation2 + $0x6a] sm:$0xff]  ;;  %v4682_v33 = vpop.f32.mrf.mxu1 }
 0x200   : > { %v1363_v40 = vpop.f32.mrf.mxu0 }
 0x201   : > { %1534 = vmatmul.f32.gmra.mxu2 %v592_v54  ;;  %v4677_v23 = vadd.f32 %v1354_v2, %v1242_v52  ;;  %v2270_v54 = vld [vmem:[#allocation8 + $0x18] sm:$0xff] }
 0x202   : > { %2427 = vmatpush.msra.mxu1 %v2270_v54  ;;  %v598_v54 = vld [vmem:[#allocation2 + $0x90] sm:$0xff] }
 0x203   : > { %1766 = vmatmul.f32.gmra.mxu0 %v658_v21  ;;  %1659 = vmatmul.f32.gmra.mxu3 %v628_v42  ;;  %v662_v42 = vld [vmem:[#allocation2 + $0x92] sm:$0xff] }
 0x204   : > { %v1131_v22 = vpop.f32.mrf.mxu2 }
 0x205   : > { %v1132_v38 = vadd.f32 %v1131_v22, %v4350_v57  ;;  %v594_v57 = vld [vmem:[#allocation2 + $0x60] sm:$0xff] }
 0x207   : > { %v1245_v6 = vadd.f32 %v1244_v12, %v1132_v38  ;;  %v1256_v59 = vpop.f32.mrf.mxu3  ;;  %v4687_v32 = vpop.f32.mrf.mxu1  ;;  %v596_v38 = vld [vmem:[#allocation2 + $0x78] sm:$0xff] }
 0x208   : > { %v1366_v46 = vpop.f32.mrf.mxu0 }
 0x209   : > { %1537 = vmatmul.f32.gmra.mxu2 %v593_v7  ;;  %v4680_v25 = vadd.f32 %v1357_v0, %v1245_v6  ;;  %v631_v6 = vld [vmem:[#allocation2 + $0x99] sm:$0xff] }
 0x20b   : > { %1769 = vmatmul.f32.gmra.mxu0 %v659_v36  ;;  %1662 = vmatmul.f32.gmra.mxu3 %v629_v4  ;;  %v5928_v36 = vld [vmem:[#allocation13_spill] sm:$0xff]  ;;  %v2269_v4 = vld [vmem:[#allocation8 + $0x10] sm:$0xff] }
 0x20c   : > { %v1134_v2 = vpop.f32.mrf.mxu2  ;;  %2428 = vmatpush.msra.mxu1 %v2269_v4 }
 0x20d   : > { %v1135_v51 = vadd.f32 %v1134_v2, %v4359_v10  ;;  %v630_v10 = vld [vmem:[#allocation2 + $0x91] sm:$0xff] }
 0x20f   : > { %v1248_v34 = vadd.f32 %v1247_v37, %v1135_v51  ;;  %v1259_v15 = vpop.f32.mrf.mxu3  ;;  %v661_v37 = vld [vmem:[#allocation2 + $0x82] sm:$0xff]  ;;  %v4693_v7 = vpop.f32.mrf.mxu1 }
 0x210   : > { %v1369_v12 = vpop.f32.mrf.mxu0 }
 0x211   : > { %1540 = vmatmul.f32.gmra.mxu2 %v594_v57  ;;  %v4685_v58 = vadd.f32 %v1360_v27, %v1248_v34  ;;  %v597_v57 = vld [vmem:[#allocation2 + $0x80] sm:$0xff] }
 0x213   : > { %1772 = vmatmul.f32.gmra.mxu0 %v660_v50  ;;  %1665 = vmatmul.f32.gmra.mxu3 %v630_v10 }
 0x214   : > { %v1137_v0 = vpop.f32.mrf.mxu2 }
 0x215   : > { %v1138_v60 = vadd.f32 %v1137_v0, %v4368_v24  ;;  %v663_v0 = vld [vmem:[#allocation2 + $0x9a] sm:$0xff] }
 0x217   : > { %v1251_v18 = vadd.f32 %v1250_v1, %v1138_v60  ;;  %v1262_v22 = vpop.f32.mrf.mxu3 }
 0x218   : > { %v1372_v52 = vpop.f32.mrf.mxu0 }
 0x219   : > { %1543 = vmatmul.f32.gmra.mxu2 %v595_v9  ;;  %v4690_v31 = vadd.f32 %v1363_v40, %v1251_v18  ;;  %v5929_v9 = vld [vmem:[#allocation14_spill] sm:$0xff] }
 0x21b   : > { %1775 = vmatmul.f32.gmra.mxu0 %v661_v37  ;;  %1668 = vmatmul.f32.gmra.mxu3 %v631_v6  ;;  %v5931_v6 = vld [vmem:[#allocation15_spill] sm:$0xff] }
 0x21c   : > { %v1140_v27 = vpop.f32.mrf.mxu2 }
 0x21d   : > { %v1141_v21 = vadd.f32 %v1140_v27, %v4377_v35  ;;  %v632_v35 = vld [vmem:[#allocation2 + $0xa9] sm:$0xff]  ;;  %v633_v27 = vld [vmem:[#allocation2 + $0xb1] sm:$0xff] }
 0x21f   : > { %v1254_v24 = vadd.f32 %v1253_v13, %v1141_v21  ;;  %v1265_v51 = vpop.f32.mrf.mxu3  ;;  %v4698_v13 = vpop.f32.mrf.mxu1  ;;  %v664_v21 = vld [vmem:[#allocation2 + $0xaa] sm:$0xff] }
 0x220   : > { %v1375_v1 = vpop.f32.mrf.mxu0 }
 0x221   : > { %1546 = vmatmul.f32.gmra.mxu2 %v596_v38  ;;  %v4695_v17 = vadd.f32 %v1366_v46, %v1254_v24 }
 0x223   : > { %1778 = vmatmul.f32.gmra.mxu0 %v662_v42  ;;  %1671 = vmatmul.f32.gmra.mxu3 %v632_v35 }
 0x224   : > { %v1143_v40 = vpop.f32.mrf.mxu2 }
 0x225   : > { %v1144_v2 = vadd.f32 %v1143_v40, %v5928_v36  ;;  %v599_v36 = vld [vmem:[#allocation2 + $0x98] sm:$0xff] }
 0x227   : > { %v1257_v34 = vadd.f32 %v1256_v59, %v1144_v2  ;;  %v1268_v10 = vpop.f32.mrf.mxu3  ;;  %v4705_v24 = vpop.f32.mrf.mxu1 }
 0x228   : > { %v1378_v50 = vpop.f32.mrf.mxu0 }
 0x229   : > { %1549 = vmatmul.f32.gmra.mxu2 %v597_v57  ;;  %v4700_v60 = vadd.f32 %v1369_v12, %v1257_v34  ;;  %v634_v57 = vld [vmem:[#allocation2 + $0xc1] sm:$0xff]  ;;  %v2268_v34 = vld [vmem:[#allocation8 + $0x8] sm:$0xff] }
 0x22a   : > { %2429 = vmatpush.msra.mxu1 %v2268_v34 }
 0x22b   : > { %1781 = vmatmul.f32.gmra.mxu0 %v663_v0  ;;  %1674 = vmatmul.f32.gmra.mxu3 %v633_v27  ;;  %v635_v27 = vld [vmem:[#allocation2 + $0xc9] sm:$0xff] }
 0x22c   : > { %v1146_v46 = vpop.f32.mrf.mxu2 }
 0x22d   : > { %v1147_v18 = vadd.f32 %v1146_v46, %v5929_v9  ;;  %v5933_v46 = vld [vmem:[#allocation16_spill] sm:$0xff] }
 0x22f   : > { %v1260_v37 = vadd.f32 %v1259_v15, %v1147_v18  ;;  %v1271_v40 = vpop.f32.mrf.mxu3  ;;  %v665_v15 = vld [vmem:[#allocation2 + $0xb2] sm:$0xff]  ;;  %v4710_v0 = vpop.f32.mrf.mxu1 }
 0x230   : > { %v1381_v59 = vpop.f32.mrf.mxu0 }
 0x231   : > { %1552 = vmatmul.f32.gmra.mxu2 %v598_v54  ;;  %v4703_v38 = vadd.f32 %v1372_v52, %v1260_v37  ;;  %v600_v54 = vld [vmem:[#allocation2 + $0xa8] sm:$0xff] }
 0x233   : > { %5930 = vst [vmem:[#allocation13_spill] sm:$0xff] %v4703_v38  ;;  %1784 = vmatmul.f32.gmra.mxu0 %v664_v21  ;;  %1677 = vmatmul.f32.gmra.mxu3 %v634_v57 }
 0x234   : > { %v1149_v12 = vpop.f32.mrf.mxu2 }
 0x235   : > { %v1150_v42 = vadd.f32 %v1149_v12, %v5931_v6  ;;  %v3795_v12 = vld [vmem:[#allocation2 + $0xc2] sm:$0xff]  ;;  %v5935_v6 = vld [vmem:[#allocation17_spill] sm:$0xff] }
 0x237   : > { %v1263_v2 = vadd.f32 %v1262_v22, %v1150_v42  ;;  %v1274_v18 = vpop.f32.mrf.mxu3  ;;  %v4716_v57 = vpop.f32.mrf.mxu1 }
 0x238   : > { %v1384_v35 = vpop.f32.mrf.mxu0 }
 0x239   : > { %1555 = vmatmul.f32.gmra.mxu2 %v599_v36  ;;  %v4708_v4 = vadd.f32 %v1375_v1, %v1263_v2  ;;  %v601_v2 = vld [vmem:[#allocation2 + $0xb0] sm:$0xff] }
 0x23b   : > { %5932 = vst [vmem:[#allocation14_spill] sm:$0xff] %v4708_v4  ;;  %1787 = vmatmul.f32.gmra.mxu0 %v665_v15  ;;  %1680 = vmatmul.f32.gmra.mxu3 %v635_v27  ;;  %v636_v15 = vld [vmem:[#allocation2 + $0xd9] sm:$0xff]  ;;  %v2330_v4 = vld [vmem:[#allocation8 + $0x1f8] sm:$0xff] }
 0x23c   : > { %v1152_v52 = vpop.f32.mrf.mxu2  ;;  %v5937_v27 = vld [vmem:[#allocation18_spill] sm:$0xff]  ;;  %2754 = vmatpush.msrb.mxu0 %v2330_v4  ;;  %v640_v4 = vld [vmem:[#allocation2 + $0x109] sm:$0xff] }
 0x23d   : > { %v1153_v9 = vadd.f32 %v1152_v52, %v5933_v46  ;;  %v2267_v52 = vld [vmem:[#allocation8] sm:$0xff] }
 0x23e   : > { %2430 = vmatpush.msra.mxu1 %v2267_v52  ;;  %v2314_v52 = vld [vmem:[#allocation8 + $0x178] sm:$0xff] }
 0x23f   : > { %v1266_v37 = vadd.f32 %v1265_v51, %v1153_v9  ;;  %v1277_v36 = vpop.f32.mrf.mxu3  ;;  %v3797_v9 = vld [vmem:[#allocation2 + $0xca] sm:$0xff]  ;;  %2641 = vmatpush.msrb.mxu3 %v2314_v52 }
 0x240   : > { %v1387_v22 = vpop.f32.mrf.mxu0 }
 0x241   : > { %1558 = vmatmul.f32.gmra.mxu2 %v600_v54  ;;  %v4713_v21 = vadd.f32 %v1378_v50, %v1266_v37  ;;  %v4720_v50 = vld [vmem:[#allocation2] sm:$0xff]  ;;  %v2298_v54 = vld [vmem:[#allocation8 + $0xf8] sm:$0xff] }
 0x242   : > { %2431 = vmatmul.f32.vlgmr.msra.gmra.mxu1 %v4720_v50  ;;  %2528 = vmatpush.msrb.mxu2 %v2298_v54  ;;  %v5939_v54 = vld [vmem:[#allocation19_spill] sm:$0xff] }
 0x243   : > { %5934 = vst [vmem:[#allocation15_spill] sm:$0xff] %v4713_v21  ;;  %1790 = vmatmul.f32.gmra.mxu0 %v3795_v12  ;;  %1683 = vmatmul.f32.gmra.mxu3 %v636_v15  ;;  %v3798_v15 = vld [vmem:[#allocation2 + $0xda] sm:$0xff] }
 0x244   : > { %v1155_v1 = vpop.f32.mrf.mxu2 }
 0x245   : > { %v1156_v42 = vadd.f32 %v1155_v1, %v5935_v6  ;;  %v602_v1 = vld [vmem:[#allocation2 + $0xc0] sm:$0xff] }
 0x247   : > { %v1269_v34 = vadd.f32 %v1268_v10, %v1156_v42  ;;  %v1280_v10 = vpop.f32.mrf.mxu3  ;;  %v637_v42 = vld [vmem:[#allocation2 + $0xe1] sm:$0xff] }
 0x248   : > { %v1390_v46 = vpop.f32.mrf.mxu0 }
 0x249   : > { %1561 = vmatmul.f32.gmra.mxu2 %v601_v2  ;;  %v4718_v51 = vadd.f32 %v1381_v59, %v1269_v34  ;;  %v4724_v59 = vpop.f32.mrf.mxu1 }
 0x24a   : > { %2434 = vmatmul.f32.gmra.mxu1 %v4720_v50 }
 0x24b   : > { %5936 = vst [vmem:[#allocation16_spill] sm:$0xff] %v4718_v51  ;;  %1793 = vmatmul.f32.gmra.mxu0 %v3797_v9  ;;  %1686 = vmatmul.f32.gmra.mxu3 %v637_v42  ;;  %v603_v51 = vld [vmem:[#allocation2 + $0xc8] sm:$0xff] }
 0x24c   : > { %v1158_v37 = vpop.f32.mrf.mxu2 }
 0x24d   : > { %v1159_v12 = vadd.f32 %v1158_v37, %v5937_v27 }
 0x24f   : > { %v1272_v6 = vadd.f32 %v1271_v40, %v1159_v12  ;;  %v1283_v27 = vpop.f32.mrf.mxu3  ;;  %v638_v12 = vld [vmem:[#allocation2 + $0xf1] sm:$0xff] }
 0x250   : > { %v1393_v2 = vpop.f32.mrf.mxu0 }
 0x251   : > { %1564 = vmatmul.f32.gmra.mxu2 %v602_v1  ;;  %v4726_v34 = vadd.f32 %v1384_v35, %v1272_v6  ;;  %v4732_v1 = vpop.f32.mrf.mxu1  ;;  %v5941_v6 = vld [vmem:[#allocation20_spill] sm:$0xff] }
 0x253   : > { %5938 = vst [vmem:[#allocation17_spill] sm:$0xff] %v4726_v34  ;;  %1796 = vmatmul.f32.gmra.mxu0 %v3798_v15  ;;  %1689 = vmatmul.f32.gmra.mxu3 %v638_v12  ;;  %v604_v15 = vld [vmem:[#allocation2 + $0xd8] sm:$0xff] }
 0x254   : > { %v1161_v9 = vpop.f32.mrf.mxu2 }
 0x255   : > { %v1162_v37 = vadd.f32 %v1161_v9, %v5939_v54  ;;  %v2346_v9 = vld [vmem:[#allocation8 + $0x278] sm:$0xff]  ;;  %v2297_v54 = vld [vmem:[#allocation8 + $0xf0] sm:$0xff] }
 0x256   : > { %2867 = vmatpush.msrb.mxu1 %v2346_v9  ;;  %2529 = vmatpush.msrb.mxu2 %v2297_v54 }
 0x257   : > { %v1275_v40 = vadd.f32 %v1274_v18, %v1162_v37  ;;  %v1642_v34 = vpop.f32.mrf.mxu3  ;;  %v639_v18 = vld [vmem:[#allocation2 + $0xf9] sm:$0xff] }
 0x258   : > { %v1396_v21 = vpop.f32.mrf.mxu0 }
 0x259   : > { %1567 = vmatmul.f32.gmra.mxu2 %v603_v51  ;;  %v4730_v52 = vadd.f32 %v1387_v22, %v1275_v40  ;;  %v4739_v37 = vpop.f32.mrf.mxu1  ;;  %v5943_v40 = vld [vmem:[#allocation21_spill] sm:$0xff] }
 0x25b   : > { %5940 = vst [vmem:[#allocation18_spill] sm:$0xff] %v4730_v52  ;;  %1799 = vmatmul.f32.gmra.mxu0 %v4468_v8  ;;  %1692 = vmatmul.f32.gmra.mxu3 %v639_v18  ;;  %v2313_v52 = vld [vmem:[#allocation8 + $0x170] sm:$0xff] }
 0x25c   : > { %v1164_v35 = vpop.f32.mrf.mxu2  ;;  %2642 = vmatpush.msrb.mxu3 %v2313_v52  ;;  %v2329_v18 = vld [vmem:[#allocation8 + $0x1f0] sm:$0xff]  ;;  %v641_v52 = vld [vmem:[#allocation2 + $0x111] sm:$0xff] }
 0x25d   : > { %v1165_v42 = vadd.f32 %v1164_v35, %v5941_v6  ;;  %v605_v6 = vld [vmem:[#allocation2 + $0xe0] sm:$0xff]  ;;  %2755 = vmatpush.msrb.mxu0 %v2329_v18 }
 0x25f   : > { %v1278_v38 = vadd.f32 %v1277_v36, %v1165_v42  ;;  %v1645_v35 = vpop.f32.mrf.mxu3 }
 0x260   : > { %v1755_v51 = vpop.f32.mrf.mxu0 }
 0x261   : > { %1570 = vmatmul.f32.gmra.mxu2 %v604_v15  ;;  %v4736_v22 = vadd.f32 %v1390_v46, %v1278_v38  ;;  %v606_v15 = vld [vmem:[#allocation2 + $0xf0] sm:$0xff] }
 0x263   : > { %5942 = vst [vmem:[#allocation19_spill] sm:$0xff] %v4736_v22  ;;  %1802 = vmatmul.f32.gmra.mxu0 %v4475_v28  ;;  %1695 = vmatmul.f32.gmra.mxu3 %v640_v4  ;;  %v5945_v28 = vld [vmem:[#allocation22_spill] sm:$0xff]  ;;  %v4746_v22 = vpop.f32.mrf.mxu1 }
 0x264   : > { %v1167_v8 = vpop.f32.mrf.mxu2  ;;  %v607_v4 = vld [vmem:[#allocation2 + $0xf8] sm:$0xff] }
 0x265   : > { %v1168_v12 = vadd.f32 %v1167_v8, %v5943_v40  ;;  %v2345_v8 = vld [vmem:[#allocation8 + $0x270] sm:$0xff]  ;;  %v2296_v40 = vld [vmem:[#allocation8 + $0xe8] sm:$0xff] }
 0x266   : > { %2868 = vmatpush.msrb.mxu1 %v2345_v8  ;;  %2530 = vmatpush.msrb.mxu2 %v2296_v40  ;;  %v608_v40 = vld [vmem:[#allocation2 + $0x108] sm:$0xff] }
 0x267   : > { %v1281_v36 = vadd.f32 %v1280_v10, %v1168_v12  ;;  %v1648_v54 = vpop.f32.mrf.mxu3 }
 0x268   : > { %v1758_v42 = vpop.f32.mrf.mxu0 }
 0x269   : > { %1573 = vmatmul.f32.gmra.mxu2 %v605_v6  ;;  %v4742_v9 = vadd.f32 %v1393_v2, %v1281_v36 }
 0x26b   : > { %5944 = vst [vmem:[#allocation20_spill] sm:$0xff] %v4742_v9  ;;  %1805 = vmatmul.f32.gmra.mxu0 %v4489_v3  ;;  %1698 = vmatmul.f32.gmra.mxu3 %v641_v52  ;;  %v4756_v18 = vpop.f32.mrf.mxu1  ;;  %v2344_v52 = vld [vmem:[#allocation8 + $0x268] sm:$0xff] }
 0x26c   : > { %v1170_v38 = vpop.f32.mrf.mxu2  ;;  %2869 = vmatpush.msrb.mxu1 %v2344_v52 }
 0x26d   : > { %v1171_v46 = vadd.f32 %v1170_v38, %v5945_v28  ;;  %v2312_v38 = vld [vmem:[#allocation8 + $0x168] sm:$0xff] }
 0x26e   : > { %2643 = vmatpush.msrb.mxu3 %v2312_v38 }
 0x26f   : > { %v1284_v10 = vadd.f32 %v1283_v27, %v1171_v46  ;;  %v4752_v36 = vpop.f32.mrf.mxu3  ;;  %v642_v27 = vld [vmem:[#allocation2 + $0x121] sm:$0xff] }
 0x270   : > { %v1761_v12 = vpop.f32.mrf.mxu0 }
 0x271   : > { %1576 = vmatmul.f32.gmra.mxu2 %v606_v15  ;;  %v4748_v2 = vadd.f32 %v1396_v21, %v1284_v10  ;;  %v2328_v10 = vld [vmem:[#allocation8 + $0x1e8] sm:$0xff] }
 0x272   : > { %2756 = vmatpush.msrb.mxu0 %v2328_v10 }
 0x273   : > { %5946 = vst [vmem:[#allocation21_spill] sm:$0xff] %v4748_v2  ;;  %1808 = vmatmul.f32.gmra.mxu0 %v4502_v14  ;;  %1701 = vmatmul.f32.gmra.mxu3 %v642_v27  ;;  %v4767_v38 = vpop.f32.mrf.mxu1 }
 0x274   : > { %v1529_v3 = vpop.f32.mrf.mxu2 }
 0x275   : > { %v1530_v6 = vadd.f32 %v1529_v3, %v4500_v29  ;;  %v2295_v3 = vld [vmem:[#allocation8 + $0xe0] sm:$0xff] }
 0x276   : > { %2531 = vmatpush.msrb.mxu2 %v2295_v3 }
 0x277   : > { %v1643_v28 = vadd.f32 %v1642_v34, %v1530_v6  ;;  %v4762_v34 = vpop.f32.mrf.mxu3  ;;  %v643_v6 = vld [vmem:[#allocation2 + $0x129] sm:$0xff] }
 0x278   : > { %v4754_v46 = vpop.f32.mrf.mxu0 }
 0x279   : > { %v1756_v15 = vadd.f32 %v1755_v51, %v1643_v28  ;;  %1579 = vmatmul.f32.gmra.mxu2 %v607_v4 }
 0x27b   : > { %vm1851_vm0 = vcmp.ge.f32.partialorder %v1756_v15, 0.0  ;;  %v1883_v21 = vmul.f32 0.2, %v1756_v15  ;;  %1811 = vmatmul.f32.gmra.mxu0 %v4515_v45  ;;  %1704 = vmatmul.f32.gmra.mxu3 %v643_v6  ;;  %v4782_v3 = vpop.f32.mrf.mxu1 }
 0x27c   : > { %v1532_v14 = vpop.f32.mrf.mxu2 }
 0x27d   : > { %v4759_v29 = vsel %vm1851_vm0, %v1756_v15, %v1883_v21  ;;  %v1533_v8 = vadd.f32 %v1532_v14, %v4513_v56  ;;  %v2311_v14 = vld [vmem:[#allocation8 + $0x160] sm:$0xff] }
 0x27e   : > { %1947 = vst [vmem:[#allocation2 + $0x19] sm:$0xff] %v4759_v29  ;;  %2644 = vmatpush.msrb.mxu3 %v2311_v14 }
 0x27f   : > { %v1646_v51 = vadd.f32 %v1645_v35, %v1533_v8  ;;  %v4775_v21 = vpop.f32.mrf.mxu3 }
 0x280   : > { %v4765_v4 = vpop.f32.mrf.mxu0 }
 0x281   : > { %v1759_v45 = vadd.f32 %v1758_v42, %v1646_v51  ;;  %1582 = vmatmul.f32.gmra.mxu2 %v608_v40  ;;  %v609_v42 = vld [vmem:[#allocation2 + $0x110] sm:$0xff]  ;;  %v644_v40 = vld [vmem:[#allocation2 + $0x139] sm:$0xff] }
 0x283   : > { %vm1852_vm1 = vcmp.ge.f32.partialorder %v1759_v45, 0.0  ;;  %v1884_v56 = vmul.f32 0.2, %v1759_v45  ;;  %1814 = vmatmul.f32.gmra.mxu0 %v4530_v30  ;;  %1707 = vmatmul.f32.gmra.mxu3 %v644_v40 }
 0x284   : > { %v1535_v28 = vpop.f32.mrf.mxu2 }
 0x285   : > { %v4770_v27 = vsel %vm1852_vm1, %v1759_v45, %v1884_v56  ;;  %v1536_v35 = vadd.f32 %v1535_v28, %v4528_v44  ;;  %v4773_v15 = vld [vmem:[#allocation2 + $0x18] sm:$0xff]  ;;  %v2343_v28 = vld [vmem:[#allocation8 + $0x260] sm:$0xff] }
 0x286   : > { %1948 = vst [vmem:[#allocation2 + $0x21] sm:$0xff] %v4770_v27  ;;  %2437 = vmatmul.f32.gmra.mxu1 %v4773_v15 }
 0x287   : > { %v1649_v8 = vadd.f32 %v1648_v54, %v1536_v35  ;;  %v610_v54 = vld [vmem:[#allocation2 + $0x120] sm:$0xff]  ;;  %v4789_v56 = vpop.f32.mrf.mxu3  ;;  %v2294_v35 = vld [vmem:[#allocation8 + $0xd8] sm:$0xff]  ;;  %2870 = vmatpush.msrb.mxu1 %v2343_v28 }
 0x288   : > { %v4779_v10 = vpop.f32.mrf.mxu0  ;;  %2532 = vmatpush.msrb.mxu2 %v2294_v35  ;;  %v677_v35 = vld [vmem:[#allocation2 + $0x142] sm:$0xff] }
 0x289   : > { %v1762_v30 = vadd.f32 %v1761_v12, %v1649_v8  ;;  %1585 = vmatmul.f32.gmra.mxu2 %v609_v42  ;;  %v2327_v12 = vld [vmem:[#allocation8 + $0x1e0] sm:$0xff]  ;;  %v645_v42 = vld [vmem:[#allocation2 + $0x141] sm:$0xff] }
 0x28a   : > { %2757 = vmatpush.msrb.mxu0 %v2327_v12 }
 0x28b   : > { %vm1853_vm2 = vcmp.ge.f32.partialorder %v1762_v30, 0.0  ;;  %v1885_v44 = vmul.f32 0.2, %v1762_v30  ;;  %1817 = vmatmul.f32.gmra.mxu0 %v4545_v49  ;;  %1710 = vmatmul.f32.gmra.mxu3 %v645_v42 }
 0x28c   : > { %v1538_v52 = vpop.f32.mrf.mxu2 }
 0x28d   : > { %v4784_v51 = vsel %vm1853_vm2, %v1762_v30, %v1885_v44  ;;  %v1539_v6 = vadd.f32 %v1538_v52, %v4543_v16  ;;  %v4787_v45 = vld [vmem:[#allocation2 + $0x20] sm:$0xff] }
 0x28e   : > { %1949 = vst [vmem:[#allocation2 + $0x31] sm:$0xff] %v4784_v51  ;;  %2440 = vmatmul.f32.gmra.mxu1 %v4787_v45 }
 0x28f   : > { %v1652_v49 = vadd.f32 %v4752_v36, %v1539_v6  ;;  %v4803_v52 = vpop.f32.mrf.mxu3  ;;  %v2310_v6 = vld [vmem:[#allocation8 + $0x158] sm:$0xff] }
 0x290   : > { %v4794_v14 = vpop.f32.mrf.mxu0  ;;  %2645 = vmatpush.msrb.mxu3 %v2310_v6  ;;  %v2293_v6 = vld [vmem:[#allocation8 + $0xd0] sm:$0xff] }
 0x291   : > { %v1765_v16 = vadd.f32 %v4754_v46, %v1652_v49  ;;  %1588 = vmatmul.f32.gmra.mxu2 %v610_v54  ;;  %v611_v46 = vld [vmem:[#allocation2 + $0x128] sm:$0xff]  ;;  %v4807_v54 = vpop.f32.mrf.mxu1 }
 0x292   : > { %5947 = vst [vmem:[#allocation22_spill] sm:$0xff] %v4807_v54  ;;  %2533 = vmatpush.msrb.mxu2 %v2293_v6  ;;  %v648_v6 = vld [vmem:[#allocation2 + $0x169] sm:$0xff] }
 0x293   : > { %vm1854_vm3 = vcmp.ge.f32.partialorder %v1765_v16, 0.0  ;;  %v1886_v8 = vmul.f32 0.2, %v1765_v16  ;;  %1820 = vmatmul.f32.gmra.mxu0 %v4560_v61  ;;  %v646_v61 = vld [vmem:[#allocation2 + $0x151] sm:$0xff] }
 0x294   : > { %v1541_v40 = vpop.f32.mrf.mxu2  ;;  %1713 = vmatmul.f32.gmra.mxu3 %v646_v61  ;;  %v647_v61 = vld [vmem:[#allocation2 + $0x159] sm:$0xff] }
 0x295   : > { %v4798_v30 = vsel %vm1854_vm3, %v1765_v16, %v1886_v8  ;;  %v1542_v44 = vadd.f32 %v1541_v40, %v4558_v41  ;;  %v4801_v36 = vld [vmem:[#allocation2 + $0x30] sm:$0xff] }
 0x296   : > { %1950 = vst [vmem:[#allocation2 + $0x39] sm:$0xff] %v4798_v30  ;;  %2443 = vmatmul.f32.gmra.mxu1 %v4801_v36 }
 0x297   : > { %v1655_v12 = vadd.f32 %v4762_v34, %v1542_v44  ;;  %v612_v34 = vld [vmem:[#allocation2 + $0x138] sm:$0xff]  ;;  %v4818_v44 = vpop.f32.mrf.mxu3 }
 0x298   : > { %v4810_v28 = vpop.f32.mrf.mxu0 }
 0x299   : > { %v1768_v41 = vadd.f32 %v4765_v4, %v1655_v12  ;;  %1591 = vmatmul.f32.gmra.mxu2 %v611_v46  ;;  %v2326_v4 = vld [vmem:[#allocation8 + $0x1d8] sm:$0xff] }
 0x29a   : > { %v2342_v46 = vld [vmem:[#allocation8 + $0x258] sm:$0xff]  ;;  %2758 = vmatpush.msrb.mxu0 %v2326_v4 }
 0x29b   : > { %vm1855_vm4 = vcmp.ge.f32.partialorder %v1768_v41, 0.0  ;;  %v1887_v49 = vmul.f32 0.2, %v1768_v41  ;;  %1823 = vmatmul.f32.gmra.mxu0 %v677_v35  ;;  %2871 = vmatpush.msrb.mxu1 %v2342_v46  ;;  %v613_v46 = vld [vmem:[#allocation2 + $0x140] sm:$0xff] }
 0x29c   : > { %v1544_v42 = vpop.f32.mrf.mxu2  ;;  %1716 = vmatmul.f32.gmra.mxu3 %v647_v61  ;;  %v679_v61 = vld [vmem:[#allocation2 + $0x15a] sm:$0xff] }
 0x29d   : > { %v4813_v16 = vsel %vm1855_vm4, %v1768_v41, %v1887_v49  ;;  %v1545_v8 = vadd.f32 %v1544_v42, %v4573_v47  ;;  %v4816_v40 = vld [vmem:[#allocation2 + $0x38] sm:$0xff]  ;;  %v4825_v41 = vpop.f32.mrf.mxu1 }
 0x29e   : > { %1951 = vst [vmem:[#allocation2 + $0x49] sm:$0xff] %v4813_v16  ;;  %2446 = vmatmul.f32.gmra.mxu1 %v4816_v40  ;;  %v678_v47 = vld [vmem:[#allocation2 + $0x152] sm:$0xff] }
 0x29f   : > { %v1658_v12 = vadd.f32 %v4775_v21, %v1545_v8  ;;  %5948 = vst [vmem:[#allocation23_spill] sm:$0xff] %v4825_v41  ;;  %v4833_v4 = vpop.f32.mrf.mxu3 }
 0x2a0   : > { %v4823_v35 = vpop.f32.mrf.mxu0 }
 0x2a1   : > { %v1771_v49 = vadd.f32 %v4779_v10, %v1658_v12  ;;  %1594 = vmatmul.f32.gmra.mxu2 %v612_v34  ;;  %v2309_v10 = vld [vmem:[#allocation8 + $0x150] sm:$0xff] }
 0x2a2   : > { %2646 = vmatpush.msrb.mxu3 %v2309_v10 }
 0x2a3   : > { %vm1856_vm5 = vcmp.ge.f32.partialorder %v1771_v49, 0.0  ;;  %v1888_v42 = vmul.f32 0.2, %v1771_v49  ;;  %1826 = vmatmul.f32.gmra.mxu0 %v678_v47 }
 0x2a4   : > { %v1547_v2 = vpop.f32.mrf.mxu2  ;;  %1719 = vmatmul.f32.gmra.mxu3 %v648_v6 }
 0x2a5   : > { %v4828_v9 = vsel %vm1856_vm5, %v1771_v49, %v1888_v42  ;;  %v1548_v21 = vadd.f32 %v1547_v2, %v4588_v19  ;;  %v4831_v8 = vld [vmem:[#allocation2 + $0x48] sm:$0xff]  ;;  %v4841_v19 = vpop.f32.mrf.mxu1 }
 0x2a6   : > { %1952 = vst [vmem:[#allocation2 + $0x51] sm:$0xff] %v4828_v9  ;;  %2449 = vmatmul.f32.gmra.mxu1 %v4831_v8 }
 0x2a7   : > { %v1661_v34 = vadd.f32 %v4789_v56, %v1548_v21  ;;  %5949 = vst [vmem:[#allocation24_spill] sm:$0xff] %v4841_v19  ;;  %v614_v21 = vld [vmem:[#allocation2 + $0x150] sm:$0xff]  ;;  %v4848_v10 = vpop.f32.mrf.mxu3 }
 0x2a8   : > { %v4838_v12 = vpop.f32.mrf.mxu0 }
 0x2a9   : > { %v1774_v47 = vadd.f32 %v4794_v14, %v1661_v34  ;;  %1597 = vmatmul.f32.gmra.mxu2 %v613_v46  ;;  %v2325_v14 = vld [vmem:[#allocation8 + $0x1d0] sm:$0xff]  ;;  %v2292_v34 = vld [vmem:[#allocation8 + $0xc8] sm:$0xff] }
 0x2aa   : > { %v2341_v46 = vld [vmem:[#allocation8 + $0x250] sm:$0xff]  ;;  %2759 = vmatpush.msrb.mxu0 %v2325_v14  ;;  %2534 = vmatpush.msrb.mxu2 %v2292_v34 }
 0x2ab   : > { %vm1857_vm6 = vcmp.ge.f32.partialorder %v1774_v47, 0.0  ;;  %v1889_v2 = vmul.f32 0.2, %v1774_v47  ;;  %1829 = vmatmul.f32.gmra.mxu0 %v679_v61  ;;  %2872 = vmatpush.msrb.mxu1 %v2341_v46  ;;  %v649_v61 = vld [vmem:[#allocation2 + $0x171] sm:$0xff] }
 0x2ac   : > { %v1550_v49 = vpop.f32.mrf.mxu2  ;;  %1722 = vmatmul.f32.gmra.mxu3 %v649_v61 }
 0x2ad   : > { %v4843_v42 = vsel %vm1857_vm6, %v1774_v47, %v1889_v2  ;;  %v1551_v41 = vadd.f32 %v1550_v49, %v4603_v26  ;;  %v4846_v56 = vld [vmem:[#allocation2 + $0x50] sm:$0xff]  ;;  %v1441_v49 = vadd.f32 %v4675_v55, %v4616_v5  ;;  %v4858_v54 = vpop.f32.mrf.mxu1  ;;  %v650_v55 = vld [vmem:[#allocation2 + $0x181] sm:$0xff] }
 0x2ae   : > { %5950 = vst [vmem:[#allocation25_spill] sm:$0xff] %v4843_v42  ;;  %2452 = vmatmul.f32.gmra.mxu1 %v4846_v56  ;;  %v680_v26 = vld [vmem:[#allocation2 + $0x16a] sm:$0xff] }
 0x2af   : > { %1953 = vst [vmem:[#allocation2 + $0x61] sm:$0xff] %v4843_v42  ;;  %v1664_v6 = vadd.f32 %v4803_v52, %v1551_v41  ;;  %v4864_v46 = vpop.f32.mrf.mxu3 }
 0x2b0   : > { %v4853_v47 = vpop.f32.mrf.mxu0  ;;  %5951 = vst [vmem:[#allocation26_spill] sm:$0xff] %v4858_v54  ;;  %v2306_v54 = vld [vmem:[#allocation8 + $0x138] sm:$0xff] }
 0x2b1   : > { %v1777_v2 = vadd.f32 %v4810_v28, %v1664_v6  ;;  %1600 = vmatmul.f32.gmra.mxu2 %v614_v21  ;;  %v615_v28 = vld [vmem:[#allocation2 + $0x158] sm:$0xff] }
 0x2b2   : > { %v2308_v21 = vld [vmem:[#allocation8 + $0x148] sm:$0xff] }
 0x2b3   : > { %vm1858_vm7 = vcmp.ge.f32.partialorder %v1777_v2, 0.0  ;;  %v1890_v19 = vmul.f32 0.2, %v1777_v2  ;;  %1832 = vmatmul.f32.gmra.mxu0 %v680_v26  ;;  %2647 = vmatpush.msrb.mxu3 %v2308_v21  ;;  %v681_v6 = vld [vmem:[#allocation2 + $0x172] sm:$0xff] }
 0x2b4   : > { %v1553_v42 = vpop.f32.mrf.mxu2  ;;  %1725 = vmatmul.f32.gmra.mxu3 %v650_v55  ;;  %v2324_v21 = vld [vmem:[#allocation8 + $0x1c8] sm:$0xff]  ;;  %v651_v55 = vld [vmem:[#allocation2 + $0x189] sm:$0xff] }
 0x2b5   : > { %v4860_v52 = vsel %vm1858_vm7, %v1777_v2, %v1890_v19  ;;  %v1554_v41 = vadd.f32 %v1553_v42, %v1441_v49  ;;  %v1444_v42 = vadd.f32 %v4682_v33, %v4628_v48  ;;  %2760 = vmatpush.msrb.mxu0 %v2324_v21  ;;  %v2291_v48 = vld [vmem:[#allocation8 + $0xc0] sm:$0xff]  ;;  %v4882_v33 = vpop.f32.mrf.mxu1  ;;  %v2290_v21 = vld [vmem:[#allocation8 + $0xb8] sm:$0xff] }
 0x2b6   : > { %v4862_v14 = vld [vmem:[#allocation2 + $0x60] sm:$0xff]  ;;  %1954 = vst [vmem:[#allocation2 + $0x69] sm:$0xff] %v4860_v52  ;;  %2535 = vmatpush.msrb.mxu2 %v2291_v48 }
 0x2b7   : > { %2455 = vmatmul.f32.gmra.mxu1 %v4862_v14  ;;  %v1667_v5 = vadd.f32 %v4818_v44, %v1554_v41  ;;  %v4878_v41 = vpop.f32.mrf.mxu3  ;;  %5953 = vst [vmem:[#allocation28_spill] sm:$0xff] %v4882_v33  ;;  %v2305_v48 = vld [vmem:[#allocation8 + $0x130] sm:$0xff] }
 0x2b8   : > { %v4869_v34 = vpop.f32.mrf.mxu0  ;;  %2536 = vmatpush.msrb.mxu2 %v2290_v21  ;;  %v2321_v33 = vld [vmem:[#allocation8 + $0x1b0] sm:$0xff]  ;;  %v2303_v21 = vld [vmem:[#allocation8 + $0x120] sm:$0xff] }
 0x2b9   : > { %v1780_v19 = vadd.f32 %v4823_v35, %v1667_v5  ;;  %1603 = vmatmul.f32.gmra.mxu2 %v615_v28  ;;  %v616_v35 = vld [vmem:[#allocation2 + $0x168] sm:$0xff]  ;;  %v2340_v28 = vld [vmem:[#allocation8 + $0x248] sm:$0xff] }
 0x2ba   : > { %2873 = vmatpush.msrb.mxu1 %v2340_v28  ;;  %v2289_v28 = vld [vmem:[#allocation8 + $0xb0] sm:$0xff] }
 0x2bb   : > { %vm1859_vm8 = vcmp.ge.f32.partialorder %v1780_v19, 0.0  ;;  %v1891_v61 = vmul.f32 0.2, %v1780_v19  ;;  %1835 = vmatmul.f32.gmra.mxu0 %v681_v6  ;;  %v2307_v6 = vld [vmem:[#allocation8 + $0x140] sm:$0xff]  ;;  %2537 = vmatpush.msrb.mxu2 %v2289_v28 }
 0x2bc   : > { %v1556_v26 = vpop.f32.mrf.mxu2  ;;  %2648 = vmatpush.msrb.mxu3 %v2307_v6 }
 0x2bd   : > { %v4874_v2 = vsel %vm1859_vm8, %v1780_v19, %v1891_v61  ;;  %v1557_v49 = vadd.f32 %v1556_v26, %v1444_v42  ;;  %v4876_v44 = vld [vmem:[#allocation2 + $0x68] sm:$0xff]  ;;  %v2323_v19 = vld [vmem:[#allocation8 + $0x1c0] sm:$0xff]  ;;  %1728 = vmatmul.f32.gmra.mxu3 %v651_v55  ;;  %v4901_v28 = vpop.f32.mrf.mxu1 }
 0x2be   : > { %5952 = vst [vmem:[#allocation27_spill] sm:$0xff] %v4874_v2  ;;  %v682_v61 = vld [vmem:[#allocation2 + $0x182] sm:$0xff]  ;;  %2761 = vmatpush.msrb.mxu0 %v2323_v19  ;;  %2649 = vmatpush.msrb.mxu3 %v2306_v54  ;;  %v2288_v19 = vld [vmem:[#allocation8 + $0xa8] sm:$0xff] }
 0x2bf   : > { %1955 = vst [vmem:[#allocation2 + $0x79] sm:$0xff] %v4874_v2  ;;  %2458 = vmatmul.f32.gmra.mxu1 %v4876_v44  ;;  %v1670_v5 = vadd.f32 %v4833_v4, %v1557_v49  ;;  %v2322_v2 = vld [vmem:[#allocation8 + $0x1b8] sm:$0xff]  ;;  %v1447_v4 = vadd.f32 %v4687_v32, %v4639_v63  ;;  %v4894_v55 = vpop.f32.mrf.mxu3  ;;  %v2304_v63 = vld [vmem:[#allocation8 + $0x128] sm:$0xff]  ;;  %v617_v32 = vld [vmem:[#allocation2 + $0x170] sm:$0xff]  ;;  %2538 = vmatpush.msrb.mxu2 %v2288_v19 }
 0x2c0   : > { %v4885_v42 = vpop.f32.mrf.mxu0  ;;  %2762 = vmatpush.msrb.mxu0 %v2322_v2  ;;  %2650 = vmatpush.msrb.mxu3 %v2305_v48  ;;  %v2320_v54 = vld [vmem:[#allocation8 + $0x1a8] sm:$0xff]  ;;  %5955 = vst [vmem:[#allocation30_spill] sm:$0xff] %v4901_v28  ;;  %v2318_v19 = vld [vmem:[#allocation8 + $0x198] sm:$0xff]  ;;  %v2283_v28 = vld [vmem:[#allocation8 + $0x80] sm:$0xff] }
 0x2c1   : > { %v1783_v26 = vadd.f32 %v4838_v12, %v1670_v5  ;;  %1606 = vmatmul.f32.gmra.mxu2 %v616_v35 }
 0x2c2   : > { %2763 = vmatpush.msrb.mxu0 %v2321_v33  ;;  %2651 = vmatpush.msrb.mxu3 %v2304_v63  ;;  %v2286_v33 = vld [vmem:[#allocation8 + $0x98] sm:$0xff]  ;;  %v2301_v63 = vld [vmem:[#allocation8 + $0x110] sm:$0xff] }
 0x2c3   : > { %vm1860_vm9 = vcmp.ge.f32.partialorder %v1783_v26, 0.0  ;;  %v1892_v49 = vmul.f32 0.2, %v1783_v26  ;;  %1838 = vmatmul.f32.gmra.mxu0 %v682_v61  ;;  %v652_v61 = vld [vmem:[#allocation2 + $0x199] sm:$0xff] }
 0x2c4   : > { %v1559_v6 = vpop.f32.mrf.mxu2  ;;  %2764 = vmatpush.msrb.mxu0 %v2320_v54  ;;  %2652 = vmatpush.msrb.mxu3 %v2303_v21 }
 0x2c5   : > { %v4890_v12 = vsel %vm1860_vm9, %v1783_v26, %v1892_v49  ;;  %v1560_v35 = vadd.f32 %v1559_v6, %v1447_v4  ;;  %v2287_v26 = vld [vmem:[#allocation8 + $0xa0] sm:$0xff]  ;;  %1731 = vmatmul.f32.gmra.mxu3 %v652_v61 }
 0x2c6   : > { %5954 = vst [vmem:[#allocation29_spill] sm:$0xff] %v4890_v12  ;;  %v4892_v5 = vld [vmem:[#allocation2 + $0x78] sm:$0xff]  ;;  %v683_v49 = vld [vmem:[#allocation2 + $0x18a] sm:$0xff]  ;;  %2539 = vmatpush.msrb.mxu2 %v2287_v26  ;;  %v2317_v26 = vld [vmem:[#allocation8 + $0x190] sm:$0xff] }
 0x2c7   : > { %1956 = vst [vmem:[#allocation2 + $0x81] sm:$0xff] %v4890_v12  ;;  %2461 = vmatmul.f32.gmra.mxu1 %v4892_v5  ;;  %v1673_v2 = vadd.f32 %v4848_v10, %v1560_v35  ;;  %v2319_v6 = vld [vmem:[#allocation8 + $0x1a0] sm:$0xff]  ;;  %v2302_v12 = vld [vmem:[#allocation8 + $0x118] sm:$0xff]  ;;  %v1450_v10 = vadd.f32 %v4693_v7, %v4646_v11  ;;  %v4910_v61 = vpop.f32.mrf.mxu3  ;;  %v2300_v11 = vld [vmem:[#allocation8 + $0x108] sm:$0xff] }
 0x2c8   : > { %v4899_v4 = vpop.f32.mrf.mxu0  ;;  %2653 = vmatpush.msrb.mxu3 %v2302_v12  ;;  %2765 = vmatpush.msrb.mxu0 %v2319_v6  ;;  %v618_v7 = vld [vmem:[#allocation2 + $0x180] sm:$0xff]  ;;  %v2339_v12 = vld [vmem:[#allocation8 + $0x240] sm:$0xff]  ;;  %v2284_v6 = vld [vmem:[#allocation8 + $0x88] sm:$0xff] }
 0x2c9   : > { %v1786_v48 = vadd.f32 %v4853_v47, %v1673_v2  ;;  %1609 = vmatmul.f32.gmra.mxu2 %v617_v32  ;;  %v2285_v47 = vld [vmem:[#allocation8 + $0x90] sm:$0xff]  ;;  %2874 = vmatpush.msrb.mxu1 %v2339_v12 }
 0x2ca   : > { %2540 = vmatpush.msrb.mxu2 %v2286_v33  ;;  %2654 = vmatpush.msrb.mxu3 %v2301_v63 }
 0x2cb   : > { %vm1861_vm10 = vcmp.ge.f32.partialorder %v1786_v48, 0.0  ;;  %v1893_v35 = vmul.f32 0.2, %v1786_v48  ;;  %1841 = vmatmul.f32.gmra.mxu0 %v683_v49 }
 0x2cc   : > { %v1562_v54 = vpop.f32.mrf.mxu2  ;;  %2766 = vmatpush.msrb.mxu0 %v2318_v19  ;;  %2541 = vmatpush.msrb.mxu2 %v2285_v47  ;;  %v4920_v19 = vpop.f32.mrf.mxu1 }
 0x2cd   : > { %v4906_v32 = vsel %vm1861_vm10, %v1786_v48, %v1893_v35  ;;  %v1563_v2 = vadd.f32 %v1562_v54, %v1450_v10  ;;  %v653_v48 = vld [vmem:[#allocation2 + $0x1a1] sm:$0xff]  ;;  %2655 = vmatpush.msrb.mxu3 %v2300_v11  ;;  %v2299_v35 = vld [vmem:[#allocation8 + $0x100] sm:$0xff]  ;;  %v2316_v54 = vld [vmem:[#allocation8 + $0x188] sm:$0xff] }
 0x2ce   : > { %v4908_v21 = vld [vmem:[#allocation2 + $0x80] sm:$0xff]  ;;  %1957 = vst [vmem:[#allocation2 + $0x91] sm:$0xff] %v4906_v32  ;;  %2767 = vmatpush.msrb.mxu0 %v2317_v26  ;;  %1734 = vmatmul.f32.gmra.mxu3 %v653_v48 }
 0x2cf   : > { %2464 = vmatmul.f32.gmra.mxu1 %v4908_v21  ;;  %v1676_v49 = vadd.f32 %v4864_v46, %v1563_v2  ;;  %v684_v10 = vld [vmem:[#allocation2 + $0x19a] sm:$0xff]  ;;  %2542 = vmatpush.msrb.mxu2 %v2284_v6  ;;  %v1453_v46 = vadd.f32 %v4698_v13, %v4652_v62  ;;  %v2315_v2 = vld [vmem:[#allocation8 + $0x180] sm:$0xff]  ;;  %v4926_v12 = vpop.f32.mrf.mxu3  ;;  %v619_v62 = vld [vmem:[#allocation2 + $0x188] sm:$0xff] }
 0x2d0   : > { %v4915_v33 = vpop.f32.mrf.mxu0  ;;  %2656 = vmatpush.msrb.mxu3 %v2299_v35  ;;  %2768 = vmatpush.msrb.mxu0 %v2316_v54  ;;  %v685_v6 = vld [vmem:[#allocation2 + $0x1a2] sm:$0xff] }
 0x2d1   : > { %v1789_v63 = vadd.f32 %v4869_v34, %v1676_v49  ;;  %1612 = vmatmul.f32.gmra.mxu2 %v618_v7  ;;  %v2043_v49 = vld [vmem:[#allocation2 + $0x2] sm:$0xff] }
 0x2d2   : > { %2543 = vmatpush.msrb.mxu2 %v2283_v28  ;;  %2769 = vmatpush.msrb.mxu0 %v2315_v2 }
 0x2d3   : > { %vm1862_vm11 = vcmp.ge.f32.partialorder %v1789_v63, 0.0  ;;  %v1894_v47 = vmul.f32 0.2, %v1789_v63  ;;  %1844 = vmatmul.f32.gmra.mxu0 %v684_v10  ;;  %v1456_v10 = vadd.f32 %v4705_v24, %v4658_v43  ;;  %v2044_v43 = vld [vmem:[#allocation2 + $0xa] sm:$0xff] }
 0x2d4   : > { %v1565_v26 = vpop.f32.mrf.mxu2  ;;  %v4934_v54 = vpop.f32.mrf.mxu1 }
 0x2d5   : > { %v4922_v11 = vsel %vm1862_vm11, %v1789_v63, %v1894_v47  ;;  %v1566_v34 = vadd.f32 %v1565_v26, %v1453_v46  ;;  %v4924_v7 = vld [vmem:[#allocation2 + $0x90] sm:$0xff] }
 0x2d6   : > { %1958 = vst [vmem:[#allocation2 + $0x99] sm:$0xff] %v4922_v11  ;;  %2657 = vmatmul.f32.vlgmr.msrb.gmra.mxu3 %v2043_v49 }
 0x2d7   : > { %2467 = vmatmul.f32.gmra.mxu1 %v4924_v7  ;;  %v1679_v13 = vadd.f32 %v4878_v41, %v1566_v34  ;;  %v1690_v2 = vpop.f32.mrf.mxu3 }
 0x2d8   : > { %v1800_v48 = vpop.f32.mrf.mxu0 }
 0x2d9   : > { %v1792_v28 = vadd.f32 %v4885_v42, %v1679_v13  ;;  %1615 = vmatmul.f32.gmra.mxu2 %v619_v62  ;;  %v2338_v42 = vld [vmem:[#allocation8 + $0x238] sm:$0xff]  ;;  %v1459_v62 = vadd.f32 %v4710_v0, %v4666_v20 }
 0x2da   : > { %2875 = vmatpush.msrb.mxu1 %v2338_v42 }
 0x2db   : > { %vm1863_vm12 = vcmp.ge.f32.partialorder %v1792_v28, 0.0  ;;  %v1895_v35 = vmul.f32 0.2, %v1792_v28  ;;  %1847 = vmatmul.f32.gmra.mxu0 %v685_v6 }
 0x2dc   : > { %v1568_v63 = vpop.f32.mrf.mxu2 }
 0x2dd   : > { %v4936_v46 = vsel %vm1863_vm12, %v1792_v28, %v1895_v35  ;;  %v1569_v47 = vadd.f32 %v1568_v63, %v1456_v10  ;;  %v4938_v41 = vld [vmem:[#allocation2 + $0x98] sm:$0xff]  ;;  %v1462_v63 = vadd.f32 %v4716_v57, %v4669_v39 }
 0x2de   : > { %1959 = vst [vmem:[#allocation2 + $0xa9] sm:$0xff] %v4936_v46  ;;  %2660 = vmatmul.f32.gmra.mxu3 %v2044_v43 }
 0x2df   : > { %2470 = vmatmul.f32.gmra.mxu1 %v4938_v41  ;;  %v1682_v26 = vadd.f32 %v4894_v55, %v1569_v47  ;;  %v1693_v10 = vpop.f32.mrf.mxu3 }
 0x2e0   : > { %v1803_v24 = vpop.f32.mrf.mxu0 }
 0x2e1   : > { %v1795_v34 = vadd.f32 %v4899_v4, %v1682_v26  ;;  %1618 = vmatmul.f32.gmra.mxu2 %v4720_v50  ;;  %v4954_v4 = vpop.f32.mrf.mxu1 }
 0x2e3   : > { %vm1864_vm13 = vcmp.ge.f32.partialorder %v1795_v34, 0.0  ;;  %v1896_v13 = vmul.f32 0.2, %v1795_v34  ;;  %2770 = vmatmul.f32.vlgmr.msrb.gmra.mxu0 %v4773_v15  ;;  %v2045_v15 = vld [vmem:[#allocation2 + $0x1a] sm:$0xff] }
 0x2e4   : > { %v1571_v49 = vpop.f32.mrf.mxu2 }
 0x2e5   : > { %v4948_v6 = vsel %vm1864_vm13, %v1795_v34, %v1896_v13  ;;  %v1572_v28 = vadd.f32 %v1571_v49, %v1459_v62  ;;  %v4950_v55 = vld [vmem:[#allocation2 + $0xa8] sm:$0xff]  ;;  %v1465_v49 = vadd.f32 %v4724_v59, %v4672_v53  ;;  %v2047_v59 = vld [vmem:[#allocation2 + $0x32] sm:$0xff] }
 0x2e6   : > { %1960 = vst [vmem:[#allocation2 + $0xb1] sm:$0xff] %v4948_v6  ;;  %2663 = vmatmul.f32.gmra.mxu3 %v2045_v15  ;;  %v2046_v13 = vld [vmem:[#allocation2 + $0x22] sm:$0xff] }
 0x2e7   : > { %2473 = vmatmul.f32.gmra.mxu1 %v4950_v55  ;;  %v1685_v35 = vadd.f32 %v4910_v61, %v1572_v28  ;;  %v4966_v61 = vpop.f32.mrf.mxu3 }
 0x2e8   : > { %v1806_v20 = vpop.f32.mrf.mxu0 }
 0x2e9   : > { %v1798_v0 = vadd.f32 %v4915_v33, %v1685_v35  ;;  %1621 = vmatmul.f32.gmra.mxu2 %v4720_v50  ;;  %v2011_v50 = vld [vmem:[#allocation2 + $0x1] sm:$0xff]  ;;  %v4971_v57 = vpop.f32.mrf.mxu1 }
 0x2ea   : > { %v2337_v33 = vld [vmem:[#allocation8 + $0x230] sm:$0xff] }
 0x2eb   : > { %vm1865_vm14 = vcmp.ge.f32.partialorder %v1798_v0, 0.0  ;;  %v1897_v47 = vmul.f32 0.2, %v1798_v0  ;;  %2773 = vmatmul.f32.gmra.mxu0 %v4787_v45  ;;  %2876 = vmatpush.msrb.mxu1 %v2337_v33 }
 0x2ec   : > { %v1574_v42 = vpop.f32.mrf.mxu2 }
 0x2ed   : > { %v4962_v26 = vsel %vm1865_vm14, %v1798_v0, %v1897_v47  ;;  %v1575_v43 = vadd.f32 %v1574_v42, %v1462_v63  ;;  %v4964_v34 = vld [vmem:[#allocation2 + $0xb0] sm:$0xff] }
 0x2ee   : > { %1961 = vst [vmem:[#allocation2 + $0xc1] sm:$0xff] %v4962_v26  ;;  %2666 = vmatmul.f32.gmra.mxu3 %v2046_v13 }
 0x2ef   : > { %2476 = vmatmul.f32.gmra.mxu1 %v4964_v34  ;;  %v1688_v39 = vadd.f32 %v4926_v12, %v1575_v43  ;;  %v1699_v63 = vpop.f32.mrf.mxu3 }
 0x2f0   : > { %v1809_v45 = vpop.f32.mrf.mxu0 }
 0x2f1   : > { %v1801_v62 = vadd.f32 %v1800_v48, %v1688_v39  ;;  %2544 = vmatmul.f32.vlgmr.msrb.gmra.mxu2 %v2011_v50  ;;  %v2012_v48 = vld [vmem:[#allocation2 + $0x9] sm:$0xff]  ;;  %v4982_v53 = vpop.f32.mrf.mxu1 }
 0x2f3   : > { %vm1866_vm15 = vcmp.ge.f32.partialorder %v1801_v62, 0.0  ;;  %v1898_v28 = vmul.f32 0.2, %v1801_v62  ;;  %2776 = vmatmul.f32.gmra.mxu0 %v4801_v36  ;;  %v1468_v36 = vadd.f32 %v4732_v1, %v4677_v23  ;;  %v2048_v1 = vld [vmem:[#allocation2 + $0x3a] sm:$0xff] }
 0x2f4   : > { %v1577_v35 = vpop.f32.mrf.mxu2 }
 0x2f5   : > { %v4976_v0 = vsel %vm1866_vm15, %v1801_v62, %v1898_v28  ;;  %v1578_v15 = vadd.f32 %v1577_v35, %v1465_v49  ;;  %v4978_v12 = vld [vmem:[#allocation2 + $0xc0] sm:$0xff] }
 0x2f6   : > { %1962 = vst [vmem:[#allocation2 + $0xc9] sm:$0xff] %v4976_v0  ;;  %2669 = vmatmul.f32.gmra.mxu3 %v2047_v59  ;;  %v2049_v59 = vld [vmem:[#allocation2 + $0x4a] sm:$0xff] }
 0x2f7   : > { %2479 = vmatmul.f32.gmra.mxu1 %v4978_v12  ;;  %v1691_v47 = vadd.f32 %v1690_v2, %v1578_v15  ;;  %v1702_v2 = vpop.f32.mrf.mxu3 }
 0x2f8   : > { %v1812_v42 = vpop.f32.mrf.mxu0 }
 0x2f9   : > { %v1804_v43 = vadd.f32 %v1803_v24, %v1691_v47  ;;  %2547 = vmatmul.f32.gmra.mxu2 %v2012_v48  ;;  %v2336_v24 = vld [vmem:[#allocation8 + $0x228] sm:$0xff] }
 0x2fa   : > { %2877 = vmatpush.msrb.mxu1 %v2336_v24 }
 0x2fb   : > { %vm1867_vm0 = vcmp.ge.f32.partialorder %v1804_v43, 0.0  ;;  %v1899_v50 = vmul.f32 0.2, %v1804_v43  ;;  %2779 = vmatmul.f32.gmra.mxu0 %v4816_v40  ;;  %v1471_v40 = vadd.f32 %v4739_v37, %v4680_v25 }
 0x2fc   : > { %v1580_v33 = vpop.f32.mrf.mxu2 }
 0x2fd   : > { %v4987_v39 = vsel %vm1867_vm0, %v1804_v43, %v1899_v50  ;;  %v1581_v62 = vadd.f32 %v1580_v33, %v1468_v36  ;;  %v4989_v13 = vld [vmem:[#allocation2 + $0xc8] sm:$0xff] }
 0x2fe   : > { %1963 = vst [vmem:[#allocation2 + $0xd9] sm:$0xff] %v4987_v39  ;;  %2672 = vmatmul.f32.gmra.mxu3 %v2048_v1 }
 0x2ff   : > { %2482 = vmatmul.f32.gmra.mxu1 %v4989_v13  ;;  %v1694_v49 = vadd.f32 %v1693_v10, %v1581_v62 }
 0x300   : > { %v1815_v28 = vpop.f32.mrf.mxu0 }
 0x301   : > { %v1807_v23 = vadd.f32 %v1806_v20, %v1694_v49  ;;  %2550 = vmatmul.f32.gmra.mxu2 %v4759_v29  ;;  %v1705_v20 = vpop.f32.mrf.mxu3 }
 0x303   : > { %vm1868_vm1 = vcmp.ge.f32.partialorder %v1807_v23, 0.0  ;;  %v1900_v35 = vmul.f32 0.2, %v1807_v23  ;;  %v4996_v15 = vpop.f32.mrf.mxu1  ;;  %2782 = vmatmul.f32.gmra.mxu0 %v4831_v8  ;;  %v1474_v8 = vadd.f32 %v4746_v22, %v4685_v58 }
 0x304   : > { %v1583_v48 = vpop.f32.mrf.mxu2 }
 0x305   : > { %v4999_v47 = vsel %vm1868_vm1, %v1807_v23, %v1900_v35  ;;  %v1584_v10 = vadd.f32 %v1583_v48, %v1471_v40  ;;  %v5001_v43 = vld [vmem:[#allocation2 + $0xd8] sm:$0xff] }
 0x306   : > { %1964 = vst [vmem:[#allocation2 + $0xe1] sm:$0xff] %v4999_v47  ;;  %2675 = vmatmul.f32.gmra.mxu3 %v2049_v59  ;;  %v2050_v23 = vld [vmem:[#allocation2 + $0x52] sm:$0xff] }
 0x307   : > { %2485 = vmatmul.f32.gmra.mxu1 %v5001_v43  ;;  %v1697_v29 = vadd.f32 %v4966_v61, %v1584_v10 }
 0x308   : > { %v1818_v25 = vpop.f32.mrf.mxu0 }
 0x309   : > { %v1810_v37 = vadd.f32 %v1809_v45, %v1697_v29  ;;  %2553 = vmatmul.f32.gmra.mxu2 %v4770_v27  ;;  %v1708_v45 = vpop.f32.mrf.mxu3  ;;  %v2335_v27 = vld [vmem:[#allocation8 + $0x220] sm:$0xff] }
 0x30a   : > { %2878 = vmatpush.msrb.mxu1 %v2335_v27  ;;  %v2052_v27 = vld [vmem:[#allocation2 + $0x6a] sm:$0xff] }
 0x30b   : > { %vm1869_vm2 = vcmp.ge.f32.partialorder %v1810_v37, 0.0  ;;  %v1901_v36 = vmul.f32 0.2, %v1810_v37  ;;  %v5009_v50 = vpop.f32.mrf.mxu1  ;;  %2785 = vmatmul.f32.gmra.mxu0 %v4846_v56  ;;  %v1477_v56 = vadd.f32 %v4756_v18, %v4690_v31  ;;  %v2051_v18 = vld [vmem:[#allocation2 + $0x62] sm:$0xff] }
 0x30c   : > { %v1586_v33 = vpop.f32.mrf.mxu2 }
 0x30d   : > { %v5012_v62 = vsel %vm1869_vm2, %v1810_v37, %v1901_v36  ;;  %v1587_v24 = vadd.f32 %v1586_v33, %v1474_v8  ;;  %v5014_v61 = vld [vmem:[#allocation2 + $0xe0] sm:$0xff] }
 0x30e   : > { %1965 = vst [vmem:[#allocation2 + $0xf1] sm:$0xff] %v5012_v62  ;;  %2678 = vmatmul.f32.gmra.mxu3 %v2050_v23 }
 0x30f   : > { %2488 = vmatmul.f32.gmra.mxu1 %v5014_v61  ;;  %v1700_v49 = vadd.f32 %v1699_v63, %v1587_v24 }
 0x310   : > { %v1821_v58 = vpop.f32.mrf.mxu0 }
 0x311   : > { %v1813_v22 = vadd.f32 %v1812_v42, %v1700_v49  ;;  %2556 = vmatmul.f32.gmra.mxu2 %v4784_v51  ;;  %v1711_v42 = vpop.f32.mrf.mxu3 }
 0x313   : > { %vm1870_vm3 = vcmp.ge.f32.partialorder %v1813_v22, 0.0  ;;  %v1902_v1 = vmul.f32 0.2, %v1813_v22  ;;  %v5021_v40 = vpop.f32.mrf.mxu1  ;;  %2788 = vmatmul.f32.gmra.mxu0 %v4862_v14  ;;  %v1480_v14 = vadd.f32 %v4767_v38, %v4695_v17 }
 0x314   : > { %v1589_v35 = vpop.f32.mrf.mxu2 }
 0x315   : > { %v5024_v48 = vsel %vm1870_vm3, %v1813_v22, %v1902_v1  ;;  %v1590_v63 = vadd.f32 %v1589_v35, %v1477_v56  ;;  %v5026_v10 = vld [vmem:[#allocation2 + $0xf0] sm:$0xff] }
 0x316   : > { %1966 = vst [vmem:[#allocation2 + $0xf9] sm:$0xff] %v5024_v48  ;;  %2681 = vmatmul.f32.gmra.mxu3 %v2051_v18 }
 0x317   : > { %2491 = vmatmul.f32.gmra.mxu1 %v5026_v10  ;;  %v1703_v51 = vadd.f32 %v1702_v2, %v1590_v63  ;;  %v5956_v63 = vld [vmem:[#allocation13_spill] sm:$0xff] }
 0x318   : > { %v1824_v29 = vpop.f32.mrf.mxu0 }
 0x319   : > { %v1816_v31 = vadd.f32 %v1815_v28, %v1703_v51  ;;  %2559 = vmatmul.f32.gmra.mxu2 %v4798_v30  ;;  %v1714_v28 = vpop.f32.mrf.mxu3  ;;  %v2334_v30 = vld [vmem:[#allocation8 + $0x218] sm:$0xff] }
 0x31a   : > { %2879 = vmatpush.msrb.mxu1 %v2334_v30 }
 0x31b   : > { %vm1871_vm4 = vcmp.ge.f32.partialorder %v1816_v31, 0.0  ;;  %v1903_v37 = vmul.f32 0.2, %v1816_v31  ;;  %v5033_v59 = vpop.f32.mrf.mxu1  ;;  %2791 = vmatmul.f32.gmra.mxu0 %v4876_v44  ;;  %v1483_v44 = vadd.f32 %v4782_v3, %v4700_v60  ;;  %v2053_v3 = vld [vmem:[#allocation2 + $0x7a] sm:$0xff] }
 0x31c   : > { %v1592_v8 = vpop.f32.mrf.mxu2 }
 0x31d   : > { %v5036_v36 = vsel %vm1871_vm4, %v1816_v31, %v1903_v37  ;;  %v1593_v33 = vadd.f32 %v1592_v8, %v1480_v14  ;;  %v5038_v2 = vld [vmem:[#allocation2 + $0xf8] sm:$0xff] }
 0x31e   : > { %1967 = vst [vmem:[#allocation2 + $0x109] sm:$0xff] %v5036_v36  ;;  %2684 = vmatmul.f32.gmra.mxu3 %v2052_v27  ;;  %v2054_v27 = vld [vmem:[#allocation2 + $0x82] sm:$0xff] }
 0x31f   : > { %2494 = vmatmul.f32.gmra.mxu1 %v5038_v2  ;;  %v1706_v24 = vadd.f32 %v1705_v20, %v1593_v33 }
 0x320   : > { %v1827_v17 = vpop.f32.mrf.mxu0 }
 0x321   : > { %v1819_v38 = vadd.f32 %v1818_v25, %v1706_v24  ;;  %2562 = vmatmul.f32.gmra.mxu2 %v4813_v16  ;;  %v1717_v25 = vpop.f32.mrf.mxu3 }
 0x323   : > { %vm1872_vm5 = vcmp.ge.f32.partialorder %v1819_v38, 0.0  ;;  %v1904_v49 = vmul.f32 0.2, %v1819_v38  ;;  %v5045_v22 = vpop.f32.mrf.mxu1  ;;  %2794 = vmatmul.f32.gmra.mxu0 %v4892_v5  ;;  %v5957_v5 = vld [vmem:[#allocation22_spill] sm:$0xff] }
 0x324   : > { %v1595_v23 = vpop.f32.mrf.mxu2  ;;  %v1486_v51 = vadd.f32 %v5957_v5, %v5956_v63 }
 0x325   : > { %v5048_v56 = vsel %vm1872_vm5, %v1819_v38, %v1904_v49  ;;  %v1596_v20 = vadd.f32 %v1595_v23, %v1483_v44  ;;  %v5050_v1 = vld [vmem:[#allocation2 + $0x108] sm:$0xff]  ;;  %v5958_v38 = vld [vmem:[#allocation25_spill] sm:$0xff]  ;;  %v5960_v44 = vld [vmem:[#allocation23_spill] sm:$0xff] }
 0x326   : > { %1968 = vst [vmem:[#allocation2 + $0x111] sm:$0xff] %v5048_v56  ;;  %2687 = vmatmul.f32.gmra.mxu3 %v2053_v3 }
 0x327   : > { %2497 = vmatmul.f32.gmra.mxu1 %v5050_v1  ;;  %v1709_v16 = vadd.f32 %v1708_v45, %v1596_v20 }
 0x328   : > { %v1830_v35 = vpop.f32.mrf.mxu0 }
 0x329   : > { %v1822_v60 = vadd.f32 %v1821_v58, %v1709_v16  ;;  %2565 = vmatmul.f32.gmra.mxu2 %v4828_v9  ;;  %v1720_v58 = vpop.f32.mrf.mxu3  ;;  %v2333_v9 = vld [vmem:[#allocation8 + $0x210] sm:$0xff] }
 0x32a   : > { %2880 = vmatpush.msrb.mxu1 %v2333_v9 }
 0x32b   : > { %vm1873_vm6 = vcmp.ge.f32.partialorder %v1822_v60, 0.0  ;;  %v1905_v31 = vmul.f32 0.2, %v1822_v60  ;;  %v5057_v18 = vpop.f32.mrf.mxu1  ;;  %2797 = vmatmul.f32.gmra.mxu0 %v4908_v21  ;;  %v5959_v21 = vld [vmem:[#allocation14_spill] sm:$0xff] }
 0x32c   : > { %v1598_v14 = vpop.f32.mrf.mxu2  ;;  %v1489_v49 = vadd.f32 %v5960_v44, %v5959_v21 }
 0x32d   : > { %v5060_v37 = vsel %vm1873_vm6, %v1822_v60, %v1905_v31  ;;  %v1599_v8 = vadd.f32 %v1598_v14, %v1486_v51  ;;  %v5062_v45 = vld [vmem:[#allocation2 + $0x110] sm:$0xff]  ;;  %v5961_v14 = vld [vmem:[#allocation15_spill] sm:$0xff] }
 0x32e   : > { %1969 = vst [vmem:[#allocation2 + $0x121] sm:$0xff] %v5060_v37  ;;  %2690 = vmatmul.f32.gmra.mxu3 %v2054_v27  ;;  %v2055_v31 = vld [vmem:[#allocation2 + $0x92] sm:$0xff] }
 0x32f   : > { %2500 = vmatmul.f32.gmra.mxu1 %v5062_v45  ;;  %v1712_v33 = vadd.f32 %v1711_v42, %v1599_v8 }
 0x330   : > { %v1833_v30 = vpop.f32.mrf.mxu0 }
 0x331   : > { %v1825_v24 = vadd.f32 %v1824_v29, %v1712_v33  ;;  %2568 = vmatmul.f32.gmra.mxu2 %v5958_v38  ;;  %v1723_v29 = vpop.f32.mrf.mxu3 }
 0x333   : > { %vm1874_vm7 = vcmp.ge.f32.partialorder %v1825_v24, 0.0  ;;  %v1906_v23 = vmul.f32 0.2, %v1825_v24  ;;  %2800 = vmatmul.f32.gmra.mxu0 %v4924_v7  ;;  %v5962_v7 = vld [vmem:[#allocation24_spill] sm:$0xff] }
 0x334   : > { %v5069_v20 = vpop.f32.mrf.mxu1  ;;  %v1601_v16 = vpop.f32.mrf.mxu2  ;;  %v1492_v8 = vadd.f32 %v5962_v7, %v5961_v14 }
 0x335   : > { %v5072_v60 = vsel %vm1874_vm7, %v1825_v24, %v1906_v23  ;;  %v1602_v42 = vadd.f32 %v1601_v16, %v1489_v49  ;;  %v5074_v3 = vld [vmem:[#allocation2 + $0x120] sm:$0xff]  ;;  %v5964_v16 = vld [vmem:[#allocation16_spill] sm:$0xff] }
 0x336   : > { %1970 = vst [vmem:[#allocation2 + $0x129] sm:$0xff] %v5072_v60  ;;  %2693 = vmatmul.f32.gmra.mxu3 %v2055_v31  ;;  %v5963_v23 = vld [vmem:[#allocation27_spill] sm:$0xff] }
 0x337   : > { %2503 = vmatmul.f32.gmra.mxu1 %v5074_v3  ;;  %v1715_v63 = vadd.f32 %v1714_v28, %v1602_v42  ;;  %v5965_v42 = vld [vmem:[#allocation26_spill] sm:$0xff] }
 0x338   : > { %v1836_v5 = vpop.f32.mrf.mxu0 }
 0x339   : > { %v1828_v51 = vadd.f32 %v1827_v17, %v1715_v63  ;;  %2571 = vmatmul.f32.gmra.mxu2 %v4860_v52  ;;  %v5088_v17 = vpop.f32.mrf.mxu3  ;;  %v2332_v52 = vld [vmem:[#allocation8 + $0x208] sm:$0xff]  ;;  %v1495_v63 = vadd.f32 %v5965_v42, %v5964_v16 }
 0x33a   : > { %2881 = vmatpush.msrb.mxu1 %v2332_v52  ;;  %v5966_v52 = vld [vmem:[#allocation29_spill] sm:$0xff] }
 0x33b   : > { %vm1875_vm8 = vcmp.ge.f32.partialorder %v1828_v51, 0.0  ;;  %v1907_v9 = vmul.f32 0.2, %v1828_v51  ;;  %2803 = vmatmul.f32.gmra.mxu0 %v4938_v41  ;;  %v2056_v41 = vld [vmem:[#allocation2 + $0x9a] sm:$0xff] }
 0x33c   : > { %v5081_v33 = vpop.f32.mrf.mxu1  ;;  %v1604_v24 = vpop.f32.mrf.mxu2 }
 0x33d   : > { %v5084_v38 = vsel %vm1875_vm8, %v1828_v51, %v1907_v9  ;;  %v1605_v27 = vadd.f32 %v1604_v24, %v1492_v8  ;;  %v5086_v28 = vld [vmem:[#allocation2 + $0x128] sm:$0xff] }
 0x33e   : > { %1971 = vst [vmem:[#allocation2 + $0x139] sm:$0xff] %v5084_v38  ;;  %2696 = vmatmul.f32.gmra.mxu3 %v2056_v41 }
 0x33f   : > { %2506 = vmatmul.f32.gmra.mxu1 %v5086_v28  ;;  %v1718_v21 = vadd.f32 %v1717_v25, %v1605_v27 }
 0x340   : > { %v5092_v44 = vpop.f32.mrf.mxu0 }
 0x341   : > { %v1831_v49 = vadd.f32 %v1830_v35, %v1718_v21  ;;  %2574 = vmatmul.f32.gmra.mxu2 %v5963_v23  ;;  %v5104_v35 = vpop.f32.mrf.mxu3  ;;  %v2057_v21 = vld [vmem:[#allocation2 + $0xaa] sm:$0xff] }
 0x343   : > { %vm1876_vm9 = vcmp.ge.f32.partialorder %v1831_v49, 0.0  ;;  %v1908_v51 = vmul.f32 0.2, %v1831_v49  ;;  %2806 = vmatmul.f32.gmra.mxu0 %v4950_v55  ;;  %v5967_v55 = vld [vmem:[#allocation17_spill] sm:$0xff] }
 0x344   : > { %v5097_v31 = vpop.f32.mrf.mxu1  ;;  %v1607_v14 = vpop.f32.mrf.mxu2 }
 0x345   : > { %v5100_v7 = vsel %vm1876_vm9, %v1831_v49, %v1908_v51  ;;  %v1608_v25 = vadd.f32 %v1607_v14, %v1495_v63  ;;  %v5102_v8 = vld [vmem:[#allocation2 + $0x138] sm:$0xff]  ;;  %v5968_v49 = vld [vmem:[#allocation28_spill] sm:$0xff]  ;;  %v2331_v14 = vld [vmem:[#allocation8 + $0x200] sm:$0xff] }
 0x346   : > { %1972 = vst [vmem:[#allocation2 + $0x141] sm:$0xff] %v5100_v7  ;;  %2699 = vmatmul.f32.gmra.mxu3 %v2057_v21  ;;  %v1498_v23 = vadd.f32 %v5968_v49, %v5967_v55  ;;  %2882 = vmatpush.msrb.mxu1 %v2331_v14  ;;  %v5969_v21 = vld [vmem:[#allocation18_spill] sm:$0xff] }
 0x347   : > { %2509 = vmatmul.f32.gmra.mxu1 %v5102_v8  ;;  %v1721_v9 = vadd.f32 %v1720_v58, %v1608_v25  ;;  %v2362_v25 = vld [vmem:[#allocation8 + $0x2f8] sm:$0xff]  ;;  %v5970_v55 = vld [vmem:[#allocation30_spill] sm:$0xff] }
 0x348   : > { %v5108_v24 = vpop.f32.mrf.mxu0  ;;  %2980 = vmatpush.msra.mxu2 %v2362_v25  ;;  %v1501_v49 = vadd.f32 %v5970_v55, %v5969_v21  ;;  %v2361_v55 = vld [vmem:[#allocation8 + $0x2f0] sm:$0xff] }
 0x349   : > { %v1834_v27 = vadd.f32 %v1833_v30, %v1721_v9  ;;  %2577 = vmatmul.f32.gmra.mxu2 %v5966_v52  ;;  %v5120_v30 = vpop.f32.mrf.mxu3 }
 0x34a   : > { %2981 = vmatpush.msra.mxu2 %v2361_v55 }
 0x34b   : > { %vm1877_vm10 = vcmp.ge.f32.partialorder %v1834_v27, 0.0  ;;  %v1909_v41 = vmul.f32 0.2, %v1834_v27  ;;  %2809 = vmatmul.f32.gmra.mxu0 %v4964_v34 }
 0x34c   : > { %v5113_v16 = vpop.f32.mrf.mxu1  ;;  %v1610_v42 = vpop.f32.mrf.mxu2 }
 0x34d   : > { %v5116_v63 = vsel %vm1877_vm10, %v1834_v27, %v1909_v41  ;;  %v1611_v58 = vadd.f32 %v1610_v42, %v1498_v23  ;;  %v5118_v51 = vld [vmem:[#allocation2 + $0x140] sm:$0xff]  ;;  %v2058_v27 = vld [vmem:[#allocation2 + $0xb2] sm:$0xff] }
 0x34e   : > { %1973 = vst [vmem:[#allocation2 + $0x151] sm:$0xff] %v5116_v63  ;;  %2702 = vmatmul.f32.gmra.mxu3 %v2058_v27  ;;  %v2410_v27 = vld [vmem:[#allocation8 + $0x478] sm:$0xff] }
 0x34f   : > { %2512 = vmatmul.f32.gmra.mxu1 %v5118_v51  ;;  %v1724_v9 = vadd.f32 %v1723_v29, %v1611_v58 }
 0x350   : > { %v5124_v52 = vpop.f32.mrf.mxu0  ;;  %3319 = vmatpush.msra.mxu1 %v2410_v27 }
 0x351   : > { %v1837_v34 = vadd.f32 %v1836_v5, %v1724_v9  ;;  %2580 = vmatmul.f32.gmra.mxu2 %v4906_v32  ;;  %v5136_v5 = vpop.f32.mrf.mxu3  ;;  %v2378_v32 = vld [vmem:[#allocation8 + $0x378] sm:$0xff] }
 0x352   : > { %3093 = vmatpush.msra.mxu3 %v2378_v32  ;;  %v2394_v9 = vld [vmem:[#allocation8 + $0x3f8] sm:$0xff] }
 0x353   : > { %vm1878_vm11 = vcmp.ge.f32.partialorder %v1837_v34, 0.0  ;;  %v1910_v23 = vmul.f32 0.2, %v1837_v34  ;;  %2812 = vmatmul.f32.gmra.mxu0 %v4978_v12 }
 0x354   : > { %v5129_v41 = vpop.f32.mrf.mxu1  ;;  %v1613_v42 = vpop.f32.mrf.mxu2  ;;  %3206 = vmatpush.msra.mxu0 %v2394_v9 }
 0x355   : > { %v5132_v29 = vsel %vm1878_vm11, %v1837_v34, %v1910_v23  ;;  %v1614_v58 = vadd.f32 %v1613_v42, %v1501_v49  ;;  %v5134_v14 = vld [vmem:[#allocation2 + $0x150] sm:$0xff]  ;;  %v2059_v34 = vld [vmem:[#allocation2 + $0xc2] sm:$0xff] }
 0x356   : > { %1974 = vst [vmem:[#allocation2 + $0x159] sm:$0xff] %v5132_v29  ;;  %2705 = vmatmul.f32.gmra.mxu3 %v2059_v34  ;;  %v5971_v49 = vld [vmem:[#allocation19_spill] sm:$0xff]  ;;  %v5972_v34 = vld [vmem:[#allocation20_spill] sm:$0xff] }
 0x357   : > { %2515 = vmatmul.f32.gmra.mxu1 %v5134_v14  ;;  %v1727_v25 = vadd.f32 %v5088_v17, %v1614_v58  ;;  %v1504_v23 = vadd.f32 %v4920_v19, %v5971_v49  ;;  %v1507_v55 = vadd.f32 %v4934_v54, %v5972_v34  ;;  %v5973_v34 = vld [vmem:[#allocation21_spill] sm:$0xff] }
 0x358   : > { %v5141_v21 = vpop.f32.mrf.mxu0 }
 0x359   : > { %v1840_v12 = vadd.f32 %v5092_v44, %v1727_v25  ;;  %2583 = vmatmul.f32.gmra.mxu2 %v4922_v11  ;;  %v5154_v11 = vpop.f32.mrf.mxu3  ;;  %v2377_v25 = vld [vmem:[#allocation8 + $0x370] sm:$0xff] }
 0x35a   : > { %3094 = vmatpush.msra.mxu3 %v2377_v25 }
 0x35b   : > { %vm1879_vm12 = vcmp.ge.f32.partialorder %v1840_v12, 0.0  ;;  %v1911_v17 = vmul.f32 0.2, %v1840_v12  ;;  %2815 = vmatmul.f32.gmra.mxu0 %v4989_v13 }
 0x35c   : > { %v5147_v42 = vpop.f32.mrf.mxu1  ;;  %v1616_v58 = vpop.f32.mrf.mxu2 }
 0x35d   : > { %v5150_v32 = vsel %vm1879_vm12, %v1840_v12, %v1911_v17  ;;  %v1617_v9 = vadd.f32 %v1616_v58, %v1504_v23  ;;  %v5152_v44 = vld [vmem:[#allocation2 + $0x158] sm:$0xff]  ;;  %v2060_v12 = vld [vmem:[#allocation2 + $0xca] sm:$0xff] }
 0x35e   : > { %1975 = vst [vmem:[#allocation2 + $0x169] sm:$0xff] %v5150_v32  ;;  %2708 = vmatmul.f32.gmra.mxu3 %v2060_v12  ;;  %v2360_v12 = vld [vmem:[#allocation8 + $0x2e8] sm:$0xff] }
 0x35f   : > { %2518 = vmatmul.f32.gmra.mxu1 %v5152_v44  ;;  %v1730_v19 = vadd.f32 %v5104_v35, %v1617_v9  ;;  %2982 = vmatpush.msra.mxu2 %v2360_v12 }
 0x360   : > { %v5159_v27 = vpop.f32.mrf.mxu0 }
 0x361   : > { %v1843_v13 = vadd.f32 %v5108_v24, %v1730_v19  ;;  %2586 = vmatmul.f32.gmra.mxu2 %v4936_v46  ;;  %v5172_v24 = vpop.f32.mrf.mxu3  ;;  %v2393_v46 = vld [vmem:[#allocation8 + $0x3f0] sm:$0xff] }
 0x362   : > { %v2409_v19 = vld [vmem:[#allocation8 + $0x470] sm:$0xff]  ;;  %3207 = vmatpush.msra.mxu0 %v2393_v46 }
 0x363   : > { %vm1880_vm13 = vcmp.ge.f32.partialorder %v1843_v13, 0.0  ;;  %v1912_v49 = vmul.f32 0.2, %v1843_v13  ;;  %2818 = vmatmul.f32.gmra.mxu0 %v5001_v43  ;;  %3320 = vmatpush.msra.mxu1 %v2409_v19 }
 0x364   : > { %v5165_v23 = vpop.f32.mrf.mxu1  ;;  %v1619_v35 = vpop.f32.mrf.mxu2 }
 0x365   : > { %v5168_v17 = vsel %vm1880_vm13, %v1843_v13, %v1912_v49  ;;  %v1620_v58 = vadd.f32 %v1619_v35, %v1507_v55  ;;  %v5170_v9 = vld [vmem:[#allocation2 + $0x168] sm:$0xff]  ;;  %v2061_v13 = vld [vmem:[#allocation2 + $0xda] sm:$0xff]  ;;  %v1510_v55 = vadd.f32 %v4954_v4, %v5973_v34 }
 0x366   : > { %1976 = vst [vmem:[#allocation2 + $0x171] sm:$0xff] %v5168_v17  ;;  %2711 = vmatmul.f32.gmra.mxu3 %v2061_v13 }
 0x367   : > { %2521 = vmatmul.f32.gmra.mxu1 %v5170_v9  ;;  %v1733_v54 = vadd.f32 %v5120_v30, %v1620_v58 }
 0x368   : > { %v5177_v25 = vpop.f32.mrf.mxu0 }
 0x369   : > { %v1846_v43 = vadd.f32 %v5124_v52, %v1733_v54  ;;  %2589 = vmatmul.f32.gmra.mxu2 %v4948_v6  ;;  %v2664_v52 = vpop.f32.mrf.mxu3  ;;  %v5192_v6 = vld [vmem:[%s5906_s4] ss:$0 sm:$0xff]  ;;  %v2376_v54 = vld [vmem:[#allocation8 + $0x368] sm:$0xff] }
 0x36a   : > { %3095 = vmatpush.msra.mxu3 %v2376_v54  ;;  %v2433_v12 = vadd.f32 %v5192_v6, %v4971_v57  ;;  %v2063_v57 = vld [vmem:[#allocation2 + $0xf2] sm:$0xff] }
 0x36b   : > { %vm1881_vm14 = vcmp.ge.f32.partialorder %v1846_v43, 0.0  ;;  %v1913_v49 = vmul.f32 0.2, %v1846_v43  ;;  %2821 = vmatmul.f32.gmra.mxu0 %v5014_v61 }
 0x36c   : > { %v5183_v30 = vpop.f32.mrf.mxu1  ;;  %v1622_v35 = vpop.f32.mrf.mxu2 }
 0x36d   : > { %v1945_v58 = vsel %vm1881_vm14, %v1846_v43, %v1913_v49  ;;  %v1623_v46 = vadd.f32 %v1622_v35, %v1510_v55  ;;  %v5186_v19 = vld [vmem:[#allocation2 + $0x170] sm:$0xff]  ;;  %v2062_v43 = vld [vmem:[#allocation2 + $0xe2] sm:$0xff] }
 0x36e   : > { %1977 = vst [vmem:[#allocation2 + $0x181] sm:$0xff] %v1945_v58  ;;  %2714 = vmatmul.f32.gmra.mxu3 %v2062_v43  ;;  %v2107_v58 = vld [vmem:[#allocation2 + $0x19] sm:$0xff]  ;;  %v2359_v43 = vld [vmem:[#allocation8 + $0x2e0] sm:$0xff] }
 0x36f   : > { %2524 = vmatmul.f32.gmra.mxu1 %v5186_v19  ;;  %v1736_v4 = vadd.f32 %v5136_v5, %v1623_v46  ;;  %2983 = vmatpush.msra.mxu2 %v2359_v43  ;;  %v2391_v43 = vld [vmem:[#allocation8 + $0x3e0] sm:$0xff] }
 0x370   : > { %v5195_v13 = vpop.f32.mrf.mxu0 }
 0x371   : > { %v1849_v61 = vadd.f32 %v5141_v21, %v1736_v4  ;;  %2592 = vmatmul.f32.gmra.mxu2 %v4962_v26  ;;  %v2667_v46 = vpop.f32.mrf.mxu3  ;;  %v2392_v21 = vld [vmem:[#allocation8 + $0x3e8] sm:$0xff] }
 0x372   : > { %v2408_v4 = vld [vmem:[#allocation8 + $0x468] sm:$0xff]  ;;  %3208 = vmatpush.msra.mxu0 %v2392_v21 }
 0x373   : > { %vm1882_vm15 = vcmp.ge.f32.partialorder %v1849_v61, 0.0  ;;  %v1914_v34 = vmul.f32 0.2, %v1849_v61  ;;  %2824 = vmatmul.f32.gmra.mxu0 %v5026_v10  ;;  %3321 = vmatpush.msra.mxu1 %v2408_v4 }
 0x374   : > { %v5201_v55 = vpop.f32.mrf.mxu1  ;;  %v2545_v5 = vpop.f32.mrf.mxu2  ;;  %3209 = vmatpush.msra.mxu0 %v2391_v43 }
 0x375   : > { %v1946_v49 = vsel %vm1882_vm15, %v1849_v61, %v1914_v34  ;;  %v2546_v35 = vadd.f32 %v2545_v5, %v2433_v12  ;;  %v2436_v61 = vadd.f32 %v5192_v6, %v4982_v53  ;;  %v2108_v5 = vld [vmem:[#allocation2 + $0x21] sm:$0xff]  ;;  %v2439_v53 = vadd.f32 %v5192_v6, %v4996_v15  ;;  %v2065_v15 = vld [vmem:[#allocation2 + $0x10a] sm:$0xff] }
 0x376   : > { %1978 = vst [vmem:[#allocation2 + $0x189] sm:$0xff] %v1946_v49  ;;  %2717 = vmatmul.f32.gmra.mxu3 %v2063_v57 }
 0x377   : > { %2883 = vmatmul.f32.vlgmr.msrb.gmra.mxu1 %v2107_v58  ;;  %v2659_v26 = vadd.f32 %v5154_v11, %v2546_v35  ;;  %v2375_v35 = vld [vmem:[#allocation8 + $0x360] sm:$0xff] }
 0x378   : > { %v2780_v54 = vpop.f32.mrf.mxu0  ;;  %3096 = vmatpush.msra.mxu3 %v2375_v35  ;;  %v5236_v35 = vld [vmem:[#allocation2 + $0x39] sm:$0xff] }
 0x379   : > { %2595 = vmatmul.f32.gmra.mxu2 %v4976_v0  ;;  %v5207_v10 = vadd.f32 %v5159_v27, %v2659_v26  ;;  %v2670_v49 = vpop.f32.mrf.mxu3  ;;  %v2064_v27 = vld [vmem:[#allocation2 + $0xfa] sm:$0xff] }
 0x37b   : > { %2827 = vmatmul.f32.gmra.mxu0 %v5038_v2 }
 0x37c   : > { %v5211_v12 = vpop.f32.mrf.mxu1  ;;  %v2548_v11 = vpop.f32.mrf.mxu2 }
 0x37d   : > { %v2549_v34 = vadd.f32 %v2548_v11, %v2436_v61  ;;  %v2407_v61 = vld [vmem:[#allocation8 + $0x460] sm:$0xff]  ;;  %v2358_v11 = vld [vmem:[#allocation8 + $0x2d8] sm:$0xff] }
 0x37e   : > { %2720 = vmatmul.f32.gmra.mxu3 %v2064_v27  ;;  %3322 = vmatpush.msra.mxu1 %v2407_v61  ;;  %v5247_v61 = vld [vmem:[#allocation2 + $0x49] sm:$0xff] }
 0x37f   : > { %2886 = vmatmul.f32.gmra.mxu1 %v2108_v5  ;;  %v2662_v0 = vadd.f32 %v5172_v24, %v2549_v34  ;;  %v5224_v24 = vld [vmem:[#allocation2 + $0x31] sm:$0xff]  ;;  %2984 = vmatpush.msra.mxu2 %v2358_v11  ;;  %v2406_v11 = vld [vmem:[#allocation8 + $0x458] sm:$0xff] }
 0x380   : > { %v2783_v58 = vpop.f32.mrf.mxu0  ;;  %3323 = vmatpush.msra.mxu1 %v2406_v11  ;;  %v5269_v11 = vld [vmem:[#allocation2 + $0x61] sm:$0xff] }
 0x381   : > { %2598 = vmatmul.f32.gmra.mxu2 %v4987_v39  ;;  %v5217_v26 = vadd.f32 %v5177_v25, %v2662_v0  ;;  %v2673_v57 = vpop.f32.mrf.mxu3 }
 0x383   : > { %2830 = vmatmul.f32.gmra.mxu0 %v5050_v1  ;;  %v2442_v1 = vadd.f32 %v5192_v6, %v5009_v50  ;;  %v2445_v50 = vadd.f32 %v5192_v6, %v5021_v40  ;;  %v2067_v40 = vld [vmem:[#allocation2 + $0x122] sm:$0xff] }
 0x384   : > { %v5221_v2 = vpop.f32.mrf.mxu1  ;;  %v2551_v21 = vpop.f32.mrf.mxu2 }
 0x385   : > { %v2552_v4 = vadd.f32 %v2551_v21, %v2439_v53  ;;  %v2374_v53 = vld [vmem:[#allocation8 + $0x358] sm:$0xff]  ;;  %v2066_v21 = vld [vmem:[#allocation2 + $0x112] sm:$0xff] }
 0x386   : > { %2723 = vmatmul.f32.gmra.mxu3 %v2065_v15 }
 0x387   : > { %2889 = vmatmul.f32.gmra.mxu1 %v5224_v24  ;;  %v2665_v39 = vadd.f32 %v2664_v52, %v2552_v4  ;;  %3097 = vmatpush.msra.mxu3 %v2374_v53  ;;  %v5258_v53 = vld [vmem:[#allocation2 + $0x51] sm:$0xff] }
 0x388   : > { %v2786_v25 = vpop.f32.mrf.mxu0 }
 0x389   : > { %2601 = vmatmul.f32.gmra.mxu2 %v4999_v47  ;;  %v5229_v34 = vadd.f32 %v5195_v13, %v2665_v39  ;;  %v2676_v27 = vpop.f32.mrf.mxu3 }
 0x38b   : > { %2833 = vmatmul.f32.gmra.mxu0 %v5062_v45 }
 0x38c   : > { %v5233_v5 = vpop.f32.mrf.mxu1  ;;  %v2554_v52 = vpop.f32.mrf.mxu2 }
 0x38d   : > { %v2555_v0 = vadd.f32 %v2554_v52, %v2442_v1  ;;  %v2357_v1 = vld [vmem:[#allocation8 + $0x2d0] sm:$0xff] }
 0x38e   : > { %2726 = vmatmul.f32.gmra.mxu3 %v2066_v21  ;;  %2985 = vmatpush.msra.mxu2 %v2357_v1  ;;  %v2405_v1 = vld [vmem:[#allocation8 + $0x450] sm:$0xff] }
 0x38f   : > { %2892 = vmatmul.f32.gmra.mxu1 %v5236_v35  ;;  %v2668_v47 = vadd.f32 %v2667_v46, %v2555_v0 }
 0x390   : > { %v2789_v13 = vpop.f32.mrf.mxu0  ;;  %3324 = vmatpush.msra.mxu1 %v2405_v1 }
 0x391   : > { %2604 = vmatmul.f32.gmra.mxu2 %v5012_v62  ;;  %v5240_v4 = vadd.f32 %v2780_v54, %v2668_v47  ;;  %v2679_v46 = vpop.f32.mrf.mxu3  ;;  %v2390_v62 = vld [vmem:[#allocation8 + $0x3d8] sm:$0xff] }
 0x392   : > { %3210 = vmatpush.msra.mxu0 %v2390_v62 }
 0x393   : > { %2836 = vmatmul.f32.gmra.mxu0 %v5074_v3  ;;  %v2448_v3 = vadd.f32 %v5192_v6, %v5033_v59  ;;  %v2451_v59 = vadd.f32 %v5192_v6, %v5045_v22  ;;  %v2069_v22 = vld [vmem:[#allocation2 + $0x13a] sm:$0xff] }
 0x394   : > { %v5244_v45 = vpop.f32.mrf.mxu1  ;;  %v2557_v39 = vpop.f32.mrf.mxu2 }
 0x395   : > { %v2558_v43 = vadd.f32 %v2557_v39, %v2445_v50  ;;  %v2373_v50 = vld [vmem:[#allocation8 + $0x350] sm:$0xff]  ;;  %v2068_v39 = vld [vmem:[#allocation2 + $0x12a] sm:$0xff] }
 0x396   : > { %2729 = vmatmul.f32.gmra.mxu3 %v2067_v40 }
 0x397   : > { %2895 = vmatmul.f32.gmra.mxu1 %v5247_v61  ;;  %v2671_v15 = vadd.f32 %v2670_v49, %v2558_v43  ;;  %3098 = vmatpush.msra.mxu3 %v2373_v50  ;;  %v5282_v50 = vld [vmem:[#allocation2 + $0x69] sm:$0xff] }
 0x398   : > { %v2792_v54 = vpop.f32.mrf.mxu0 }
 0x399   : > { %2607 = vmatmul.f32.gmra.mxu2 %v5024_v48  ;;  %v5251_v52 = vadd.f32 %v2783_v58, %v2671_v15  ;;  %v2682_v21 = vpop.f32.mrf.mxu3 }
 0x39b   : > { %2839 = vmatmul.f32.gmra.mxu0 %v5086_v28 }
 0x39c   : > { %v5255_v0 = vpop.f32.mrf.mxu1  ;;  %v2560_v49 = vpop.f32.mrf.mxu2 }
 0x39d   : > { %v2561_v47 = vadd.f32 %v2560_v49, %v2448_v3  ;;  %v2356_v3 = vld [vmem:[#allocation8 + $0x2c8] sm:$0xff] }
 0x39e   : > { %2732 = vmatmul.f32.gmra.mxu3 %v2068_v39  ;;  %2986 = vmatpush.msra.mxu2 %v2356_v3 }
 0x39f   : > { %2898 = vmatmul.f32.gmra.mxu1 %v5258_v53  ;;  %v2674_v48 = vadd.f32 %v2673_v57, %v2561_v47 }
 0x3a0   : > { %v2795_v58 = vpop.f32.mrf.mxu0 }
 0x3a1   : > { %2610 = vmatmul.f32.gmra.mxu2 %v5036_v36  ;;  %v5262_v43 = vadd.f32 %v2786_v25, %v2674_v48  ;;  %v2685_v57 = vpop.f32.mrf.mxu3  ;;  %v2389_v36 = vld [vmem:[#allocation8 + $0x3d0] sm:$0xff] }
 0x3a2   : > { %3211 = vmatpush.msra.mxu0 %v2389_v36 }
 0x3a3   : > { %2842 = vmatmul.f32.gmra.mxu0 %v5102_v8  ;;  %v2454_v8 = vadd.f32 %v5192_v6, %v5057_v18 }
 0x3a4   : > { %v5266_v28 = vpop.f32.mrf.mxu1  ;;  %v2563_v15 = vpop.f32.mrf.mxu2 }
 0x3a5   : > { %v2564_v62 = vadd.f32 %v2563_v15, %v2451_v59  ;;  %v2372_v59 = vld [vmem:[#allocation8 + $0x348] sm:$0xff]  ;;  %v2070_v15 = vld [vmem:[#allocation2 + $0x142] sm:$0xff] }
 0x3a6   : > { %2735 = vmatmul.f32.gmra.mxu3 %v2069_v22  ;;  %v2388_v22 = vld [vmem:[#allocation8 + $0x3c8] sm:$0xff] }
 0x3a7   : > { %2901 = vmatmul.f32.gmra.mxu1 %v5269_v11  ;;  %v2677_v40 = vadd.f32 %v2676_v27, %v2564_v62  ;;  %3099 = vmatpush.msra.mxu3 %v2372_v59  ;;  %v5310_v59 = vld [vmem:[#allocation2 + $0x81] sm:$0xff] }
 0x3a8   : > { %v5272_v25 = vpop.f32.mrf.mxu0  ;;  %3212 = vmatpush.msra.mxu0 %v2388_v22 }
 0x3a9   : > { %2613 = vmatmul.f32.gmra.mxu2 %v5048_v56  ;;  %v5275_v49 = vadd.f32 %v2789_v13, %v2677_v40  ;;  %v2688_v39 = vpop.f32.mrf.mxu3 }
 0x3ab   : > { %2845 = vmatmul.f32.gmra.mxu0 %v5118_v51  ;;  %v2457_v51 = vadd.f32 %v5192_v6, %v5069_v20  ;;  %v2071_v20 = vld [vmem:[#allocation2 + $0x152] sm:$0xff] }
 0x3ac   : > { %v5279_v47 = vpop.f32.mrf.mxu1  ;;  %v2566_v27 = vpop.f32.mrf.mxu2 }
 0x3ad   : > { %v2567_v48 = vadd.f32 %v2566_v27, %v2454_v8  ;;  %v2355_v8 = vld [vmem:[#allocation8 + $0x2c0] sm:$0xff]  ;;  %v2460_v27 = vadd.f32 %v5192_v6, %v5081_v33  ;;  %v2354_v33 = vld [vmem:[#allocation8 + $0x2b8] sm:$0xff] }
 0x3ae   : > { %2738 = vmatmul.f32.gmra.mxu3 %v2070_v15  ;;  %2987 = vmatpush.msra.mxu2 %v2355_v8 }
 0x3af   : > { %2904 = vmatmul.f32.gmra.mxu1 %v5282_v50  ;;  %v2680_v56 = vadd.f32 %v2679_v46, %v2567_v48  ;;  %v5295_v46 = vld [vmem:[#allocation2 + $0x79] sm:$0xff] }
 0x3b0   : > { %v5285_v13 = vpop.f32.mrf.mxu0  ;;  %2988 = vmatpush.msra.mxu2 %v2354_v33  ;;  %v2403_v33 = vld [vmem:[#allocation8 + $0x440] sm:$0xff] }
 0x3b1   : > { %2616 = vmatmul.f32.gmra.mxu2 %v5060_v37  ;;  %v5288_v18 = vadd.f32 %v2792_v54, %v2680_v56  ;;  %v5297_v1 = vpop.f32.mrf.mxu3  ;;  %v2404_v54 = vld [vmem:[#allocation8 + $0x448] sm:$0xff] }
 0x3b2   : > { %3325 = vmatpush.msra.mxu1 %v2404_v54 }
 0x3b3   : > { %2848 = vmatmul.f32.gmra.mxu0 %v5134_v14 }
 0x3b4   : > { %v5292_v62 = vpop.f32.mrf.mxu1  ;;  %v2569_v40 = vpop.f32.mrf.mxu2  ;;  %3326 = vmatpush.msra.mxu1 %v2403_v33  ;;  %v2074_v33 = vld [vmem:[#allocation2 + $0x172] sm:$0xff] }
 0x3b5   : > { %v2570_v36 = vadd.f32 %v2569_v40, %v2457_v51  ;;  %v2387_v51 = vld [vmem:[#allocation8 + $0x3c0] sm:$0xff] }
 0x3b6   : > { %2741 = vmatmul.f32.gmra.mxu3 %v2071_v20  ;;  %3213 = vmatpush.msra.mxu0 %v2387_v51  ;;  %v2073_v51 = vld [vmem:[#allocation2 + $0x16a] sm:$0xff] }
 0x3b7   : > { %2907 = vmatmul.f32.gmra.mxu1 %v5295_v46  ;;  %v2683_v37 = vadd.f32 %v2682_v21, %v2570_v36  ;;  %v2072_v36 = vld [vmem:[#allocation2 + $0x15a] sm:$0xff] }
 0x3b8   : > { %v5300_v3 = vpop.f32.mrf.mxu0 }
 0x3b9   : > { %2619 = vmatmul.f32.gmra.mxu2 %v5072_v60  ;;  %v5303_v14 = vadd.f32 %v2795_v58, %v2683_v37  ;;  %v5312_v15 = vpop.f32.mrf.mxu3  ;;  %v2371_v58 = vld [vmem:[#allocation8 + $0x340] sm:$0xff]  ;;  %v2386_v37 = vld [vmem:[#allocation8 + $0x3b8] sm:$0xff] }
 0x3ba   : > { %3100 = vmatpush.msra.mxu3 %v2371_v58  ;;  %3214 = vmatpush.msra.mxu0 %v2386_v37  ;;  %v2367_v37 = vld [vmem:[#allocation8 + $0x320] sm:$0xff] }
 0x3bb   : > { %2851 = vmatmul.f32.gmra.mxu0 %v5152_v44  ;;  %v2370_v44 = vld [vmem:[#allocation8 + $0x338] sm:$0xff] }
 0x3bc   : > { %v5307_v48 = vpop.f32.mrf.mxu1  ;;  %v2572_v21 = vpop.f32.mrf.mxu2  ;;  %3101 = vmatpush.msra.mxu3 %v2370_v44 }
 0x3bd   : > { %v2573_v56 = vadd.f32 %v2572_v21, %v2460_v27  ;;  %v2353_v21 = vld [vmem:[#allocation8 + $0x2b0] sm:$0xff] }
 0x3be   : > { %2744 = vmatmul.f32.gmra.mxu3 %v2072_v36  ;;  %2989 = vmatpush.msra.mxu2 %v2353_v21  ;;  %v2384_v36 = vld [vmem:[#allocation8 + $0x3a8] sm:$0xff]  ;;  %v2350_v21 = vld [vmem:[#allocation8 + $0x298] sm:$0xff] }
 0x3bf   : > { %2910 = vmatmul.f32.gmra.mxu1 %v5310_v59  ;;  %v2686_v60 = vadd.f32 %v2685_v57, %v2573_v56  ;;  %v2463_v57 = vadd.f32 %v5192_v6, %v5097_v31  ;;  %v2369_v56 = vld [vmem:[#allocation8 + $0x330] sm:$0xff]  ;;  %v2352_v31 = vld [vmem:[#allocation8 + $0x2a8] sm:$0xff] }
 0x3c0   : > { %v5315_v40 = vpop.f32.mrf.mxu0  ;;  %3102 = vmatpush.msra.mxu3 %v2369_v56  ;;  %2990 = vmatpush.msra.mxu2 %v2352_v31  ;;  %v2366_v56 = vld [vmem:[#allocation8 + $0x318] sm:$0xff] }
 0x3c1   : > { %2622 = vmatmul.f32.gmra.mxu2 %v5084_v38  ;;  %v5319_v22 = vadd.f32 %v5272_v25, %v2686_v60  ;;  %v5326_v38 = vld [vmem:[#allocation2 + $0x91] sm:$0xff]  ;;  %v5328_v27 = vpop.f32.mrf.mxu3  ;;  %v2385_v60 = vld [vmem:[#allocation8 + $0x3b0] sm:$0xff]  ;;  %v2382_v31 = vld [vmem:[#allocation8 + $0x398] sm:$0xff] }
 0x3c2   : > { %3215 = vmatpush.msra.mxu0 %v2385_v60 }
 0x3c3   : > { %5974 = vst [vmem:[#allocation13_spill] sm:$0xff] %v5319_v22  ;;  %2854 = vmatmul.f32.gmra.mxu0 %v5170_v9  ;;  %v2368_v9 = vld [vmem:[#allocation8 + $0x328] sm:$0xff]  ;;  %v5510_v22 = vld [vmem:[#allocation2 + $0x82] sm:$0xff] }
 0x3c4   : > { %v5323_v54 = vpop.f32.mrf.mxu1  ;;  %v2575_v20 = vpop.f32.mrf.mxu2  ;;  %3103 = vmatpush.msra.mxu3 %v2368_v9  ;;  %3216 = vmatpush.msra.mxu0 %v2384_v36  ;;  %v2365_v9 = vld [vmem:[#allocation8 + $0x310] sm:$0xff]  ;;  %v2364_v36 = vld [vmem:[#allocation8 + $0x308] sm:$0xff] }
 0x3c5   : > { %v2576_v8 = vadd.f32 %v2575_v20, %v2463_v57  ;;  %v2466_v57 = vadd.f32 %v5192_v6, %v5113_v16 }
 0x3c6   : > { %2747 = vmatmul.f32.gmra.mxu3 %v2073_v51 }
 0x3c7   : > { %2913 = vmatmul.f32.gmra.mxu1 %v5326_v38  ;;  %v2689_v25 = vadd.f32 %v2688_v39, %v2576_v8  ;;  %v2351_v39 = vld [vmem:[#allocation8 + $0x2a0] sm:$0xff]  ;;  %3104 = vmatpush.msra.mxu3 %v2367_v37  ;;  %v2348_v37 = vld [vmem:[#allocation8 + $0x288] sm:$0xff] }
 0x3c8   : > { %v5331_v58 = vpop.f32.mrf.mxu0  ;;  %2991 = vmatpush.msra.mxu2 %v2351_v39  ;;  %v2381_v39 = vld [vmem:[#allocation8 + $0x390] sm:$0xff] }
 0x3c9   : > { %2625 = vmatmul.f32.gmra.mxu2 %v5100_v7  ;;  %v5335_v44 = vadd.f32 %v5285_v13, %v2689_v25  ;;  %v2383_v7 = vld [vmem:[#allocation8 + $0x3a0] sm:$0xff]  ;;  %v5342_v25 = vld [vmem:[#allocation2 + $0x99] sm:$0xff]  ;;  %v5344_v60 = vpop.f32.mrf.mxu3  ;;  %3105 = vmatpush.msra.mxu3 %v2366_v56 }
 0x3ca   : > { %3217 = vmatpush.msra.mxu0 %v2383_v7  ;;  %2992 = vmatpush.msra.mxu2 %v2350_v21  ;;  %v2105_v7 = vld [vmem:[#allocation2 + $0x180] sm:$0xff]  ;;  %v2380_v56 = vld [vmem:[#allocation8 + $0x388] sm:$0xff] }
 0x3cb   : > { %5975 = vst [vmem:[#allocation22_spill] sm:$0xff] %v5335_v44  ;;  %2857 = vmatmul.f32.gmra.mxu0 %v5186_v19  ;;  %v2349_v19 = vld [vmem:[#allocation8 + $0x290] sm:$0xff]  ;;  %3106 = vmatpush.msra.mxu3 %v2365_v9  ;;  %v5358_v9 = vld [vmem:[#allocation2 + $0xa9] sm:$0xff]  ;;  %v2396_v44 = vld [vmem:[#allocation8 + $0x408] sm:$0xff] }
 0x3cc   : > { %v5339_v20 = vpop.f32.mrf.mxu1  ;;  %v2578_v8 = vpop.f32.mrf.mxu2  ;;  %3218 = vmatpush.msra.mxu0 %v2382_v31  ;;  %2993 = vmatpush.msra.mxu2 %v2349_v19  ;;  %v2402_v19 = vld [vmem:[#allocation8 + $0x438] sm:$0xff] }
 0x3cd   : > { %v2579_v13 = vadd.f32 %v2578_v8, %v2466_v57  ;;  %v2469_v8 = vadd.f32 %v5192_v6, %v5129_v41  ;;  %3107 = vmatpush.msra.mxu3 %v2364_v36  ;;  %3327 = vmatpush.msra.mxu1 %v2402_v19  ;;  %v2171_v36 = vld [vmem:[#allocation2 + $0x30] sm:$0xff] }
 0x3ce   : > { %2750 = vmatmul.f32.gmra.mxu3 %v2074_v33  ;;  %3219 = vmatpush.msra.mxu0 %v2381_v39 }
 0x3cf   : > { %2916 = vmatmul.f32.gmra.mxu1 %v5342_v25  ;;  %v2692_v16 = vadd.f32 %v5297_v1, %v2579_v13  ;;  %v2363_v1 = vld [vmem:[#allocation8 + $0x300] sm:$0xff]  ;;  %2994 = vmatpush.msra.mxu2 %v2348_v37  ;;  %v2106_v37 = vld [vmem:[#allocation2 + $0x188] sm:$0xff] }
 0x3d0   : > { %v5348_v51 = vpop.f32.mrf.mxu0  ;;  %v2347_v13 = vld [vmem:[#allocation8 + $0x280] sm:$0xff]  ;;  %3108 = vmatpush.msra.mxu3 %v2363_v1  ;;  %3220 = vmatpush.msra.mxu0 %v2380_v56 }
 0x3d1   : > { %2628 = vmatmul.f32.gmra.mxu2 %v5116_v63  ;;  %v5352_v57 = vadd.f32 %v5300_v3, %v2692_v16  ;;  %v2703_v3 = vpop.f32.mrf.mxu3  ;;  %v2379_v16 = vld [vmem:[#allocation8 + $0x380] sm:$0xff] }
 0x3d2   : > { %2995 = vmatpush.msra.mxu2 %v2347_v13  ;;  %3221 = vmatpush.msra.mxu0 %v2379_v16  ;;  %v5370_v56 = vld [vmem:[#allocation2 + $0xb1] sm:$0xff] }
 0x3d3   : > { %5976 = vst [vmem:[#allocation25_spill] sm:$0xff] %v5352_v57  ;;  %2860 = vmatmul.f32.gmra.mxu0 %v2105_v7  ;;  %v2472_v7 = vadd.f32 %v5192_v6, %v5147_v42  ;;  %v2475_v42 = vadd.f32 %v5192_v6, %v5165_v23  ;;  %v5484_v57 = vld [vmem:[#allocation2 + $0x6a] sm:$0xff] }
 0x3d4   : > { %v5356_v21 = vpop.f32.mrf.mxu1  ;;  %v2581_v63 = vpop.f32.mrf.mxu2 }
 0x3d5   : > { %v2582_v31 = vadd.f32 %v2581_v63, %v2469_v8 }
 0x3d6   : > { %3109 = vmatmul.f32.vlgmr.msra.gmra.mxu3 %v2171_v36  ;;  %v5383_v36 = vld [vmem:[#allocation2 + $0xc1] sm:$0xff] }
 0x3d7   : > { %2919 = vmatmul.f32.gmra.mxu1 %v5358_v9  ;;  %v2695_v41 = vadd.f32 %v5312_v15, %v2582_v31 }
 0x3d8   : > { %v2816_v33 = vpop.f32.mrf.mxu0 }
 0x3d9   : > { %2631 = vmatmul.f32.gmra.mxu2 %v5132_v29  ;;  %v5364_v39 = vadd.f32 %v5315_v40, %v2695_v41  ;;  %v2706_v63 = vpop.f32.mrf.mxu3  ;;  %v2172_v40 = vld [vmem:[#allocation2 + $0x38] sm:$0xff] }
 0x3db   : > { %5977 = vst [vmem:[#allocation14_spill] sm:$0xff] %v5364_v39  ;;  %2863 = vmatmul.f32.gmra.mxu0 %v2106_v37  ;;  %v2401_v37 = vld [vmem:[#allocation8 + $0x430] sm:$0xff] }
 0x3dc   : > { %v5368_v1 = vpop.f32.mrf.mxu1  ;;  %v2584_v15 = vpop.f32.mrf.mxu2  ;;  %3328 = vmatpush.msra.mxu1 %v2401_v37  ;;  %v2397_v39 = vld [vmem:[#allocation8 + $0x410] sm:$0xff] }
 0x3dd   : > { %v2585_v8 = vadd.f32 %v2584_v15, %v2472_v7  ;;  %v2173_v7 = vld [vmem:[#allocation2 + $0x48] sm:$0xff] }
 0x3de   : > { %3112 = vmatmul.f32.gmra.mxu3 %v2172_v40 }
 0x3df   : > { %2922 = vmatmul.f32.gmra.mxu1 %v5370_v56  ;;  %v2698_v29 = vadd.f32 %v5328_v27, %v2585_v8 }
 0x3e0   : > { %v2819_v13 = vpop.f32.mrf.mxu0 }
 0x3e1   : > { %2634 = vmatmul.f32.gmra.mxu2 %v5150_v32  ;;  %v5376_v31 = vadd.f32 %v5331_v58, %v2698_v29  ;;  %v2709_v27 = vpop.f32.mrf.mxu3 }
 0x3e3   : > { %5978 = vst [vmem:[#allocation23_spill] sm:$0xff] %v5376_v31  ;;  %3222 = vmatmul.f32.vlgmr.msra.gmra.mxu0 %v5224_v24  ;;  %v2478_v24 = vadd.f32 %v5192_v6, %v5183_v30  ;;  %v2481_v30 = vadd.f32 %v5192_v6, %v5201_v55  ;;  %v2484_v55 = vadd.f32 %v5192_v6, %v5211_v12  ;;  %v5458_v31 = vld [vmem:[#allocation2 + $0x52] sm:$0xff] }
 0x3e4   : > { %v5380_v16 = vpop.f32.mrf.mxu1  ;;  %v2587_v41 = vpop.f32.mrf.mxu2  ;;  %v2487_v12 = vadd.f32 %v5192_v6, %v5221_v2  ;;  %v2177_v2 = vld [vmem:[#allocation2 + $0x78] sm:$0xff] }
 0x3e5   : > { %v2588_v19 = vadd.f32 %v2587_v41, %v2475_v42  ;;  %v2139_v42 = vld [vmem:[#allocation2 + $0x1a] sm:$0xff] }
 0x3e6   : > { %3115 = vmatmul.f32.gmra.mxu3 %v2173_v7  ;;  %v5406_v7 = vld [vmem:[#allocation2 + $0xd9] sm:$0xff] }
 0x3e7   : > { %2925 = vmatmul.f32.gmra.mxu1 %v5383_v36  ;;  %v2701_v32 = vadd.f32 %v5344_v60, %v2588_v19  ;;  %v5396_v60 = vld [vmem:[#allocation2 + $0xc9] sm:$0xff] }
 0x3e8   : > { %v2822_v58 = vpop.f32.mrf.mxu0 }
 0x3e9   : > { %2637 = vmatmul.f32.gmra.mxu2 %v5168_v17  ;;  %v5389_v23 = vadd.f32 %v5348_v51, %v2701_v32  ;;  %v2712_v40 = vpop.f32.mrf.mxu3  ;;  %v2174_v51 = vld [vmem:[#allocation2 + $0x50] sm:$0xff] }
 0x3eb   : > { %5979 = vst [vmem:[#allocation15_spill] sm:$0xff] %v5389_v23  ;;  %3225 = vmatmul.f32.gmra.mxu0 %v5236_v35  ;;  %v2398_v23 = vld [vmem:[#allocation8 + $0x418] sm:$0xff] }
 0x3ec   : > { %v5393_v15 = vpop.f32.mrf.mxu1  ;;  %v2590_v8 = vpop.f32.mrf.mxu2 }
 0x3ed   : > { %v2591_v29 = vadd.f32 %v2590_v8, %v2478_v24  ;;  %v2400_v8 = vld [vmem:[#allocation8 + $0x428] sm:$0xff] }
 0x3ee   : > { %3118 = vmatmul.f32.gmra.mxu3 %v2174_v51  ;;  %3329 = vmatpush.msra.mxu1 %v2400_v8  ;;  %v5419_v8 = vld [vmem:[#allocation2 + $0x32] sm:$0xff] }
 0x3ef   : > { %2928 = vmatmul.f32.gmra.mxu1 %v5396_v60  ;;  %v2704_v17 = vadd.f32 %v2703_v3, %v2591_v29  ;;  %v2140_v29 = vld [vmem:[#allocation2 + $0x22] sm:$0xff] }
 0x3f0   : > { %v2825_v41 = vpop.f32.mrf.mxu0 }
 0x3f1   : > { %2996 = vmatmul.f32.vlgmr.msra.gmra.mxu2 %v2139_v42  ;;  %v5399_v19 = vadd.f32 %v2816_v33, %v2704_v17  ;;  %v2715_v24 = vpop.f32.mrf.mxu3  ;;  %v2175_v17 = vld [vmem:[#allocation2 + $0x60] sm:$0xff] }
 0x3f3   : > { %5980 = vst [vmem:[#allocation24_spill] sm:$0xff] %v5399_v19  ;;  %3228 = vmatmul.f32.gmra.mxu0 %v5247_v61  ;;  %v5432_v19 = vld [vmem:[#allocation2 + $0x3a] sm:$0xff] }
 0x3f4   : > { %v5403_v32 = vpop.f32.mrf.mxu1  ;;  %v2593_v35 = vpop.f32.mrf.mxu2 }
 0x3f5   : > { %v2594_v37 = vadd.f32 %v2593_v35, %v2481_v30  ;;  %v5416_v35 = vld [vmem:[#allocation2 + $0xe1] sm:$0xff] }
 0x3f6   : > { %3121 = vmatmul.f32.gmra.mxu3 %v2175_v17 }
 0x3f7   : > { %2931 = vmatmul.f32.gmra.mxu1 %v5406_v7  ;;  %v2707_v3 = vadd.f32 %v2706_v63, %v2594_v37 }
 0x3f8   : > { %v2828_v33 = vpop.f32.mrf.mxu0 }
 0x3f9   : > { %2999 = vmatmul.f32.gmra.mxu2 %v2140_v29  ;;  %v5409_v42 = vadd.f32 %v2819_v13, %v2707_v3  ;;  %v2718_v63 = vpop.f32.mrf.mxu3  ;;  %v2176_v3 = vld [vmem:[#allocation2 + $0x68] sm:$0xff] }
 0x3fb   : > { %5981 = vst [vmem:[#allocation27_spill] sm:$0xff] %v5409_v42  ;;  %3231 = vmatmul.f32.gmra.mxu0 %v5258_v53  ;;  %v2399_v42 = vld [vmem:[#allocation8 + $0x420] sm:$0xff] }
 0x3fc   : > { %v5413_v61 = vpop.f32.mrf.mxu1  ;;  %v2596_v51 = vpop.f32.mrf.mxu2  ;;  %3330 = vmatpush.msra.mxu1 %v2399_v42 }
 0x3fd   : > { %v2597_v30 = vadd.f32 %v2596_v51, %v2484_v55  ;;  %v5429_v51 = vld [vmem:[#allocation2 + $0xf1] sm:$0xff] }
 0x3fe   : > { %3124 = vmatmul.f32.gmra.mxu3 %v2176_v3  ;;  %3331 = vmatpush.msra.mxu1 %v2398_v23 }
 0x3ff   : > { %2934 = vmatmul.f32.gmra.mxu1 %v5416_v35  ;;  %v2710_v37 = vadd.f32 %v2709_v27, %v2597_v30 }
 0x400   : > { %v2831_v13 = vpop.f32.mrf.mxu0  ;;  %3332 = vmatpush.msra.mxu1 %v2397_v39 }
 0x401   : > { %3002 = vmatmul.f32.gmra.mxu2 %v5419_v8  ;;  %v5422_v29 = vadd.f32 %v2822_v58, %v2710_v37  ;;  %v2721_v27 = vpop.f32.mrf.mxu3 }
 0x402   : > { %3333 = vmatpush.msra.mxu1 %v2396_v44 }
 0x403   : > { %5982 = vst [vmem:[#allocation16_spill] sm:$0xff] %v5422_v29  ;;  %3234 = vmatmul.f32.gmra.mxu0 %v5269_v11  ;;  %v2490_v11 = vadd.f32 %v5192_v6, %v5233_v5  ;;  %v5445_v29 = vld [vmem:[#allocation2 + $0x4a] sm:$0xff]  ;;  %v2493_v5 = vadd.f32 %v5192_v6, %v5244_v45 }
 0x404   : > { %v5426_v53 = vpop.f32.mrf.mxu1  ;;  %v2599_v17 = vpop.f32.mrf.mxu2  ;;  %v2179_v45 = vld [vmem:[#allocation2 + $0x90] sm:$0xff] }
 0x405   : > { %v2600_v55 = vadd.f32 %v2599_v17, %v2487_v12  ;;  %v5442_v17 = vld [vmem:[#allocation2 + $0xf9] sm:$0xff] }
 0x406   : > { %3127 = vmatmul.f32.gmra.mxu3 %v2177_v2 }
 0x407   : > { %2937 = vmatmul.f32.gmra.mxu1 %v5429_v51  ;;  %v2713_v30 = vadd.f32 %v2712_v40, %v2600_v55 }
 0x408   : > { %v2834_v58 = vpop.f32.mrf.mxu0 }
 0x409   : > { %3005 = vmatmul.f32.gmra.mxu2 %v5432_v19  ;;  %v5435_v37 = vadd.f32 %v2825_v41, %v2713_v30  ;;  %v2724_v55 = vpop.f32.mrf.mxu3  ;;  %v2178_v30 = vld [vmem:[#allocation2 + $0x80] sm:$0xff] }
 0x40b   : > { %5983 = vst [vmem:[#allocation26_spill] sm:$0xff] %v5435_v37  ;;  %3237 = vmatmul.f32.gmra.mxu0 %v5282_v50  ;;  %v5455_v37 = vld [vmem:[#allocation2 + $0x109] sm:$0xff] }
 0x40c   : > { %v5439_v3 = vpop.f32.mrf.mxu1  ;;  %v2602_v12 = vpop.f32.mrf.mxu2 }
 0x40d   : > { %v2603_v40 = vadd.f32 %v2602_v12, %v2490_v11 }
 0x40e   : > { %3130 = vmatmul.f32.gmra.mxu3 %v2178_v30 }
 0x40f   : > { %2940 = vmatmul.f32.gmra.mxu1 %v5442_v17  ;;  %v2716_v42 = vadd.f32 %v2715_v24, %v2603_v40 }
 0x410   : > { %v2837_v41 = vpop.f32.mrf.mxu0 }
 0x411   : > { %3008 = vmatmul.f32.gmra.mxu2 %v5445_v29  ;;  %v5448_v2 = vadd.f32 %v2828_v33, %v2716_v42  ;;  %v2727_v24 = vpop.f32.mrf.mxu3 }
 0x413   : > { %5984 = vst [vmem:[#allocation29_spill] sm:$0xff] %v5448_v2  ;;  %3240 = vmatmul.f32.gmra.mxu0 %v5295_v46  ;;  %v2496_v46 = vadd.f32 %v5192_v6, %v5255_v0  ;;  %v5471_v2 = vld [vmem:[#allocation2 + $0x62] sm:$0xff]  ;;  %v2499_v0 = vadd.f32 %v5192_v6, %v5266_v28 }
 0x414   : > { %v5452_v50 = vpop.f32.mrf.mxu1  ;;  %v2605_v11 = vpop.f32.mrf.mxu2  ;;  %v2181_v28 = vld [vmem:[#allocation2 + $0xa8] sm:$0xff] }
 0x415   : > { %v2606_v12 = vadd.f32 %v2605_v11, %v2493_v5  ;;  %v5468_v11 = vld [vmem:[#allocation2 + $0x111] sm:$0xff] }
 0x416   : > { %3133 = vmatmul.f32.gmra.mxu3 %v2179_v45 }
 0x417   : > { %2943 = vmatmul.f32.gmra.mxu1 %v5455_v37  ;;  %v2719_v40 = vadd.f32 %v2718_v63, %v2606_v12 }
 0x418   : > { %v2840_v33 = vpop.f32.mrf.mxu0 }
 0x419   : > { %3011 = vmatmul.f32.gmra.mxu2 %v5458_v31  ;;  %v5461_v42 = vadd.f32 %v2831_v13, %v2719_v40  ;;  %v2730_v12 = vpop.f32.mrf.mxu3  ;;  %v2180_v40 = vld [vmem:[#allocation2 + $0x98] sm:$0xff] }
 0x41b   : > { %5985 = vst [vmem:[#allocation17_spill] sm:$0xff] %v5461_v42  ;;  %3243 = vmatmul.f32.gmra.mxu0 %v5310_v59  ;;  %v5481_v42 = vld [vmem:[#allocation2 + $0x121] sm:$0xff] }
 0x41c   : > { %v5465_v30 = vpop.f32.mrf.mxu1  ;;  %v2608_v5 = vpop.f32.mrf.mxu2 }
 0x41d   : > { %v2609_v63 = vadd.f32 %v2608_v5, %v2496_v46 }
 0x41e   : > { %3136 = vmatmul.f32.gmra.mxu3 %v2180_v40 }
 0x41f   : > { %2946 = vmatmul.f32.gmra.mxu1 %v5468_v11  ;;  %v2722_v23 = vadd.f32 %v2721_v27, %v2609_v63 }
 0x420   : > { %v2843_v13 = vpop.f32.mrf.mxu0 }
 0x421   : > { %3014 = vmatmul.f32.gmra.mxu2 %v5471_v2  ;;  %v5474_v45 = vadd.f32 %v2834_v58, %v2722_v23  ;;  %v2733_v27 = vpop.f32.mrf.mxu3 }
 0x423   : > { %5986 = vst [vmem:[#allocation28_spill] sm:$0xff] %v5474_v45  ;;  %3246 = vmatmul.f32.gmra.mxu0 %v5326_v38  ;;  %v2502_v38 = vadd.f32 %v5192_v6, %v5279_v47  ;;  %v5497_v45 = vld [vmem:[#allocation2 + $0x7a] sm:$0xff]  ;;  %v2505_v47 = vadd.f32 %v5192_v6, %v5292_v62 }
 0x424   : > { %v5478_v59 = vpop.f32.mrf.mxu1  ;;  %v2611_v46 = vpop.f32.mrf.mxu2  ;;  %v2183_v62 = vld [vmem:[#allocation2 + $0xc0] sm:$0xff] }
 0x425   : > { %v2612_v5 = vadd.f32 %v2611_v46, %v2499_v0  ;;  %v5494_v46 = vld [vmem:[#allocation2 + $0x129] sm:$0xff] }
 0x426   : > { %3139 = vmatmul.f32.gmra.mxu3 %v2181_v28 }
 0x427   : > { %2949 = vmatmul.f32.gmra.mxu1 %v5481_v42  ;;  %v2725_v63 = vadd.f32 %v2724_v55, %v2612_v5 }
 0x428   : > { %v2846_v58 = vpop.f32.mrf.mxu0 }
 0x429   : > { %3017 = vmatmul.f32.gmra.mxu2 %v5484_v57  ;;  %v5487_v23 = vadd.f32 %v2837_v41, %v2725_v63  ;;  %v2736_v5 = vpop.f32.mrf.mxu3  ;;  %v2182_v63 = vld [vmem:[#allocation2 + $0xb0] sm:$0xff] }
 0x42b   : > { %5987 = vst [vmem:[#allocation18_spill] sm:$0xff] %v5487_v23  ;;  %3249 = vmatmul.f32.gmra.mxu0 %v5342_v25  ;;  %v5507_v23 = vld [vmem:[#allocation2 + $0x139] sm:$0xff] }
 0x42c   : > { %v5491_v40 = vpop.f32.mrf.mxu1  ;;  %v2614_v0 = vpop.f32.mrf.mxu2 }
 0x42d   : > { %v2615_v55 = vadd.f32 %v2614_v0, %v2502_v38 }
 0x42e   : > { %3142 = vmatmul.f32.gmra.mxu3 %v2182_v63 }
 0x42f   : > { %2952 = vmatmul.f32.gmra.mxu1 %v5494_v46  ;;  %v2728_v39 = vadd.f32 %v2727_v24, %v2615_v55 }
 0x430   : > { %v2849_v41 = vpop.f32.mrf.mxu0 }
 0x431   : > { %3020 = vmatmul.f32.gmra.mxu2 %v5497_v45  ;;  %v5500_v28 = vadd.f32 %v2840_v33, %v2728_v39  ;;  %v2739_v24 = vpop.f32.mrf.mxu3 }
 0x433   : > { %5988 = vst [vmem:[#allocation30_spill] sm:$0xff] %v5500_v28  ;;  %3252 = vmatmul.f32.gmra.mxu0 %v5358_v9  ;;  %v2508_v9 = vadd.f32 %v5192_v6, %v5307_v48 }
 0x434   : > { %v5504_v25 = vpop.f32.mrf.mxu1  ;;  %v2617_v38 = vpop.f32.mrf.mxu2 }
 0x435   : > { %v2618_v0 = vadd.f32 %v2617_v38, %v2505_v47  ;;  %v5520_v38 = vld [vmem:[#allocation2 + $0x141] sm:$0xff] }
 0x436   : > { %3145 = vmatmul.f32.gmra.mxu3 %v2183_v62 }
 0x437   : > { %2955 = vmatmul.f32.gmra.mxu1 %v5507_v23  ;;  %v2731_v55 = vadd.f32 %v2730_v12, %v2618_v0  ;;  %v5523_v0 = vld [vmem:[#allocation2 + $0x92] sm:$0xff] }
 0x438   : > { %v2852_v33 = vpop.f32.mrf.mxu0 }
 0x439   : > { %3023 = vmatmul.f32.gmra.mxu2 %v5510_v22  ;;  %v5513_v39 = vadd.f32 %v2843_v13, %v2731_v55  ;;  %v2742_v28 = vpop.f32.mrf.mxu3  ;;  %v2184_v13 = vld [vmem:[#allocation2 + $0xc8] sm:$0xff] }
 0x43b   : > { %5989 = vst [vmem:[#allocation19_spill] sm:$0xff] %v5513_v39  ;;  %3255 = vmatmul.f32.gmra.mxu0 %v5370_v56  ;;  %v2511_v56 = vadd.f32 %v5192_v6, %v5323_v54  ;;  %v2395_v39 = vld [vmem:[#allocation8 + $0x400] sm:$0xff]  ;;  %v3799_v54 = vld [vmem:[%s5906_s4] ss:$0 sm:$0xff] }
 0x43c   : > { %v5517_v63 = vpop.f32.mrf.mxu1  ;;  %v2620_v47 = vpop.f32.mrf.mxu2  ;;  %3334 = vmatpush.msra.mxu1 %v2395_v39 }
 0x43d   : > { %5990 = vst [vmem:[#allocation20_spill] sm:$0xff] %v5517_v63  ;;  %v2621_v12 = vadd.f32 %v2620_v47, %v2508_v9  ;;  %v5536_v63 = vld [vmem:[#allocation2 + $0x9a] sm:$0xff] }
 0x43e   : > { %3148 = vmatmul.f32.gmra.mxu3 %v2184_v13 }
 0x43f   : > { %2958 = vmatmul.f32.gmra.mxu1 %v5520_v38  ;;  %v2734_v44 = vadd.f32 %v2733_v27, %v2621_v12  ;;  %v5533_v27 = vld [vmem:[#allocation2 + $0x151] sm:$0xff] }
 0x440   : > { %v2855_v48 = vpop.f32.mrf.mxu0 }
 0x441   : > { %3026 = vmatmul.f32.gmra.mxu2 %v5523_v0  ;;  %v5526_v55 = vadd.f32 %v2846_v58, %v2734_v44  ;;  %v2185_v58 = vld [vmem:[#allocation2 + $0xd8] sm:$0xff]  ;;  %v2745_v6 = vpop.f32.mrf.mxu3 }
 0x443   : > { %5991 = vst [vmem:[#allocation21_spill] sm:$0xff] %v5526_v55  ;;  %3258 = vmatmul.f32.gmra.mxu0 %v5383_v36  ;;  %v2514_v36 = vadd.f32 %v3799_v54, %v5339_v20  ;;  %v2517_v20 = vadd.f32 %v3799_v54, %v5356_v21  ;;  %v5560_v55 = vld [vmem:[#allocation2 + $0x169] sm:$0xff]  ;;  %v2520_v21 = vadd.f32 %v3799_v54, %v5368_v1 }
 0x444   : > { %v5530_v62 = vpop.f32.mrf.mxu1  ;;  %v2623_v9 = vpop.f32.mrf.mxu2  ;;  %v2523_v1 = vadd.f32 %v3799_v54, %v5380_v16 }
 0x445   : > { %v2624_v47 = vadd.f32 %v2623_v9, %v2511_v56  ;;  %v5548_v9 = vld [vmem:[#allocation2 + $0x159] sm:$0xff] }
 0x446   : > { %3151 = vmatmul.f32.gmra.mxu3 %v2185_v58 }
 0x447   : > { %2961 = vmatmul.f32.gmra.mxu1 %v5533_v27  ;;  %v2737_v12 = vadd.f32 %v2736_v5, %v2624_v47  ;;  %v5551_v47 = vld [vmem:[#allocation2 + $0xaa] sm:$0xff] }
 0x448   : > { %v2858_v56 = vpop.f32.mrf.mxu0 }
 0x449   : > { %3029 = vmatmul.f32.gmra.mxu2 %v5536_v63  ;;  %v5539_v44 = vadd.f32 %v2849_v41, %v2737_v12  ;;  %v2186_v12 = vld [vmem:[#allocation2 + $0xe0] sm:$0xff] }
 0x44b   : > { %5992 = vst [vmem:[#allocation31_spill] sm:$0xff] %v5539_v44  ;;  %3261 = vmatmul.f32.gmra.mxu0 %v5396_v60 }
 0x44c   : > { %v5545_v13 = vpop.f32.mrf.mxu1  ;;  %v2626_v5 = vpop.f32.mrf.mxu2 }
 0x44d   : > { %5993 = vst [vmem:[#allocation32_spill] sm:$0xff] %v5545_v13  ;;  %v2627_v39 = vadd.f32 %v2626_v5, %v2514_v36  ;;  %v2748_v36 = vpop.f32.mrf.mxu3  ;;  %v5563_v13 = vld [vmem:[#allocation2 + $0xb2] sm:$0xff] }
 0x44e   : > { %3154 = vmatmul.f32.gmra.mxu3 %v2186_v12 }
 0x44f   : > { %2964 = vmatmul.f32.gmra.mxu1 %v5548_v9  ;;  %v2740_v41 = vadd.f32 %v2739_v24, %v2627_v39 }
 0x450   : > { %v2861_v24 = vpop.f32.mrf.mxu0 }
 0x451   : > { %3032 = vmatmul.f32.gmra.mxu2 %v5551_v47  ;;  %v5554_v58 = vadd.f32 %v2852_v33, %v2740_v41  ;;  %v2187_v33 = vld [vmem:[#allocation2 + $0xf0] sm:$0xff] }
 0x453   : > { %5994 = vst [vmem:[#allocation33_spill] sm:$0xff] %v5554_v58  ;;  %3264 = vmatmul.f32.gmra.mxu0 %v5406_v7  ;;  %v5575_v58 = vld [vmem:[#allocation2 + $0xc2] sm:$0xff] }
 0x454   : > { %v5557_v44 = vpop.f32.mrf.mxu1  ;;  %v2629_v60 = vpop.f32.mrf.mxu2 }
 0x455   : > { %5995 = vst [vmem:[#allocation34_spill] sm:$0xff] %v5557_v44  ;;  %v2630_v5 = vadd.f32 %v2629_v60, %v2517_v20  ;;  %v5572_v60 = vld [vmem:[#allocation2 + $0x171] sm:$0xff] }
 0x456   : > { %3157 = vmatmul.f32.gmra.mxu3 %v2187_v33 }
 0x457   : > { %2967 = vmatmul.f32.gmra.mxu1 %v5560_v55  ;;  %v2743_v39 = vadd.f32 %v2742_v28, %v2630_v5  ;;  %v2751_v28 = vpop.f32.mrf.mxu3 }
 0x458   : > { %v2864_v44 = vpop.f32.mrf.mxu0 }
 0x459   : > { %3035 = vmatmul.f32.gmra.mxu2 %v5563_v13  ;;  %v5566_v41 = vadd.f32 %v2855_v48, %v2743_v39  ;;  %v2188_v48 = vld [vmem:[#allocation2 + $0xf8] sm:$0xff] }
 0x45b   : > { %5996 = vst [vmem:[#allocation35_spill] sm:$0xff] %v5566_v41  ;;  %3267 = vmatmul.f32.gmra.mxu0 %v5416_v35 }
 0x45c   : > { %v5569_v7 = vpop.f32.mrf.mxu1  ;;  %v2632_v12 = vpop.f32.mrf.mxu2 }
 0x45d   : > { %v2633_v20 = vadd.f32 %v2632_v12, %v2520_v21  ;;  %v5584_v12 = vld [vmem:[#allocation2 + $0x181] sm:$0xff] }
 0x45e   : > { %3160 = vmatmul.f32.gmra.mxu3 %v2188_v48  ;;  %v2526_v48 = vadd.f32 %v3799_v54, %v5393_v15  ;;  %v2885_v15 = vadd.f32 %v5403_v32, %v5207_v10  ;;  %v2888_v10 = vadd.f32 %v5413_v61, %v5217_v26  ;;  %v2891_v26 = vadd.f32 %v5426_v53, %v5229_v34 }
 0x45f   : > { %2970 = vmatmul.f32.gmra.mxu1 %v5572_v60  ;;  %v2746_v5 = vadd.f32 %v2745_v6, %v2633_v20  ;;  %v5587_v20 = vld [vmem:[#allocation2 + $0xca] sm:$0xff]  ;;  %v3110_v41 = vpop.f32.mrf.mxu3  ;;  %v2894_v34 = vadd.f32 %v5439_v3, %v5240_v4  ;;  %v2897_v4 = vadd.f32 %v5452_v50, %v5251_v52  ;;  %v2900_v52 = vadd.f32 %v5465_v30, %v5262_v43 }
 0x460   : > { %v3223_v16 = vpop.f32.mrf.mxu0  ;;  %v2903_v43 = vadd.f32 %v5478_v59, %v5275_v49  ;;  %v2906_v49 = vadd.f32 %v5491_v40, %v5288_v18  ;;  %v5696_v40 = vld [vmem:[#allocation2 + $0x142] sm:$0xff] }
 0x461   : > { %3038 = vmatmul.f32.gmra.mxu2 %v5575_v58  ;;  %v5578_v39 = vadd.f32 %v2858_v56, %v2746_v5  ;;  %v2189_v56 = vld [vmem:[#allocation2 + $0x108] sm:$0xff] }
 0x463   : > { %5997 = vst [vmem:[#allocation36_spill] sm:$0xff] %v5578_v39  ;;  %3270 = vmatmul.f32.gmra.mxu0 %v5429_v51  ;;  %v5596_v39 = vld [vmem:[#allocation2 + $0x189] sm:$0xff] }
 0x464   : > { %v5581_v35 = vpop.f32.mrf.mxu1  ;;  %v2635_v33 = vpop.f32.mrf.mxu2 }
 0x465   : > { %v2636_v21 = vadd.f32 %v2635_v33, %v2523_v1 }
 0x466   : > { %3163 = vmatmul.f32.gmra.mxu3 %v2189_v56 }
 0x467   : > { %2973 = vmatmul.f32.gmra.mxu1 %v5584_v12  ;;  %v2749_v6 = vadd.f32 %v2748_v36, %v2636_v21  ;;  %v5599_v21 = vld [vmem:[#allocation2 + $0xda] sm:$0xff]  ;;  %v3113_v56 = vpop.f32.mrf.mxu3 }
 0x469   : > { %3041 = vmatmul.f32.gmra.mxu2 %v5587_v20  ;;  %v5590_v5 = vadd.f32 %v2861_v24, %v2749_v6  ;;  %v2190_v24 = vld [vmem:[#allocation2 + $0x110] sm:$0xff] }
 0x46b   : > { %3273 = vmatmul.f32.gmra.mxu0 %v5442_v17 }
 0x46c   : > { %v5593_v51 = vpop.f32.mrf.mxu1  ;;  %v2638_v1 = vpop.f32.mrf.mxu2 }
 0x46d   : > { %v2639_v33 = vadd.f32 %v2638_v1, %v2526_v48  ;;  %v3226_v48 = vpop.f32.mrf.mxu0 }
 0x46e   : > { %3166 = vmatmul.f32.gmra.mxu3 %v2190_v24 }
 0x46f   : > { %2976 = vmatmul.f32.gmra.mxu1 %v5596_v39  ;;  %v2752_v36 = vadd.f32 %v2751_v28, %v2639_v33  ;;  %v5610_v33 = vld [vmem:[#allocation2 + $0xe2] sm:$0xff]  ;;  %v3116_v24 = vpop.f32.mrf.mxu3 }
 0x471   : > { %3044 = vmatmul.f32.gmra.mxu2 %v5599_v21  ;;  %v5602_v6 = vadd.f32 %v2864_v44, %v2752_v36  ;;  %v2191_v44 = vld [vmem:[#allocation2 + $0x120] sm:$0xff] }
 0x473   : > { %3276 = vmatmul.f32.gmra.mxu0 %v5455_v37 }
 0x474   : > { %v5606_v17 = vpop.f32.mrf.mxu1  ;;  %v2997_v54 = vpop.f32.mrf.mxu2 }
 0x475   : > { %v2998_v1 = vadd.f32 %v2997_v54, %v2885_v15  ;;  %v5621_v54 = vld [vmem:[#allocation2 + $0xf2] sm:$0xff] }
 0x476   : > { %3169 = vmatmul.f32.gmra.mxu3 %v2191_v44 }
 0x477   : > { %3335 = vmatmul.f32.vlgmr.msra.gmra.mxu1 %v5419_v8  ;;  %v3111_v28 = vadd.f32 %v3110_v41, %v2998_v1  ;;  %v3229_v8 = vpop.f32.mrf.mxu0 }
 0x479   : > { %3047 = vmatmul.f32.gmra.mxu2 %v5610_v33  ;;  %v5613_v36 = vadd.f32 %v3223_v16, %v3111_v28  ;;  %v2192_v16 = vld [vmem:[#allocation2 + $0x128] sm:$0xff] }
 0x47b   : > { %3279 = vmatmul.f32.gmra.mxu0 %v5468_v11 }
 0x47c   : > { %v5617_v32 = vpop.f32.mrf.mxu1  ;;  %v3000_v37 = vpop.f32.mrf.mxu2 }
 0x47d   : > { %v3001_v15 = vadd.f32 %v3000_v37, %v2888_v10  ;;  %v5632_v10 = vld [vmem:[#allocation2 + $0xfa] sm:$0xff] }
 0x47e   : > { %3172 = vmatmul.f32.gmra.mxu3 %v2192_v16 }
 0x47f   : > { %3338 = vmatmul.f32.gmra.mxu1 %v5432_v19  ;;  %v3114_v41 = vadd.f32 %v3113_v56, %v3001_v15  ;;  %v3119_v19 = vpop.f32.mrf.mxu3  ;;  %v3232_v44 = vpop.f32.mrf.mxu0  ;;  %v5643_v15 = vld [vmem:[#allocation2 + $0x10a] sm:$0xff] }
 0x481   : > { %3050 = vmatmul.f32.gmra.mxu2 %v5621_v54  ;;  %v5624_v1 = vadd.f32 %v3226_v48, %v3114_v41  ;;  %v2193_v48 = vld [vmem:[#allocation2 + $0x138] sm:$0xff] }
 0x483   : > { %3282 = vmatmul.f32.gmra.mxu0 %v5481_v42 }
 0x484   : > { %v5628_v61 = vpop.f32.mrf.mxu1  ;;  %v3003_v11 = vpop.f32.mrf.mxu2 }
 0x485   : > { %v3004_v28 = vadd.f32 %v3003_v11, %v2891_v26 }
 0x486   : > { %3175 = vmatmul.f32.gmra.mxu3 %v2193_v48 }
 0x487   : > { %3341 = vmatmul.f32.gmra.mxu1 %v5445_v29  ;;  %v3117_v56 = vadd.f32 %v3116_v24, %v3004_v28  ;;  %v3122_v41 = vpop.f32.mrf.mxu3  ;;  %v3235_v26 = vpop.f32.mrf.mxu0  ;;  %v5654_v28 = vld [vmem:[#allocation2 + $0x112] sm:$0xff] }
 0x489   : > { %3053 = vmatmul.f32.gmra.mxu2 %v5632_v10  ;;  %v5635_v37 = vadd.f32 %v3229_v8, %v3117_v56  ;;  %v2194_v8 = vld [vmem:[#allocation2 + $0x140] sm:$0xff] }
 0x48b   : > { %3285 = vmatmul.f32.gmra.mxu0 %v5494_v46 }
 0x48c   : > { %v5639_v53 = vpop.f32.mrf.mxu1  ;;  %v3006_v42 = vpop.f32.mrf.mxu2 }
 0x48d   : > { %v3007_v29 = vadd.f32 %v3006_v42, %v2894_v34  ;;  %v5665_v42 = vld [vmem:[#allocation2 + $0x122] sm:$0xff] }
 0x48e   : > { %3178 = vmatmul.f32.gmra.mxu3 %v2194_v8 }
 0x48f   : > { %3344 = vmatmul.f32.gmra.mxu1 %v5458_v31  ;;  %v3120_v24 = vadd.f32 %v3119_v19, %v3007_v29  ;;  %v2195_v19 = vld [vmem:[#allocation2 + $0x150] sm:$0xff]  ;;  %v2196_v29 = vld [vmem:[#allocation2 + $0x158] sm:$0xff] }
 0x491   : > { %3056 = vmatmul.f32.gmra.mxu2 %v5643_v15  ;;  %v5646_v16 = vadd.f32 %v3232_v44, %v3120_v24  ;;  %v3125_v44 = vpop.f32.mrf.mxu3 }
 0x493   : > { %3288 = vmatmul.f32.gmra.mxu0 %v5507_v23  ;;  %v3238_v23 = vpop.f32.mrf.mxu0 }
 0x494   : > { %v5650_v3 = vpop.f32.mrf.mxu1  ;;  %v3009_v46 = vpop.f32.mrf.mxu2 }
 0x495   : > { %v3010_v31 = vadd.f32 %v3009_v46, %v2897_v4  ;;  %v5676_v4 = vld [vmem:[#allocation2 + $0x12a] sm:$0xff] }
 0x496   : > { %3181 = vmatmul.f32.gmra.mxu3 %v2195_v19  ;;  %v2197_v46 = vld [vmem:[#allocation2 + $0x168] sm:$0xff] }
 0x497   : > { %3347 = vmatmul.f32.gmra.mxu1 %v5471_v2  ;;  %v3123_v11 = vadd.f32 %v3122_v41, %v3010_v31 }
 0x499   : > { %3059 = vmatmul.f32.gmra.mxu2 %v5654_v28  ;;  %v5657_v56 = vadd.f32 %v3235_v26, %v3123_v11  ;;  %v3128_v41 = vpop.f32.mrf.mxu3 }
 0x49b   : > { %3291 = vmatmul.f32.gmra.mxu0 %v5520_v38 }
 0x49c   : > { %v5661_v50 = vpop.f32.mrf.mxu1  ;;  %v3012_v48 = vpop.f32.mrf.mxu2 }
 0x49d   : > { %v3013_v2 = vadd.f32 %v3012_v48, %v2900_v52  ;;  %v5687_v52 = vld [vmem:[#allocation2 + $0x13a] sm:$0xff] }
 0x49e   : > { %3184 = vmatmul.f32.gmra.mxu3 %v2196_v29  ;;  %v3800_v29 = vld [vmem:[#allocation2] sm:$0xff] }
 0x49f   : > { %3350 = vmatmul.f32.gmra.mxu1 %v5484_v57  ;;  %v3126_v34 = vadd.f32 %v3125_v44, %v3013_v2  ;;  %v3241_v57 = vpop.f32.mrf.mxu0  ;;  %v5703_v2 = vld [vmem:[#allocation2 + $0x152] sm:$0xff] }
 0x4a1   : > { %3062 = vmatmul.f32.gmra.mxu2 %v5665_v42  ;;  %v5668_v24 = vadd.f32 %v3238_v23, %v3126_v34  ;;  %v3131_v19 = vpop.f32.mrf.mxu3  ;;  %v2198_v23 = vld [vmem:[#allocation2 + $0x170] sm:$0xff]  ;;  %v2200_v34 = vld [vmem:[#allocation2 + $0x188] sm:$0xff] }
 0x4a3   : > { %3294 = vmatmul.f32.gmra.mxu0 %v5533_v27 }
 0x4a4   : > { %v5672_v30 = vpop.f32.mrf.mxu1  ;;  %v3015_v38 = vpop.f32.mrf.mxu2 }
 0x4a5   : > { %v3016_v8 = vadd.f32 %v3015_v38, %v2903_v43  ;;  %v2233_v43 = vld [vmem:[#allocation2 + $0x199] sm:$0xff]  ;;  %v2234_v38 = vld [vmem:[#allocation2 + $0x1a1] sm:$0xff] }
 0x4a6   : > { %3187 = vmatmul.f32.gmra.mxu3 %v2197_v46 }
 0x4a7   : > { %3353 = vmatmul.f32.gmra.mxu1 %v5497_v45  ;;  %v3129_v26 = vadd.f32 %v3128_v41, %v3016_v8  ;;  %v3244_v44 = vpop.f32.mrf.mxu0 }
 0x4a9   : > { %3065 = vmatmul.f32.gmra.mxu2 %v5676_v4  ;;  %v5679_v31 = vadd.f32 %v3241_v57, %v3129_v26 }
 0x4ab   : > { %3297 = vmatmul.f32.gmra.mxu0 %v5548_v9 }
 0x4ac   : > { %v5683_v59 = vpop.f32.mrf.mxu1  ;;  %v3018_v27 = vpop.f32.mrf.mxu2 }
 0x4ad   : > { %v3019_v11 = vadd.f32 %v3018_v27, %v2906_v49 }
 0x4ae   : > { %3190 = vmatmul.f32.gmra.mxu3 %v2198_v23 }
 0x4af   : > { %3356 = vmatmul.f32.gmra.mxu1 %v5510_v22  ;;  %v3132_v45 = vadd.f32 %v3131_v19, %v3019_v11  ;;  %v2199_v22 = vld [vmem:[#allocation2 + $0x180] sm:$0xff] }
 0x4b1   : > { %3068 = vmatmul.f32.gmra.mxu2 %v5687_v52  ;;  %v5690_v48 = vadd.f32 %v3244_v44, %v3132_v45 }
 0x4b3   : > { %3300 = vmatmul.f32.gmra.mxu0 %v5560_v55 }
 0x4b4   : > { %v5692_v18 = vpop.f32.mrf.mxu1  ;;  %v3021_v49 = vpop.f32.mrf.mxu2 }
 0x4b6   : > { %3193 = vmatmul.f32.gmra.mxu3 %v2199_v22 }
 0x4b7   : > { %3359 = vmatmul.f32.gmra.mxu1 %v5523_v0  ;;  %v5710_v0 = vld [vmem:[#allocation2 + $0x15a] sm:$0xff] }
 0x4b9   : > { %3071 = vmatmul.f32.gmra.mxu2 %v5696_v40 }
 0x4bb   : > { %3303 = vmatmul.f32.gmra.mxu0 %v5572_v60 }
 0x4bc   : > { %v5699_v9 = vpop.f32.mrf.mxu1  ;;  %v3024_v19 = vpop.f32.mrf.mxu2 }
 0x4be   : > { %3196 = vmatmul.f32.gmra.mxu3 %v2200_v34 }
 0x4bf   : > { %3362 = vmatmul.f32.gmra.mxu1 %v5536_v63  ;;  %v5717_v63 = vld [vmem:[#allocation2 + $0x16a] sm:$0xff] }
 0x4c1   : > { %3074 = vmatmul.f32.gmra.mxu2 %v5703_v2 }
 0x4c3   : > { %3306 = vmatmul.f32.gmra.mxu0 %v5584_v12 }
 0x4c4   : > { %v5706_v55 = vpop.f32.mrf.mxu1 }
 0x4c6   : > { %3199 = vmatmul.f32.gmra.mxu3 %v3800_v29 }
 0x4c7   : > { %3365 = vmatmul.f32.gmra.mxu1 %v5551_v47  ;;  %v5723_v47 = vld [vmem:[#allocation2 + $0x172] sm:$0xff] }
 0x4c9   : > { %3077 = vmatmul.f32.gmra.mxu2 %v5710_v0 }
 0x4cb   : > { %3309 = vmatmul.f32.gmra.mxu0 %v5596_v39 }
 0x4cc   : > { %v5713_v60 = vpop.f32.mrf.mxu1 }
 0x4ce   : > { %3202 = vmatmul.f32.gmra.mxu3 %v3800_v29 }
 0x4cf   : > { %3368 = vmatmul.f32.gmra.mxu1 %v5563_v13  ;;  %v5729_v13 = vld [vmem:[#allocation2 + $0x182] sm:$0xff] }
 0x4d1   : > { %3080 = vmatmul.f32.gmra.mxu2 %v5717_v63 }
 0x4d3   : > { %3312 = vmatmul.f32.gmra.mxu0 %v2233_v43  ;;  %v3027_v43 = vpop.f32.mrf.mxu2 }
 0x4d4   : > { %v5720_v12 = vpop.f32.mrf.mxu1 }
 0x4d7   : > { %3371 = vmatmul.f32.gmra.mxu1 %v5575_v58  ;;  %v5735_v58 = vld [vmem:[#allocation2 + $0x18a] sm:$0xff] }
 0x4d9   : > { %3083 = vmatmul.f32.gmra.mxu2 %v5723_v47 }
 0x4db   : > { %3315 = vmatmul.f32.gmra.mxu0 %v2234_v38 }
 0x4dc   : > { %v5726_v41 = vpop.f32.mrf.mxu1 }
 0x4df   : > { %3374 = vmatmul.f32.gmra.mxu1 %v5587_v20 }
 0x4e1   : > { %3086 = vmatmul.f32.gmra.mxu2 %v5729_v13 }
 0x4e4   : > { %v5732_v39 = vpop.f32.mrf.mxu1 }
 0x4e7   : > { %3377 = vmatmul.f32.gmra.mxu1 %v5599_v21 }
 0x4e9   : > { %3089 = vmatmul.f32.gmra.mxu2 %v5735_v58 }
 0x4ec   : > { %v5738_v8 = vpop.f32.mrf.mxu1 }
 0x4ef   : > { %3380 = vmatmul.f32.gmra.mxu1 %v5610_v33 }
 0x4f4   : > { %v3336_v57 = vpop.f32.mrf.mxu1 }
 0x4f5   : > { %v3337_v20 = vadd.f32 %v3336_v57, %v5613_v36  ;;  %v3134_v36 = vpop.f32.mrf.mxu3 }
 0x4f7   : > { %vm3432_vm0 = vcmp.ge.f32.partialorder %v3337_v20, 0.0  ;;  %v3464_v26 = vmul.f32 0.2, %v3337_v20  ;;  %3383 = vmatmul.f32.gmra.mxu1 %v5621_v54  ;;  %v3247_v54 = vpop.f32.mrf.mxu0 }
 0x4f9   : > { %v3496_v46 = vsel %vm3432_vm0, %v3337_v20, %v3464_v26 }
 0x4fa   : > { %3528 = vst [vmem:[%s5745_s30] sm:$0xff] %v3496_v46 }
 0x4fc   : > { %v3339_v21 = vpop.f32.mrf.mxu1 }
 0x4fd   : > { %v3340_v27 = vadd.f32 %v3339_v21, %v5624_v1  ;;  %v3137_v1 = vpop.f32.mrf.mxu3 }
 0x4ff   : > { %vm3433_vm1 = vcmp.ge.f32.partialorder %v3340_v27, 0.0  ;;  %v3465_v33 = vmul.f32 0.2, %v3340_v27  ;;  %3386 = vmatmul.f32.gmra.mxu1 %v5632_v10  ;;  %v5754_v29 = vpop.f32.mrf.mxu0 }
 0x501   : > { %v3497_v11 = vsel %vm3433_vm1, %v3340_v27, %v3465_v33 }
 0x502   : > { %3529 = vst [vmem:[%s5745_s30 + $0x8] sm:$0xff] %v3497_v11 }
 0x504   : > { %v3342_v45 = vpop.f32.mrf.mxu1 }
 0x505   : > { %v3343_v44 = vadd.f32 %v3342_v45, %v5635_v37  ;;  %v3140_v37 = vpop.f32.mrf.mxu3 }
 0x507   : > { %vm3434_vm2 = vcmp.ge.f32.partialorder %v3343_v44, 0.0  ;;  %v3466_v23 = vmul.f32 0.2, %v3343_v44  ;;  %3389 = vmatmul.f32.gmra.mxu1 %v5643_v15  ;;  %v5760_v26 = vpop.f32.mrf.mxu0 }
 0x509   : > { %v3498_v22 = vsel %vm3434_vm2, %v3343_v44, %v3466_v23 }
 0x50a   : > { %3530 = vst [vmem:[%s5745_s30 + $0x10] sm:$0xff] %v3498_v22 }
 0x50c   : > { %v3345_v34 = vpop.f32.mrf.mxu1 }
 0x50d   : > { %v3346_v10 = vadd.f32 %v3345_v34, %v5646_v16  ;;  %v3030_v16 = vpop.f32.mrf.mxu2  ;;  %v2909_v34 = vadd.f32 %v5504_v25, %v5303_v14 }
 0x50f   : > { %vm3435_vm3 = vcmp.ge.f32.partialorder %v3346_v10, 0.0  ;;  %v3467_v38 = vmul.f32 0.2, %v3346_v10  ;;  %3392 = vmatmul.f32.gmra.mxu1 %v5654_v28  ;;  %v3143_v28 = vpop.f32.mrf.mxu3 }
 0x511   : > { %v3499_v57 = vsel %vm3435_vm3, %v3346_v10, %v3467_v38 }
 0x512   : > { %3531 = vst [vmem:[%s5745_s30 + $0x18] sm:$0xff] %v3499_v57 }
 0x514   : > { %v3348_v20 = vpop.f32.mrf.mxu1 }
 0x515   : > { %v3349_v15 = vadd.f32 %v3348_v20, %v5657_v56  ;;  %v5766_v56 = vpop.f32.mrf.mxu0  ;;  %v5768_v44 = vpop.f32.mrf.mxu2 }
 0x517   : > { %vm3436_vm4 = vcmp.ge.f32.partialorder %v3349_v15, 0.0  ;;  %v3468_v46 = vmul.f32 0.2, %v3349_v15  ;;  %3395 = vmatmul.f32.gmra.mxu1 %v5665_v42 }
 0x519   : > { %v3500_v21 = vsel %vm3436_vm4, %v3349_v15, %v3468_v46 }
 0x51a   : > { %3532 = vst [vmem:[%s5745_s30 + $0x20] sm:$0xff] %v3500_v21  ;;  %v5999_v21 = vld [vmem:[#allocation20_spill] sm:$0xff] }
 0x51c   : > { %v3351_v27 = vpop.f32.mrf.mxu1 }
 0x51d   : > { %v3352_v33 = vadd.f32 %v3351_v27, %v5668_v24  ;;  %v3146_v24 = vpop.f32.mrf.mxu3  ;;  %v5776_v38 = vpop.f32.mrf.mxu0 }
 0x51e   : > { %v5778_v57 = vpop.f32.mrf.mxu2 }
 0x51f   : > { %vm3437_vm5 = vcmp.ge.f32.partialorder %v3352_v33, 0.0  ;;  %v3469_v11 = vmul.f32 0.2, %v3352_v33  ;;  %3398 = vmatmul.f32.gmra.mxu1 %v5676_v4  ;;  %v3022_v4 = vadd.f32 %v3021_v49, %v2909_v34 }
 0x521   : > { %v3501_v45 = vsel %vm3437_vm5, %v3352_v33, %v3469_v11 }
 0x522   : > { %3533 = vst [vmem:[%s5745_s30 + $0x28] sm:$0xff] %v3501_v45 }
 0x524   : > { %v3354_v23 = vpop.f32.mrf.mxu1 }
 0x525   : > { %v3355_v42 = vadd.f32 %v3354_v23, %v5679_v31  ;;  %v3135_v31 = vadd.f32 %v3134_v36, %v3022_v4  ;;  %v3149_v25 = vpop.f32.mrf.mxu3  ;;  %v5785_v45 = vpop.f32.mrf.mxu0 }
 0x527   : > { %vm3438_vm6 = vcmp.ge.f32.partialorder %v3355_v42, 0.0  ;;  %v3470_v22 = vmul.f32 0.2, %v3355_v42  ;;  %3401 = vmatmul.f32.gmra.mxu1 %v5687_v52  ;;  %v5998_v52 = vld [vmem:[#allocation13_spill] sm:$0xff]  ;;  %v3248_v33 = vadd.f32 %v3247_v54, %v3135_v31 }
 0x528   : > { %v2912_v27 = vadd.f32 %v5999_v21, %v5998_v52  ;;  %v6002_v52 = vld [vmem:[#allocation32_spill] sm:$0xff] }
 0x529   : > { %v3502_v10 = vsel %vm3438_vm6, %v3355_v42, %v3470_v22  ;;  %v3039_v42 = vpop.f32.mrf.mxu2 }
 0x52a   : > { %3534 = vst [vmem:[%s5745_s30 + $0x30] sm:$0xff] %v3502_v10  ;;  %v3025_v49 = vadd.f32 %v3024_v19, %v2912_v27 }
 0x52c   : > { %v3357_v20 = vpop.f32.mrf.mxu1 }
 0x52d   : > { %v3358_v15 = vadd.f32 %v3357_v20, %v5690_v48  ;;  %v3138_v48 = vadd.f32 %v3137_v1, %v3025_v49  ;;  %v3152_v54 = vpop.f32.mrf.mxu3  ;;  %v3265_v31 = vpop.f32.mrf.mxu0 }
 0x52f   : > { %vm3439_vm7 = vcmp.ge.f32.partialorder %v3358_v15, 0.0  ;;  %v3471_v46 = vmul.f32 0.2, %v3358_v15  ;;  %3404 = vmatmul.f32.gmra.mxu1 %v5696_v40  ;;  %v6000_v40 = vld [vmem:[#allocation22_spill] sm:$0xff]  ;;  %v3251_v19 = vadd.f32 %v5754_v29, %v3138_v48 }
 0x530   : > { %v2915_v22 = vadd.f32 %v5530_v62, %v6000_v40 }
 0x531   : > { %v3503_v14 = vsel %vm3439_vm7, %v3358_v15, %v3471_v46  ;;  %v3042_v46 = vpop.f32.mrf.mxu2 }
 0x532   : > { %3535 = vst [vmem:[%s5745_s30 + $0x38] sm:$0xff] %v3503_v14  ;;  %v3028_v10 = vadd.f32 %v3027_v43, %v2915_v22 }
 0x534   : > { %v3360_v11 = vpop.f32.mrf.mxu1  ;;  %v3141_v15 = vadd.f32 %v3140_v37, %v3028_v10 }
 0x535   : > { %v3361_v23 = vadd.f32 %v3360_v11, %v3248_v33  ;;  %v3155_v49 = vpop.f32.mrf.mxu3  ;;  %v6003_v11 = vld [vmem:[#allocation14_spill] sm:$0xff]  ;;  %v3268_v48 = vpop.f32.mrf.mxu0 }
 0x536   : > { %v3254_v43 = vadd.f32 %v5760_v26, %v3141_v15 }
 0x537   : > { %vm3440_vm8 = vcmp.ge.f32.partialorder %v3361_v23, 0.0  ;;  %v3472_v36 = vmul.f32 0.2, %v3361_v23  ;;  %3407 = vmatmul.f32.gmra.mxu1 %v5703_v2  ;;  %v6001_v2 = vld [vmem:[#allocation25_spill] sm:$0xff] }
 0x538   : > { %v2918_v21 = vadd.f32 %v6002_v52, %v6001_v2 }
 0x539   : > { %v3504_v34 = vsel %vm3440_vm8, %v3361_v23, %v3472_v36  ;;  %v3045_v40 = vpop.f32.mrf.mxu2 }
 0x53a   : > { %3536 = vst [vmem:[%s5745_s30 + $0x40] sm:$0xff] %v3504_v34  ;;  %v3031_v27 = vadd.f32 %v3030_v16, %v2918_v21 }
 0x53c   : > { %v3363_v4 = vpop.f32.mrf.mxu1  ;;  %v3144_v33 = vadd.f32 %v3143_v28, %v3031_v27 }
 0x53d   : > { %v3364_v20 = vadd.f32 %v3363_v4, %v3251_v19  ;;  %v6005_v19 = vld [vmem:[#allocation23_spill] sm:$0xff] }
 0x53e   : > { %v3257_v26 = vadd.f32 %v5766_v56, %v3144_v33  ;;  %v2924_v4 = vadd.f32 %v5569_v7, %v6005_v19 }
 0x53f   : > { %vm3441_vm9 = vcmp.ge.f32.partialorder %v3364_v20, 0.0  ;;  %v3473_v1 = vmul.f32 0.2, %v3364_v20  ;;  %3410 = vmatmul.f32.gmra.mxu1 %v5710_v0  ;;  %v6004_v0 = vld [vmem:[#allocation34_spill] sm:$0xff] }
 0x540   : > { %v2921_v23 = vadd.f32 %v6004_v0, %v6003_v11  ;;  %v3037_v15 = vadd.f32 %v5778_v57, %v2924_v4 }
 0x541   : > { %v3505_v62 = vsel %vm3441_vm9, %v3364_v20, %v3473_v1  ;;  %v3271_v1 = vpop.f32.mrf.mxu0  ;;  %v3048_v56 = vpop.f32.mrf.mxu2 }
 0x542   : > { %3537 = vst [vmem:[%s5745_s30 + $0x48] sm:$0xff] %v3505_v62  ;;  %v3034_v16 = vadd.f32 %v5768_v44, %v2921_v23 }
 0x544   : > { %v3366_v29 = vpop.f32.mrf.mxu1  ;;  %v3147_v10 = vadd.f32 %v3146_v24, %v3034_v16  ;;  %v3150_v24 = vadd.f32 %v3149_v25, %v3037_v15 }
 0x545   : > { %v3367_v14 = vadd.f32 %v3366_v29, %v3254_v43 }
 0x546   : > { %v3260_v44 = vadd.f32 %v5776_v38, %v3147_v10  ;;  %v3263_v57 = vadd.f32 %v5785_v45, %v3150_v24  ;;  %v2265_v45 = vld [vmem:[#allocation2 + $0x19a] sm:$0xff] }
 0x547   : > { %vm3442_vm10 = vcmp.ge.f32.partialorder %v3367_v14, 0.0  ;;  %v3474_v37 = vmul.f32 0.2, %v3367_v14  ;;  %3413 = vmatmul.f32.gmra.mxu1 %v5717_v63  ;;  %v3158_v63 = vpop.f32.mrf.mxu3  ;;  %v6008_v10 = vld [vmem:[#allocation27_spill] sm:$0xff] }
 0x549   : > { %v3506_v36 = vsel %vm3442_vm10, %v3367_v14, %v3474_v37  ;;  %v3274_v38 = vpop.f32.mrf.mxu0  ;;  %v3051_v33 = vpop.f32.mrf.mxu2 }
 0x54a   : > { %3538 = vst [vmem:[%s5745_s30 + $0x50] sm:$0xff] %v3506_v36 }
 0x54c   : > { %v3369_v22 = vpop.f32.mrf.mxu1 }
 0x54d   : > { %v3370_v34 = vadd.f32 %v3369_v22, %v3257_v26 }
 0x54f   : > { %vm3443_vm11 = vcmp.ge.f32.partialorder %v3370_v34, 0.0  ;;  %v3475_v28 = vmul.f32 0.2, %v3370_v34  ;;  %3416 = vmatmul.f32.gmra.mxu1 %v5723_v47  ;;  %v6006_v47 = vld [vmem:[#allocation15_spill] sm:$0xff]  ;;  %v3161_v27 = vpop.f32.mrf.mxu3 }
 0x550   : > { %v2927_v62 = vadd.f32 %v5581_v35, %v6006_v47 }
 0x551   : > { %v3507_v20 = vsel %vm3443_vm11, %v3370_v34, %v3475_v28  ;;  %v3277_v22 = vpop.f32.mrf.mxu0  ;;  %v3054_v34 = vpop.f32.mrf.mxu2 }
 0x552   : > { %3539 = vst [vmem:[%s5745_s30 + $0x58] sm:$0xff] %v3507_v20  ;;  %v3040_v43 = vadd.f32 %v3039_v42, %v2927_v62 }
 0x554   : > { %v3372_v2 = vpop.f32.mrf.mxu1  ;;  %v3153_v37 = vadd.f32 %v3152_v54, %v3040_v43 }
 0x555   : > { %v3373_v52 = vadd.f32 %v3372_v2, %v3260_v44  ;;  %v6009_v44 = vld [vmem:[#allocation16_spill] sm:$0xff] }
 0x556   : > { %v3266_v23 = vadd.f32 %v3265_v31, %v3153_v37  ;;  %v2266_v31 = vld [vmem:[#allocation2 + $0x1a2] sm:$0xff]  ;;  %v2936_v2 = vadd.f32 %v5617_v32, %v6009_v44 }
 0x557   : > { %vm3444_vm12 = vcmp.ge.f32.partialorder %v3373_v52, 0.0  ;;  %v3476_v21 = vmul.f32 0.2, %v3373_v52  ;;  %3419 = vmatmul.f32.gmra.mxu1 %v5729_v13  ;;  %v6007_v13 = vld [vmem:[#allocation24_spill] sm:$0xff]  ;;  %v3164_v42 = vpop.f32.mrf.mxu3 }
 0x558   : > { %v2930_v11 = vadd.f32 %v5593_v51, %v6007_v13 }
 0x559   : > { %v3508_v7 = vsel %vm3444_vm12, %v3373_v52, %v3476_v21  ;;  %v3280_v52 = vpop.f32.mrf.mxu0  ;;  %v3049_v21 = vadd.f32 %v3048_v56, %v2936_v2 }
 0x55a   : > { %3540 = vst [vmem:[%s5745_s30 + $0x60] sm:$0xff] %v3508_v7  ;;  %v3043_v0 = vadd.f32 %v3042_v46, %v2930_v11 }
 0x55b   : > { %v3162_v62 = vadd.f32 %v3161_v27, %v3049_v21 }
 0x55c   : > { %v3375_v29 = vpop.f32.mrf.mxu1  ;;  %v3156_v26 = vadd.f32 %v3155_v49, %v3043_v0 }
 0x55d   : > { %v3376_v14 = vadd.f32 %v3375_v29, %v3263_v57  ;;  %v3275_v37 = vadd.f32 %v3274_v38, %v3162_v62 }
 0x55e   : > { %v3269_v19 = vadd.f32 %v3268_v48, %v3156_v26 }
 0x55f   : > { %vm3445_vm13 = vcmp.ge.f32.partialorder %v3376_v14, 0.0  ;;  %v3477_v25 = vmul.f32 0.2, %v3376_v14  ;;  %3422 = vmatmul.f32.gmra.mxu1 %v5735_v58  ;;  %v2933_v58 = vadd.f32 %v5606_v17, %v6008_v10  ;;  %v3167_v20 = vpop.f32.mrf.mxu3  ;;  %v3057_v17 = vpop.f32.mrf.mxu2  ;;  %v6012_v10 = vld [vmem:[#allocation17_spill] sm:$0xff] }
 0x561   : > { %v3509_v35 = vsel %vm3445_vm13, %v3376_v14, %v3477_v25  ;;  %v3046_v51 = vadd.f32 %v3045_v40, %v2933_v58  ;;  %v3283_v32 = vpop.f32.mrf.mxu0 }
 0x562   : > { %3541 = vst [vmem:[%s5745_s30 + $0x68] sm:$0xff] %v3509_v35  ;;  %v6011_v35 = vld [vmem:[#allocation29_spill] sm:$0xff] }
 0x563   : > { %v3159_v15 = vadd.f32 %v3158_v63, %v3046_v51  ;;  %v6010_v63 = vld [vmem:[#allocation26_spill] sm:$0xff]  ;;  %v2942_v27 = vadd.f32 %v5639_v53, %v6011_v35 }
 0x564   : > { %v3378_v36 = vpop.f32.mrf.mxu1  ;;  %v2939_v57 = vadd.f32 %v5628_v61, %v6010_v63 }
 0x565   : > { %v3379_v16 = vadd.f32 %v3378_v36, %v3266_v23  ;;  %v3272_v47 = vadd.f32 %v3271_v1, %v3159_v15  ;;  %v3055_v36 = vadd.f32 %v3054_v34, %v2942_v27  ;;  %v6013_v15 = vld [vmem:[#allocation28_spill] sm:$0xff] }
 0x566   : > { %v3052_v14 = vadd.f32 %v3051_v33, %v2939_v57 }
 0x567   : > { %vm3446_vm14 = vcmp.ge.f32.partialorder %v3379_v16, 0.0  ;;  %v3478_v54 = vmul.f32 0.2, %v3379_v16  ;;  %3425 = vmatmul.f32.gmra.mxu1 %v2265_v45  ;;  %v3170_v43 = vpop.f32.mrf.mxu3  ;;  %v3060_v25 = vpop.f32.mrf.mxu2  ;;  %v3168_v38 = vadd.f32 %v3167_v20, %v3055_v36  ;;  %v2948_v20 = vadd.f32 %v5661_v50, %v6013_v15  ;;  %v6016_v36 = vld [vmem:[#allocation19_spill] sm:$0xff] }
 0x568   : > { %v3165_v56 = vadd.f32 %v3164_v42, %v3052_v14  ;;  %v2945_v42 = vadd.f32 %v5650_v3, %v6012_v10 }
 0x569   : > { %v3510_v28 = vsel %vm3446_vm14, %v3379_v16, %v3478_v54  ;;  %v3286_v16 = vpop.f32.mrf.mxu0  ;;  %v3281_v53 = vadd.f32 %v3280_v52, %v3168_v38  ;;  %v3061_v44 = vadd.f32 %v3060_v25, %v2948_v20 }
 0x56a   : > { %3542 = vst [vmem:[%s5745_s30 + $0x70] sm:$0xff] %v3510_v28  ;;  %v3278_v61 = vadd.f32 %v3277_v22, %v3165_v56  ;;  %v3058_v28 = vadd.f32 %v3057_v17, %v2945_v42 }
 0x56c   : > { %v3381_v46 = vpop.f32.mrf.mxu1  ;;  %v3171_v34 = vadd.f32 %v3170_v43, %v3058_v28  ;;  %v6017_v28 = vld [vmem:[#allocation21_spill] sm:$0xff] }
 0x56d   : > { %v3382_v4 = vadd.f32 %v3381_v46, %v3269_v19 }
 0x56e   : > { %v3284_v3 = vadd.f32 %v3283_v32, %v3171_v34 }
 0x56f   : > { %vm3447_vm15 = vcmp.ge.f32.partialorder %v3382_v4, 0.0  ;;  %v3479_v49 = vmul.f32 0.2, %v3382_v4  ;;  %3428 = vmatmul.f32.gmra.mxu1 %v2266_v31  ;;  %v3173_v23 = vpop.f32.mrf.mxu3  ;;  %v3063_v26 = vpop.f32.mrf.mxu2 }
 0x570   : > { %v3174_v52 = vadd.f32 %v3173_v23, %v3061_v44 }
 0x571   : > { %v3511_v24 = vsel %vm3447_vm15, %v3382_v4, %v3479_v49  ;;  %v3289_v22 = vpop.f32.mrf.mxu0 }
 0x572   : > { %3543 = vst [vmem:[%s5745_s30 + $0x78] sm:$0xff] %v3511_v24  ;;  %v3287_v50 = vadd.f32 %v3286_v16, %v3174_v52 }
 0x574   : > { %v3384_v40 = vpop.f32.mrf.mxu1 }
 0x575   : > { %v3385_v48 = vadd.f32 %v3384_v40, %v3272_v47  ;;  %v6014_v47 = vld [vmem:[#allocation18_spill] sm:$0xff] }
 0x576   : > { %v2951_v40 = vadd.f32 %v5672_v30, %v6014_v47 }
 0x577   : > { %vm3448_vm0 = vcmp.ge.f32.partialorder %v3385_v48, 0.0  ;;  %v3480_v7 = vmul.f32 0.2, %v3385_v48  ;;  %v3176_v51 = vpop.f32.mrf.mxu3  ;;  %v3066_v4 = vpop.f32.mrf.mxu2 }
 0x578   : > { %v3064_v43 = vadd.f32 %v3063_v26, %v2951_v40  ;;  %v6019_v40 = vld [vmem:[#allocation33_spill] sm:$0xff] }
 0x579   : > { %v3512_v29 = vsel %vm3448_vm0, %v3385_v48, %v3480_v7  ;;  %v3292_v48 = vpop.f32.mrf.mxu0 }
 0x57a   : > { %3544 = vst [vmem:[%s5745_s30 + $0x80] sm:$0xff] %v3512_v29  ;;  %v3177_v29 = vadd.f32 %v3176_v51, %v3064_v43 }
 0x57c   : > { %v3387_v13 = vpop.f32.mrf.mxu1  ;;  %v3290_v56 = vadd.f32 %v3289_v22, %v3177_v29 }
 0x57d   : > { %v3388_v11 = vadd.f32 %v3387_v13, %v3275_v37  ;;  %v6015_v37 = vld [vmem:[#allocation30_spill] sm:$0xff] }
 0x57e   : > { %v2954_v25 = vadd.f32 %v5683_v59, %v6015_v37  ;;  %v6020_v37 = vld [vmem:[#allocation35_spill] sm:$0xff] }
 0x57f   : > { %vm3449_vm1 = vcmp.ge.f32.partialorder %v3388_v11, 0.0  ;;  %v3481_v1 = vmul.f32 0.2, %v3388_v11  ;;  %v3179_v17 = vpop.f32.mrf.mxu3  ;;  %v3069_v7 = vpop.f32.mrf.mxu2 }
 0x581   : > { %v3513_v0 = vsel %vm3449_vm1, %v3388_v11, %v3481_v1  ;;  %v3067_v11 = vadd.f32 %v3066_v4, %v2954_v25  ;;  %v3295_v30 = vpop.f32.mrf.mxu0  ;;  %v2969_v25 = vadd.f32 %v5720_v12, %v6020_v37 }
 0x582   : > { %3545 = vst [vmem:[%s5745_s30 + $0x88] sm:$0xff] %v3513_v0 }
 0x583   : > { %v3180_v0 = vadd.f32 %v3179_v17, %v3067_v11 }
 0x584   : > { %v3390_v45 = vpop.f32.mrf.mxu1 }
 0x585   : > { %v3391_v33 = vadd.f32 %v3390_v45, %v3278_v61  ;;  %v2957_v61 = vadd.f32 %v5692_v18, %v6016_v36  ;;  %v3293_v59 = vadd.f32 %v3292_v48, %v3180_v0  ;;  %v2966_v48 = vadd.f32 %v5713_v60, %v6019_v40 }
 0x587   : > { %vm3450_vm2 = vcmp.ge.f32.partialorder %v3391_v33, 0.0  ;;  %v3482_v54 = vmul.f32 0.2, %v3391_v33  ;;  %v3182_v32 = vpop.f32.mrf.mxu3  ;;  %v3072_v1 = vpop.f32.mrf.mxu2 }
 0x589   : > { %v3514_v58 = vsel %vm3450_vm2, %v3391_v33, %v3482_v54  ;;  %v3070_v33 = vadd.f32 %v3069_v7, %v2957_v61  ;;  %v3298_v38 = vpop.f32.mrf.mxu0 }
 0x58a   : > { %3546 = vst [vmem:[%s5745_s30 + $0x90] sm:$0xff] %v3514_v58 }
 0x58b   : > { %v3183_v42 = vadd.f32 %v3182_v32, %v3070_v33 }
 0x58c   : > { %v3393_v19 = vpop.f32.mrf.mxu1 }
 0x58d   : > { %v3394_v46 = vadd.f32 %v3393_v19, %v3281_v53  ;;  %v2960_v53 = vadd.f32 %v5699_v9, %v6017_v28  ;;  %v3296_v18 = vadd.f32 %v3295_v30, %v3183_v42  ;;  %v2975_v42 = vadd.f32 %v5732_v39, %v5590_v5 }
 0x58f   : > { %vm3451_vm3 = vcmp.ge.f32.partialorder %v3394_v46, 0.0  ;;  %v3483_v31 = vmul.f32 0.2, %v3394_v46  ;;  %v3185_v16 = vpop.f32.mrf.mxu3  ;;  %v3075_v10 = vpop.f32.mrf.mxu2  ;;  %v3073_v19 = vadd.f32 %v3072_v1, %v2960_v53 }
 0x591   : > { %v3515_v49 = vsel %vm3451_vm3, %v3394_v46, %v3483_v31  ;;  %v3186_v31 = vadd.f32 %v3185_v16, %v3073_v19  ;;  %v3301_v4 = vpop.f32.mrf.mxu0 }
 0x592   : > { %3547 = vst [vmem:[%s5745_s30 + $0x98] sm:$0xff] %v3515_v49  ;;  %v6018_v49 = vld [vmem:[#allocation31_spill] sm:$0xff] }
 0x593   : > { %v2963_v44 = vadd.f32 %v5706_v55, %v6018_v49  ;;  %v3299_v9 = vadd.f32 %v3298_v38, %v3186_v31  ;;  %v2978_v31 = vadd.f32 %v5738_v8, %v5602_v6 }
 0x594   : > { %v3396_v2 = vpop.f32.mrf.mxu1 }
 0x595   : > { %v3397_v24 = vadd.f32 %v3396_v2, %v3284_v3  ;;  %v3076_v2 = vadd.f32 %v3075_v10, %v2963_v44 }
 0x597   : > { %vm3452_vm4 = vcmp.ge.f32.partialorder %v3397_v24, 0.0  ;;  %v3484_v21 = vmul.f32 0.2, %v3397_v24  ;;  %v3188_v46 = vpop.f32.mrf.mxu3  ;;  %v3078_v20 = vpop.f32.mrf.mxu2 }
 0x599   : > { %v3516_v62 = vsel %vm3452_vm4, %v3397_v24, %v3484_v21  ;;  %v3189_v21 = vadd.f32 %v3188_v46, %v3076_v2 }
 0x59a   : > { %3548 = vst [vmem:[%s5745_s30 + $0xa0] sm:$0xff] %v3516_v62  ;;  %v3304_v62 = vpop.f32.mrf.mxu0 }
 0x59b   : > { %v3302_v55 = vadd.f32 %v3301_v4, %v3189_v21 }
 0x59c   : > { %v3399_v63 = vpop.f32.mrf.mxu1 }
 0x59d   : > { %v3400_v57 = vadd.f32 %v3399_v63, %v3287_v50  ;;  %v3079_v50 = vadd.f32 %v3078_v20, %v2966_v48 }
 0x59f   : > { %vm3453_vm5 = vcmp.ge.f32.partialorder %v3400_v57, 0.0  ;;  %v3485_v14 = vmul.f32 0.2, %v3400_v57  ;;  %v3191_v52 = vpop.f32.mrf.mxu3  ;;  %v3081_v43 = vpop.f32.mrf.mxu2 }
 0x5a0   : > { %v3192_v29 = vadd.f32 %v3191_v52, %v3079_v50  ;;  %v3082_v60 = vadd.f32 %v3081_v43, %v2969_v25 }
 0x5a1   : > { %v3517_v13 = vsel %vm3453_vm5, %v3400_v57, %v3485_v14 }
 0x5a2   : > { %3549 = vst [vmem:[%s5745_s30 + $0xa8] sm:$0xff] %v3517_v13  ;;  %v3307_v11 = vpop.f32.mrf.mxu0  ;;  %v3305_v30 = vadd.f32 %v3304_v62, %v3192_v29 }
 0x5a4   : > { %v3402_v35 = vpop.f32.mrf.mxu1 }
 0x5a5   : > { %v3403_v27 = vadd.f32 %v3402_v35, %v3290_v56 }
 0x5a7   : > { %vm3454_vm6 = vcmp.ge.f32.partialorder %v3403_v27, 0.0  ;;  %v3486_v23 = vmul.f32 0.2, %v3403_v27  ;;  %v3194_v32 = vpop.f32.mrf.mxu3  ;;  %v3084_v56 = vpop.f32.mrf.mxu2 }
 0x5a9   : > { %v3518_v45 = vsel %vm3454_vm6, %v3403_v27, %v3486_v23  ;;  %v3195_v27 = vadd.f32 %v3194_v32, %v3082_v60  ;;  %v6021_v23 = vld [vmem:[#allocation36_spill] sm:$0xff] }
 0x5aa   : > { %3550 = vst [vmem:[%s5745_s30 + $0xb0] sm:$0xff] %v3518_v45  ;;  %v2972_v36 = vadd.f32 %v5726_v41, %v6021_v23 }
 0x5ab   : > { %v3308_v12 = vadd.f32 %v3307_v11, %v3195_v27 }
 0x5ac   : > { %v3405_v26 = vpop.f32.mrf.mxu1  ;;  %v3085_v16 = vadd.f32 %v3084_v56, %v2972_v36 }
 0x5ad   : > { %v3406_v54 = vadd.f32 %v3405_v26, %v3293_v59  ;;  %v3310_v26 = vpop.f32.mrf.mxu0 }
 0x5af   : > { %vm3455_vm7 = vcmp.ge.f32.partialorder %v3406_v54, 0.0  ;;  %v3487_v58 = vmul.f32 0.2, %v3406_v54  ;;  %v3197_v45 = vpop.f32.mrf.mxu3  ;;  %v3087_v38 = vpop.f32.mrf.mxu2 }
 0x5b0   : > { %v3088_v41 = vadd.f32 %v3087_v38, %v2975_v42 }
 0x5b1   : > { %v3519_v51 = vsel %vm3455_vm7, %v3406_v54, %v3487_v58  ;;  %v3198_v54 = vadd.f32 %v3197_v45, %v3085_v16 }
 0x5b2   : > { %3551 = vst [vmem:[%s5745_s30 + $0xb8] sm:$0xff] %v3519_v51 }
 0x5b3   : > { %v3311_v53 = vadd.f32 %v3310_v26, %v3198_v54 }
 0x5b4   : > { %v3408_v34 = vpop.f32.mrf.mxu1 }
 0x5b5   : > { %v3409_v22 = vadd.f32 %v3408_v34, %v3296_v18  ;;  %v3313_v18 = vpop.f32.mrf.mxu0 }
 0x5b7   : > { %vm3456_vm8 = vcmp.ge.f32.partialorder %v3409_v22, 0.0  ;;  %v3488_v15 = vmul.f32 0.2, %v3409_v22  ;;  %v3200_v28 = vpop.f32.mrf.mxu3 }
 0x5b8   : > { %v3201_v46 = vadd.f32 %v3200_v28, %v3088_v41 }
 0x5b9   : > { %v3520_v3 = vsel %vm3456_vm8, %v3409_v22, %v3488_v15  ;;  %v3090_v22 = vpop.f32.mrf.mxu2 }
 0x5ba   : > { %3552 = vst [vmem:[%s5745_s30 + $0xc0] sm:$0xff] %v3520_v3  ;;  %v3314_v5 = vadd.f32 %v3313_v18, %v3201_v46  ;;  %v3091_v39 = vadd.f32 %v3090_v22, %v2978_v31 }
 0x5bc   : > { %v3411_v24 = vpop.f32.mrf.mxu1 }
 0x5bd   : > { %v3412_v17 = vadd.f32 %v3411_v24, %v3299_v9  ;;  %v3316_v2 = vpop.f32.mrf.mxu0 }
 0x5bf   : > { %vm3457_vm9 = vcmp.ge.f32.partialorder %v3412_v17, 0.0  ;;  %v3489_v47 = vmul.f32 0.2, %v3412_v17  ;;  %v3203_v15 = vpop.f32.mrf.mxu3 }
 0x5c0   : > { %v3204_v44 = vadd.f32 %v3203_v15, %v3091_v39 }
 0x5c1   : > { %v3521_v7 = vsel %vm3457_vm9, %v3412_v17, %v3489_v47 }
 0x5c2   : > { %3553 = vst [vmem:[%s5745_s30 + $0xc8] sm:$0xff] %v3521_v7  ;;  %v3317_v6 = vadd.f32 %v3316_v2, %v3204_v44 }
 0x5c4   : > { %v3414_v63 = vpop.f32.mrf.mxu1 }
 0x5c5   : > { %v3415_v57 = vadd.f32 %v3414_v63, %v3302_v55 }
 0x5c7   : > { %vm3458_vm10 = vcmp.ge.f32.partialorder %v3415_v57, 0.0  ;;  %v3490_v14 = vmul.f32 0.2, %v3415_v57 }
 0x5c9   : > { %v3522_v13 = vsel %vm3458_vm10, %v3415_v57, %v3490_v14 }
 0x5ca   : > { %3554 = vst [vmem:[%s5745_s30 + $0xd0] sm:$0xff] %v3522_v13 }
 0x5cc   : > { %v3417_v1 = vpop.f32.mrf.mxu1 }
 0x5cd   : > { %v3418_v35 = vadd.f32 %v3417_v1, %v3305_v30 }
 0x5cf   : > { %vm3459_vm11 = vcmp.ge.f32.partialorder %v3418_v35, 0.0  ;;  %v3491_v0 = vmul.f32 0.2, %v3418_v35 }
 0x5d1   : > { %v3523_v61 = vsel %vm3459_vm11, %v3418_v35, %v3491_v0 }
 0x5d2   : > { %3555 = vst [vmem:[%s5745_s30 + $0xd8] sm:$0xff] %v3523_v61 }
 0x5d4   : > { %v3420_v33 = vpop.f32.mrf.mxu1 }
 0x5d5   : > { %v3421_v59 = vadd.f32 %v3420_v33, %v3308_v12 }
 0x5d7   : > { %vm3460_vm12 = vcmp.ge.f32.partialorder %v3421_v59, 0.0  ;;  %v3492_v10 = vmul.f32 0.2, %v3421_v59 }
 0x5d9   : > { %v3524_v58 = vsel %vm3460_vm12, %v3421_v59, %v3492_v10 }
 0x5da   : > { %3556 = vst [vmem:[%s5745_s30 + $0xe0] sm:$0xff] %v3524_v58 }
 0x5dc   : > { %v3423_v51 = vpop.f32.mrf.mxu1 }
 0x5dd   : > { %v3424_v19 = vadd.f32 %v3423_v51, %v3311_v53 }
 0x5df   : > { %vm3461_vm13 = vcmp.ge.f32.partialorder %v3424_v19, 0.0  ;;  %v3493_v34 = vmul.f32 0.2, %v3424_v19 }
 0x5e1   : > { %v3525_v4 = vsel %vm3461_vm13, %v3424_v19, %v3493_v34 }
 0x5e2   : > { %3557 = vst [vmem:[%s5745_s30 + $0xe8] sm:$0xff] %v3525_v4 }
 0x5e4   : > { %v3426_v20 = vpop.f32.mrf.mxu1 }
 0x5e5   : > { %v3427_v49 = vadd.f32 %v3426_v20, %v3314_v5 }
 0x5e7   : > { %vm3462_vm14 = vcmp.ge.f32.partialorder %v3427_v49, 0.0  ;;  %v3494_v3 = vmul.f32 0.2, %v3427_v49 }
 0x5e9   : > { %v3526_v9 = vsel %vm3462_vm14, %v3427_v49, %v3494_v3 }
 0x5ea   : > { %3558 = vst [vmem:[%s5745_s30 + $0xf0] sm:$0xff] %v3526_v9 }
 0x5ec   : > { %v3429_v8 = vpop.f32.mrf.mxu1 }
 0x5ed   : > { %v3430_v24 = vadd.f32 %v3429_v8, %v3317_v6 }
 0x5ef   : > { %vm3463_vm15 = vcmp.ge.f32.partialorder %v3430_v24, 0.0  ;;  %v3495_v17 = vmul.f32 0.2, %v3430_v24 }
 0x5f1   : > { %v3527_v52 = vsel %vm3463_vm15, %v3430_v24, %v3495_v17 }
 0x5f2   : > { %3559 = vst [vmem:[%s5745_s30 + $0xf8] sm:$0xff] %v3527_v52 }
 0x5f3   : > { %3918 = shalt.err (!%p3915_p10)
}
 0x5f4   : > { %s3968_s8 = smov 128   ;;  %s3969_s27 = smov 8  }
 0x5f5   : > { %3730 = dma.vmem_to_hbm [thread:$0]  (%p4072_p3), %s3574_s16, 4096, %s3576_s28, %s3561_s22, %s3968_s8, %s3968_s8, %s3969_s27  }
 0x5f6 PF: > { %s3590_s30 = sand.u32 1, %s3949_s18   ;;  %p6022_p12 = scmp.ge.s32.totalorder %s3961_s21, 2 }
 0x5f7   : > { %s3591_s6 = scalar_lea.sflag [#allocation5], %s3590_s30 }
 0x5f8   : > { %p3744_p13 = pnand %p6022_p12, %p4035_p6 }
 0x5fa   : > { %p3745_p0 = pneg %p3744_p13 }
 0x5fc   : > { %3944 = dma.done.wait (%p3745_p0), %s3591_s6, 4096  }
 0x5fd   : > { %3946 = vsyncadd (%p3745_p0), %s3591_s6, 4294963200  ;;  %p19_p5 = scmp.ge.s32.totalorder %s4062_s14, 4   ;;  %s6023_s18 = smov %s3953_s19 }
 0x5fe   : > { %s6024_s19 = smov %s3957_s20  ;;  %s6025_s20 = smov %s4078_s23 }
 0x5ff   : > { %s6026_s21 = smov %s4062_s14  ;;  %21 = sbr.rel (!%p19_p5) target bundleno = 6 (0x6), region = 95 }
 0x604   :  { %3597 = vsyncpa [#allocation4], 1 }
 0x605   :  { %3599 = vsyncpa [#allocation4 + $0x1], 1 }
 0x606   :  { %3600 = vsyncpa [#allocation7], 1 }
 0x607   :  { %3601 = vsyncpa [#allocation5], 1 }
 0x608   :  { %3603 = vsyncpa [#allocation5 + $0x1], 1 }

</bundles_post_ra>
